<compile_context>
chip_gen: v5e
topology: v5e:2x2
jax: 0.10.0
libtpu: 0.0.40
codegen_flags: <defaults>
</compile_context>

<pallas_src>
import jax
import jax.numpy as jnp
from jax.experimental import pallas as pl
from jax.experimental.pallas import tpu as pltpu

# 3x3x3 Sobel kernels (indexed [kd][kh][kw]) -- used by the pure-JAX reference.
SOBEL_X = (
    ((-1, 0, 1), (-3, 0, 3), (-1, 0, 1)),
    ((-3, 0, 3), (-6, 0, 6), (-3, 0, 3)),
    ((-1, 0, 1), (-3, 0, 3), (-1, 0, 1)),
)
SOBEL_Y = (
    ((-1, -3, -1), (0, 0, 0), (1, 3, 1)),
    ((-3, -6, -3), (0, 0, 0), (3, 6, 3)),
    ((-1, -3, -1), (0, 0, 0), (1, 3, 1)),
)
SOBEL_Z = (
    ((-1, -3, -1), (-3, -6, -3), (-1, -3, -1)),
    ((0, 0, 0), (0, 0, 0), (0, 0, 0)),
    ((1, 3, 1), (3, 6, 3), (1, 3, 1)),
)


def _hybrid_loss_kernel(p_ref, t_ref, pp_ref, tp_ref, pn_ref, tn_ref,
                        a_s_ref, a_d_ref, out_ref, e_ref):
    """Partial sums for one (batch, D-slab) step: sum((p-t)^2), sum|gx|+|gy|+|gz|."""
    s = pl.program_id(1)
    ns = pl.num_programs(1)
    _, TD, H, W = p_ref.shape
    TDp = TD + 2
    Hpa = e_ref.shape[1]  # H + 2 rounded up to a multiple of 8

    # Interior diff (conv is linear: conv(p) - conv(t) == conv(p - t)).
    d = p_ref[0] - t_ref[0]                                     # (TD, H, W)
    sq_sum = jnp.sum(d * d)

    # Padded diff slab.  Only the halo faces / pad rows are zeroed (surface
    # work); every element the stencil reads is written every step, so there is
    # no full-buffer memset and no first-iteration guard (megacore-safe).
    e_ref[:, 0:1, :] = jnp.zeros((TDp, 1, W), jnp.float32)
    e_ref[:, H + 1:Hpa, :] = jnp.zeros((TDp, Hpa - H - 1, W), jnp.float32)
    prev_d = jnp.where(s > 0, pp_ref[0] - tp_ref[0], 0.0)        # (1, H, W)
    next_d = jnp.where(s < ns - 1, pn_ref[0] - tn_ref[0], 0.0)   # (1, H, W)
    e_ref[0:1, 1:H + 1, :] = prev_d
    e_ref[TD + 1:TD + 2, 1:H + 1, :] = next_d
    e_ref[1:TD + 1, 1:H + 1, :] = d

    # Lane-axis (W) Sobel taps on the MXU: zero padding is baked into the
    # banded [W, W] matrices, so there is no W halo and no lane shifts.
    # Hpa % 8 == 0 makes the (TDp, Hpa, W) <-> (TDp*Hpa, W) reshape layout-free.
    e2 = e_ref[...].reshape(TDp * Hpa, W)
    u = jnp.dot(e2, a_d_ref[...], preferred_element_type=jnp.float32,
                precision=jax.lax.Precision.HIGHEST).reshape(TDp, Hpa, W)
    sw = jnp.dot(e2, a_s_ref[...], preferred_element_type=jnp.float32,
                 precision=jax.lax.Precision.HIGHEST).reshape(TDp, Hpa, W)

    # gx = (S_d (x) S_h - 3*delta_d delta_h) (x) D_w   applied to the diff.
    sh = u[:, 0:H, :] + 3.0 * u[:, 1:H + 1, :] + u[:, 2:H + 2, :]   # (TDp,H,W)
    gx = (sh[0:TD] + 3.0 * sh[1:TD + 1] + sh[2:TD + 2]
          - 3.0 * u[1:TD + 1, 1:H + 1, :])
    g_abs = jnp.abs(gx)

    # gy = D_h (x) (S_d (x) S_w - 3*delta_d delta_w)
    dh = sw[:, 2:H + 2, :] - sw[:, 0:H, :]                          # (TDp,H,W)
    gy = (dh[0:TD] + 3.0 * dh[1:TD + 1] + dh[2:TD + 2]
          - 3.0 * (e_ref[1:TD + 1, 2:H + 2, :] - e_ref[1:TD + 1, 0:H, :]))
    g_abs = g_abs + jnp.abs(gy)

    # gz = D_d (x) (S_h (x) S_w - 3*delta_h delta_w)
    shw = sw[:, 0:H, :] + 3.0 * sw[:, 1:H + 1, :] + sw[:, 2:H + 2, :]
    gz = (shw[2:TD + 2] - shw[0:TD]
          - 3.0 * (e_ref[2:TD + 2, 1:H + 1, :] - e_ref[0:TD, 1:H + 1, :]))
    g_abs = g_abs + jnp.abs(gz)

    abs_sum = jnp.sum(g_abs)   # single cross-lane reduction for all 3 terms

    # Lane-dense (8, 128) partial-sum slab: lane 0 = sum(d^2), lane 1 = sum|grad|.
    row = jax.lax.broadcasted_iota(jnp.int32, (8, 128), 0)
    lane = jax.lax.broadcasted_iota(jnp.int32, (8, 128), 1)
    flat = row * 128 + lane
    out_ref[0, 0] = (jnp.where(flat == 0, sq_sum, 0.0)
                     + jnp.where(flat == 1, abs_sum, 0.0))


def _pick_slab(D, target):
    """Largest divisor of D that is <= target (always exists; worst case 1)."""
    td = min(D, target)
    while D % td:
        td -= 1
    return td


def hybrid_gradient_loss(pred, target, alpha=0.5, beta=0.5, slab_planes=16):
    """pred, target: [B, C, D, H, W] with C == 1 (NCDHW, as in the PyTorch module)."""
    assert pred.shape == target.shape
    B, C, D, H, W = pred.shape
    assert C == 1, "Sobel conv3d weights have in_channels=1 -> C must be 1"

    p = jnp.asarray(pred, jnp.float32).reshape(B, D, H, W)
    t = jnp.asarray(target, jnp.float32).reshape(B, D, H, W)

    TD = _pick_slab(D, slab_planes)
    nD = D // TD
    Hpa = ((H + 2 + 7) // 8) * 8

    # Banded [W, W] matrices: zero-padded 3-tap smooth S_w=[1,3,1] and central
    # difference D_w=[-1,0,1], applied as right-matmuls on the lane axis.
    i = jnp.arange(W)[:, None]
    j = jnp.arange(W)[None, :]
    a_s = (jnp.where(i == j, 3.0, 0.0)
           + jnp.where(jnp.abs(i - j) == 1, 1.0, 0.0)).astype(jnp.float32)
    a_d = (jnp.where(i == j + 1, 1.0, 0.0)
           + jnp.where(i == j - 1, -1.0, 0.0)).astype(jnp.float32)

    # Scoped-VMEM budget: double-buffered blocks + scratch + temp headroom.
    est_bytes = 4 * (
        2 * 2 * TD * H * W            # double-buffered pred/target slabs
        + 4 * 2 * H * W               # double-buffered halo planes
        + 2 * 2 * W * W               # banded matrices
        + 10 * (TD + 2) * Hpa * W     # padded scratch + stencil/matmul temps
        + 2 * 8 * 128)                # output slab
    vmem_limit = int(min(max(est_bytes, 32 * 1024 * 1024), 64 * 1024 * 1024))

    slab_map = lambda b, s: (b, s, 0, 0)
    prev_map = lambda b, s: (b, jnp.maximum(s * TD - 1, 0), 0, 0)
    next_map = lambda b, s: (b, jnp.minimum((s + 1) * TD, D - 1), 0, 0)

    partials = pl.pallas_call(
        _hybrid_loss_kernel,
        out_shape=jax.ShapeDtypeStruct((B, nD, 8, 128), jnp.float32),
        grid=(B, nD),
        in_specs=[
            pl.BlockSpec((1, TD, H, W), slab_map),       # pred slab
            pl.BlockSpec((1, TD, H, W), slab_map),       # target slab
            pl.BlockSpec((1, 1, H, W), prev_map),        # pred prev halo plane
            pl.BlockSpec((1, 1, H, W), prev_map),        # target prev halo plane
            pl.BlockSpec((1, 1, H, W), next_map),        # pred next halo plane
            pl.BlockSpec((1, 1, H, W), next_map),        # target next halo plane
            pl.BlockSpec((W, W), lambda b, s: (0, 0)),   # S_w banded matrix
            pl.BlockSpec((W, W), lambda b, s: (0, 0)),   # D_w banded matrix
        ],
        out_specs=pl.BlockSpec((1, 1, 8, 128), lambda b, s: (b, s, 0, 0)),
        scratch_shapes=[pltpu.VMEM((TD + 2, Hpa, W), jnp.float32)],
        compiler_params=pltpu.CompilerParams(
            dimension_semantics=("parallel", "parallel"),
            vmem_limit_bytes=vmem_limit),
    )(p, t, p, t, p, t, a_s, a_d)

    sums = jnp.sum(partials[:, :, 0, :2], axis=(0, 1))   # [sum d^2, sum |grad|]
    n = float(B * D * H * W)                              # C == 1
    return alpha * sums[0] / n + beta * sums[1] / n


# -------- pure-JAX reference (mirrors the PyTorch ops) for verification -----
def _reference(pred, target, alpha=0.5, beta=0.5):
    B, C, D, H, W = pred.shape
    p = jnp.asarray(pred, jnp.float32).reshape(B, D, H, W)
    t = jnp.asarray(target, jnp.float32).reshape(B, D, H, W)
    pad = ((0, 0), (1, 1), (1, 1), (1, 1))
    pp, tp = jnp.pad(p, pad), jnp.pad(t, pad)

    def conv(x, k):
        out = jnp.zeros((B, D, H, W), jnp.float32)
        for kd in range(3):
            for kh in range(3):
                for kw in range(3):
                    w = float(k[kd][kh][kw])
                    if w != 0.0:
                        out = out + w * x[:, kd:kd + D, kh:kh + H, kw:kw + W]
        return out

    mse = jnp.mean((p - t) ** 2)
    g = 0.0
    for k in (SOBEL_X, SOBEL_Y, SOBEL_Z):
        g = g + jnp.mean(jnp.abs(conv(pp, k) - conv(tp, k)))
    return alpha * mse + beta * g


if __name__ == "__main__":
    key = jax.random.PRNGKey(0)
    k1, k2 = jax.random.split(key)
    # Small NCDHW inputs consistent with the module (C must be 1).
    pred = jax.random.normal(k1, (2, 1, 8, 16, 16), dtype=jnp.float32)
    target = jax.random.normal(k2, (2, 1, 8, 16, 16), dtype=jnp.float32)

    ref = jax.block_until_ready(_reference(pred, target, 0.5, 0.5))

    # Single-slab path (whole D fits in one slab).
    loss1 = jax.block_until_ready(hybrid_gradient_loss(pred, target, 0.5, 0.5))
    assert jnp.allclose(loss1, ref, rtol=1e-4, atol=1e-4), (loss1, ref)

    # Multi-slab path (exercises the D halo exchange and boundary zeroing).
    loss2 = jax.block_until_ready(
        hybrid_gradient_loss(pred, target, 0.5, 0.5, slab_planes=2))
    assert jnp.allclose(loss2, ref, rtol=1e-4, atol=1e-4), (loss2, ref)

    print("KERNEL_OK")
</pallas_src>

<mosaic_0001>
module attributes {stable_mosaic.version = 11 : i64} {
  func.func @_hybrid_loss_kernel(%arg0: i32, %arg1: i32, %arg2: memref<1x8x16x16xf32, #tpu.memory_space<vmem>>, %arg3: memref<1x8x16x16xf32, #tpu.memory_space<vmem>>, %arg4: memref<1x1x16x16xf32, #tpu.memory_space<vmem>>, %arg5: memref<1x1x16x16xf32, #tpu.memory_space<vmem>>, %arg6: memref<1x1x16x16xf32, #tpu.memory_space<vmem>>, %arg7: memref<1x1x16x16xf32, #tpu.memory_space<vmem>>, %arg8: memref<16x16xf32, #tpu.memory_space<vmem>>, %arg9: memref<16x16xf32, #tpu.memory_space<vmem>>, %arg10: memref<1x1x8x128xf32, #tpu.memory_space<vmem>>, %arg11: memref<10x24x16xf32, #tpu.memory_space<vmem>>) attributes {dimension_semantics = [#tpu.dimension_semantics<parallel>, #tpu.dimension_semantics<parallel>], iteration_bounds = array<i64: 2, 1>, scalar_prefetch = 0 : i64, scratch_operands = 1 : i64, tpu.core_type = #tpu.core_type<tc>, window_params = [{transform_indices = @transform_0, window_bounds = array<i64: 1, 8, 16, 16>}, {transform_indices = @transform_1, window_bounds = array<i64: 1, 8, 16, 16>}, {transform_indices = @transform_2, window_bounds = array<i64: 1, 1, 16, 16>}, {transform_indices = @transform_3, window_bounds = array<i64: 1, 1, 16, 16>}, {transform_indices = @transform_4, window_bounds = array<i64: 1, 1, 16, 16>}, {transform_indices = @transform_5, window_bounds = array<i64: 1, 1, 16, 16>}, {pipeline_mode = #tpu.pipeline_mode<synchronous>, transform_indices = @transform_6, window_bounds = array<i64: 16, 16>}, {pipeline_mode = #tpu.pipeline_mode<synchronous>, transform_indices = @transform_7, window_bounds = array<i64: 16, 16>}, {transform_indices = @transform_8, window_bounds = array<i64: 1, 1, 8, 128>}]} {
    %c0 = arith.constant 0 : index
    %c0_0 = arith.constant 0 : index
    %c0_1 = arith.constant 0 : index
    %c0_2 = arith.constant 0 : index
    %0 = vector.load %arg2[%c0, %c0_0, %c0_1, %c0_2] : memref<1x8x16x16xf32, #tpu.memory_space<vmem>>, vector<1x8x16x16xf32>
    %1 = vector.shape_cast %0 : vector<1x8x16x16xf32> to vector<8x16x16xf32>
    %c0_3 = arith.constant 0 : index
    %c0_4 = arith.constant 0 : index
    %c0_5 = arith.constant 0 : index
    %c0_6 = arith.constant 0 : index
    %2 = vector.load %arg3[%c0_3, %c0_4, %c0_5, %c0_6] : memref<1x8x16x16xf32, #tpu.memory_space<vmem>>, vector<1x8x16x16xf32>
    %3 = vector.shape_cast %2 : vector<1x8x16x16xf32> to vector<8x16x16xf32>
    %4 = arith.subf %1, %3 : vector<8x16x16xf32>
    %5 = arith.mulf %4, %4 : vector<8x16x16xf32>
    %6 = vector.shape_cast %5 : vector<8x16x16xf32> to vector<1x8x16x16xf32>
    %cst = arith.constant dense<0.000000e+00> : vector<1xf32>
    %7 = vector.multi_reduction <add>, %6, %cst [1, 2, 3] : vector<1x8x16x16xf32> to vector<1xf32>
    %8 = vector.shape_cast %7 : vector<1xf32> to vector<1x1x1x1xf32>
    %9 = vector.extract %8[0, 0, 0, 0] : f32 from vector<1x1x1x1xf32>
    %cst_7 = arith.constant 0.000000e+00 : f32
    %10 = vector.broadcast %cst_7 : f32 to vector<10x1x16xf32>
    %c0_8 = arith.constant 0 : index
    %c0_9 = arith.constant 0 : index
    %c0_10 = arith.constant 0 : index
    %11 = vector.load %arg11[%c0_8, %c0_9, %c0_10] : memref<10x24x16xf32, #tpu.memory_space<vmem>>, vector<10x1x16xf32>
    tpu.vector_store %arg11[%c0_8, %c0_9, %c0_10], %10 {strides = array<i32>} : memref<10x24x16xf32, #tpu.memory_space<vmem>>, vector<10x1x16xf32>,
    %cst_11 = arith.constant 0.000000e+00 : f32
    %12 = vector.broadcast %cst_11 : f32 to vector<10x7x16xf32>
    %c0_12 = arith.constant 0 : index
    %c17 = arith.constant 17 : index
    %c0_13 = arith.constant 0 : index
    %13 = vector.load %arg11[%c0_12, %c17, %c0_13] : memref<10x24x16xf32, #tpu.memory_space<vmem>>, vector<10x7x16xf32>
    tpu.vector_store %arg11[%c0_12, %c17, %c0_13], %12 {strides = array<i32>} : memref<10x24x16xf32, #tpu.memory_space<vmem>>, vector<10x7x16xf32>,
    %c0_i32 = arith.constant 0 : i32
    %14 = arith.cmpi sgt, %arg1, %c0_i32 : i32
    %c0_14 = arith.constant 0 : index
    %c0_15 = arith.constant 0 : index
    %c0_16 = arith.constant 0 : index
    %c0_17 = arith.constant 0 : index
    %15 = vector.load %arg4[%c0_14, %c0_15, %c0_16, %c0_17] : memref<1x1x16x16xf32, #tpu.memory_space<vmem>>, vector<1x1x16x16xf32>
    %16 = vector.shape_cast %15 : vector<1x1x16x16xf32> to vector<1x16x16xf32>
    %c0_18 = arith.constant 0 : index
    %c0_19 = arith.constant 0 : index
    %c0_20 = arith.constant 0 : index
    %c0_21 = arith.constant 0 : index
    %17 = vector.load %arg5[%c0_18, %c0_19, %c0_20, %c0_21] : memref<1x1x16x16xf32, #tpu.memory_space<vmem>>, vector<1x1x16x16xf32>
    %18 = vector.shape_cast %17 : vector<1x1x16x16xf32> to vector<1x16x16xf32>
    %19 = arith.subf %16, %18 : vector<1x16x16xf32>
    %cst_22 = arith.constant 0.000000e+00 : f32
    %20 = vector.broadcast %cst_22 : f32 to vector<1x16x16xf32>
    %21 = arith.select %14, %19, %20 : vector<1x16x16xf32>
    %c0_i32_23 = arith.constant 0 : i32
    %22 = arith.cmpi slt, %arg1, %c0_i32_23 : i32
    %c0_24 = arith.constant 0 : index
    %c0_25 = arith.constant 0 : index
    %c0_26 = arith.constant 0 : index
    %c0_27 = arith.constant 0 : index
    %23 = vector.load %arg6[%c0_24, %c0_25, %c0_26, %c0_27] : memref<1x1x16x16xf32, #tpu.memory_space<vmem>>, vector<1x1x16x16xf32>
    %24 = vector.shape_cast %23 : vector<1x1x16x16xf32> to vector<1x16x16xf32>
    %c0_28 = arith.constant 0 : index
    %c0_29 = arith.constant 0 : index
    %c0_30 = arith.constant 0 : index
    %c0_31 = arith.constant 0 : index
    %25 = vector.load %arg7[%c0_28, %c0_29, %c0_30, %c0_31] : memref<1x1x16x16xf32, #tpu.memory_space<vmem>>, vector<1x1x16x16xf32>
    %26 = vector.shape_cast %25 : vector<1x1x16x16xf32> to vector<1x16x16xf32>
    %27 = arith.subf %24, %26 : vector<1x16x16xf32>
    %cst_32 = arith.constant 0.000000e+00 : f32
    %28 = vector.broadcast %cst_32 : f32 to vector<1x16x16xf32>
    %29 = arith.select %22, %27, %28 : vector<1x16x16xf32>
    %c0_33 = arith.constant 0 : index
    %c1 = arith.constant 1 : index
    %c0_34 = arith.constant 0 : index
    %30 = vector.load %arg11[%c0_33, %c1, %c0_34] : memref<10x24x16xf32, #tpu.memory_space<vmem>>, vector<1x16x16xf32>
    tpu.vector_store %arg11[%c0_33, %c1, %c0_34], %21 {strides = array<i32>} : memref<10x24x16xf32, #tpu.memory_space<vmem>>, vector<1x16x16xf32>,
    %c9 = arith.constant 9 : index
    %c1_35 = arith.constant 1 : index
    %c0_36 = arith.constant 0 : index
    %31 = vector.load %arg11[%c9, %c1_35, %c0_36] : memref<10x24x16xf32, #tpu.memory_space<vmem>>, vector<1x16x16xf32>
    tpu.vector_store %arg11[%c9, %c1_35, %c0_36], %29 {strides = array<i32>} : memref<10x24x16xf32, #tpu.memory_space<vmem>>, vector<1x16x16xf32>,
    %c1_37 = arith.constant 1 : index
    %c1_38 = arith.constant 1 : index
    %c0_39 = arith.constant 0 : index
    %32 = vector.load %arg11[%c1_37, %c1_38, %c0_39] : memref<10x24x16xf32, #tpu.memory_space<vmem>>, vector<8x16x16xf32>
    tpu.vector_store %arg11[%c1_37, %c1_38, %c0_39], %4 {strides = array<i32>} : memref<10x24x16xf32, #tpu.memory_space<vmem>>, vector<8x16x16xf32>,
    %c0_40 = arith.constant 0 : index
    %c0_41 = arith.constant 0 : index
    %c0_42 = arith.constant 0 : index
    %33 = vector.load %arg11[%c0_40, %c0_41, %c0_42] : memref<10x24x16xf32, #tpu.memory_space<vmem>>, vector<10x24x16xf32>
    %34 = vector.shape_cast %33 : vector<10x24x16xf32> to vector<240x16xf32>
    %c0_43 = arith.constant 0 : index
    %c0_44 = arith.constant 0 : index
    %35 = vector.load %arg9[%c0_43, %c0_44] : memref<16x16xf32, #tpu.memory_space<vmem>>, vector<16x16xf32>
    %cst_45 = arith.constant dense<0.000000e+00> : vector<240x16xf32>
    %36 = tpu.matmul %34, %35, %cst_45 {dimension_numbers = #tpu.dot_dimension_numbers<[1], [0], [0], [1], [0, 0, 1, 1], [], []>, precision = #tpu.contract_precision<fp32>} : vector<240x16xf32>, vector<16x16xf32>, vector<240x16xf32> -> vector<240x16xf32>
    %37 = vector.shape_cast %36 : vector<240x16xf32> to vector<10x24x16xf32>
    %c0_46 = arith.constant 0 : index
    %c0_47 = arith.constant 0 : index
    %38 = vector.load %arg8[%c0_46, %c0_47] : memref<16x16xf32, #tpu.memory_space<vmem>>, vector<16x16xf32>
    %cst_48 = arith.constant dense<0.000000e+00> : vector<240x16xf32>
    %39 = tpu.matmul %34, %38, %cst_48 {dimension_numbers = #tpu.dot_dimension_numbers<[1], [0], [0], [1], [0, 0, 1, 1], [], []>, precision = #tpu.contract_precision<fp32>} : vector<240x16xf32>, vector<16x16xf32>, vector<240x16xf32> -> vector<240x16xf32>
    %40 = vector.shape_cast %39 : vector<240x16xf32> to vector<10x24x16xf32>
    %41 = vector.extract_strided_slice %37 {offsets = [0, 0, 0], sizes = [10, 16, 16], strides = [1, 1, 1]} : vector<10x24x16xf32> to vector<10x16x16xf32>
    %42 = vector.extract_strided_slice %37 {offsets = [0, 1, 0], sizes = [10, 16, 16], strides = [1, 1, 1]} : vector<10x24x16xf32> to vector<10x16x16xf32>
    %cst_49 = arith.constant 3.000000e+00 : f32
    %43 = vector.broadcast %cst_49 : f32 to vector<10x16x16xf32>
    %44 = arith.mulf %43, %42 : vector<10x16x16xf32>
    %45 = arith.addf %41, %44 : vector<10x16x16xf32>
    %46 = vector.extract_strided_slice %37 {offsets = [0, 2, 0], sizes = [10, 16, 16], strides = [1, 1, 1]} : vector<10x24x16xf32> to vector<10x16x16xf32>
    %47 = arith.addf %45, %46 : vector<10x16x16xf32>
    %48 = vector.extract_strided_slice %47 {offsets = [0, 0, 0], sizes = [8, 16, 16], strides = [1, 1, 1]} : vector<10x16x16xf32> to vector<8x16x16xf32>
    %49 = vector.extract_strided_slice %47 {offsets = [1, 0, 0], sizes = [8, 16, 16], strides = [1, 1, 1]} : vector<10x16x16xf32> to vector<8x16x16xf32>
    %cst_50 = arith.constant 3.000000e+00 : f32
    %50 = vector.broadcast %cst_50 : f32 to vector<8x16x16xf32>
    %51 = arith.mulf %50, %49 : vector<8x16x16xf32>
    %52 = arith.addf %48, %51 : vector<8x16x16xf32>
    %53 = vector.extract_strided_slice %47 {offsets = [2, 0, 0], sizes = [8, 16, 16], strides = [1, 1, 1]} : vector<10x16x16xf32> to vector<8x16x16xf32>
    %54 = arith.addf %52, %53 : vector<8x16x16xf32>
    %55 = vector.extract_strided_slice %37 {offsets = [1, 1, 0], sizes = [8, 16, 16], strides = [1, 1, 1]} : vector<10x24x16xf32> to vector<8x16x16xf32>
    %cst_51 = arith.constant 3.000000e+00 : f32
    %56 = vector.broadcast %cst_51 : f32 to vector<8x16x16xf32>
    %57 = arith.mulf %56, %55 : vector<8x16x16xf32>
    %58 = arith.subf %54, %57 : vector<8x16x16xf32>
    %59 = math.absf %58 : vector<8x16x16xf32>
    %60 = vector.extract_strided_slice %40 {offsets = [0, 2, 0], sizes = [10, 16, 16], strides = [1, 1, 1]} : vector<10x24x16xf32> to vector<10x16x16xf32>
    %61 = vector.extract_strided_slice %40 {offsets = [0, 0, 0], sizes = [10, 16, 16], strides = [1, 1, 1]} : vector<10x24x16xf32> to vector<10x16x16xf32>
    %62 = arith.subf %60, %61 : vector<10x16x16xf32>
    %63 = vector.extract_strided_slice %62 {offsets = [0, 0, 0], sizes = [8, 16, 16], strides = [1, 1, 1]} : vector<10x16x16xf32> to vector<8x16x16xf32>
    %64 = vector.extract_strided_slice %62 {offsets = [1, 0, 0], sizes = [8, 16, 16], strides = [1, 1, 1]} : vector<10x16x16xf32> to vector<8x16x16xf32>
    %cst_52 = arith.constant 3.000000e+00 : f32
    %65 = vector.broadcast %cst_52 : f32 to vector<8x16x16xf32>
    %66 = arith.mulf %65, %64 : vector<8x16x16xf32>
    %67 = arith.addf %63, %66 : vector<8x16x16xf32>
    %68 = vector.extract_strided_slice %62 {offsets = [2, 0, 0], sizes = [8, 16, 16], strides = [1, 1, 1]} : vector<10x16x16xf32> to vector<8x16x16xf32>
    %69 = arith.addf %67, %68 : vector<8x16x16xf32>
    %c1_53 = arith.constant 1 : index
    %c2 = arith.constant 2 : index
    %c0_54 = arith.constant 0 : index
    %70 = vector.load %arg11[%c1_53, %c2, %c0_54] : memref<10x24x16xf32, #tpu.memory_space<vmem>>, vector<8x16x16xf32>
    %c1_55 = arith.constant 1 : index
    %c0_56 = arith.constant 0 : index
    %c0_57 = arith.constant 0 : index
    %71 = vector.load %arg11[%c1_55, %c0_56, %c0_57] : memref<10x24x16xf32, #tpu.memory_space<vmem>>, vector<8x16x16xf32>
    %72 = arith.subf %70, %71 : vector<8x16x16xf32>
    %cst_58 = arith.constant 3.000000e+00 : f32
    %73 = vector.broadcast %cst_58 : f32 to vector<8x16x16xf32>
    %74 = arith.mulf %73, %72 : vector<8x16x16xf32>
    %75 = arith.subf %69, %74 : vector<8x16x16xf32>
    %76 = math.absf %75 : vector<8x16x16xf32>
    %77 = arith.addf %59, %76 : vector<8x16x16xf32>
    %78 = vector.extract_strided_slice %40 {offsets = [0, 0, 0], sizes = [10, 16, 16], strides = [1, 1, 1]} : vector<10x24x16xf32> to vector<10x16x16xf32>
    %79 = vector.extract_strided_slice %40 {offsets = [0, 1, 0], sizes = [10, 16, 16], strides = [1, 1, 1]} : vector<10x24x16xf32> to vector<10x16x16xf32>
    %cst_59 = arith.constant 3.000000e+00 : f32
    %80 = vector.broadcast %cst_59 : f32 to vector<10x16x16xf32>
    %81 = arith.mulf %80, %79 : vector<10x16x16xf32>
    %82 = arith.addf %78, %81 : vector<10x16x16xf32>
    %83 = vector.extract_strided_slice %40 {offsets = [0, 2, 0], sizes = [10, 16, 16], strides = [1, 1, 1]} : vector<10x24x16xf32> to vector<10x16x16xf32>
    %84 = arith.addf %82, %83 : vector<10x16x16xf32>
    %85 = vector.extract_strided_slice %84 {offsets = [2, 0, 0], sizes = [8, 16, 16], strides = [1, 1, 1]} : vector<10x16x16xf32> to vector<8x16x16xf32>
    %86 = vector.extract_strided_slice %84 {offsets = [0, 0, 0], sizes = [8, 16, 16], strides = [1, 1, 1]} : vector<10x16x16xf32> to vector<8x16x16xf32>
    %87 = arith.subf %85, %86 : vector<8x16x16xf32>
    %c2_60 = arith.constant 2 : index
    %c1_61 = arith.constant 1 : index
    %c0_62 = arith.constant 0 : index
    %88 = vector.load %arg11[%c2_60, %c1_61, %c0_62] : memref<10x24x16xf32, #tpu.memory_space<vmem>>, vector<8x16x16xf32>
    %c0_63 = arith.constant 0 : index
    %c1_64 = arith.constant 1 : index
    %c0_65 = arith.constant 0 : index
    %89 = vector.load %arg11[%c0_63, %c1_64, %c0_65] : memref<10x24x16xf32, #tpu.memory_space<vmem>>, vector<8x16x16xf32>
    %90 = arith.subf %88, %89 : vector<8x16x16xf32>
    %cst_66 = arith.constant 3.000000e+00 : f32
    %91 = vector.broadcast %cst_66 : f32 to vector<8x16x16xf32>
    %92 = arith.mulf %91, %90 : vector<8x16x16xf32>
    %93 = arith.subf %87, %92 : vector<8x16x16xf32>
    %94 = math.absf %93 : vector<8x16x16xf32>
    %95 = arith.addf %77, %94 : vector<8x16x16xf32>
    %96 = vector.shape_cast %95 : vector<8x16x16xf32> to vector<1x8x16x16xf32>
    %cst_67 = arith.constant dense<0.000000e+00> : vector<1xf32>
    %97 = vector.multi_reduction <add>, %96, %cst_67 [1, 2, 3] : vector<1x8x16x16xf32> to vector<1xf32>
    %98 = vector.shape_cast %97 : vector<1xf32> to vector<1x1x1x1xf32>
    %99 = vector.extract %98[0, 0, 0, 0] : f32 from vector<1x1x1x1xf32>
    %100 = tpu.iota {dimensions = array<i32: 0>} : vector<8x128xi32>
    %101 = tpu.iota {dimensions = array<i32: 1>} : vector<8x128xi32>
    %c128_i32 = arith.constant 128 : i32
    %102 = vector.broadcast %c128_i32 : i32 to vector<8x128xi32>
    %103 = arith.muli %100, %102 : vector<8x128xi32>
    %104 = arith.addi %103, %101 : vector<8x128xi32>
    %c0_i32_68 = arith.constant 0 : i32
    %105 = vector.broadcast %c0_i32_68 : i32 to vector<8x128xi32>
    %106 = arith.cmpi eq, %104, %105 : vector<8x128xi32>
    %cst_69 = arith.constant 0.000000e+00 : f32
    %107 = vector.broadcast %9 : f32 to vector<8x128xf32>
    %108 = vector.broadcast %cst_69 : f32 to vector<8x128xf32>
    %109 = arith.select %106, %107, %108 : vector<8x128xi1>, vector<8x128xf32>
    %c1_i32 = arith.constant 1 : i32
    %110 = vector.broadcast %c1_i32 : i32 to vector<8x128xi32>
    %111 = arith.cmpi eq, %104, %110 : vector<8x128xi32>
    %cst_70 = arith.constant 0.000000e+00 : f32
    %112 = vector.broadcast %99 : f32 to vector<8x128xf32>
    %113 = vector.broadcast %cst_70 : f32 to vector<8x128xf32>
    %114 = arith.select %111, %112, %113 : vector<8x128xi1>, vector<8x128xf32>
    %115 = arith.addf %109, %114 : vector<8x128xf32>
    %c0_71 = arith.constant 0 : index
    %c0_72 = arith.constant 0 : index
    %c0_73 = arith.constant 0 : index
    %c0_74 = arith.constant 0 : index
    %116 = vector.load %arg10[%c0_71, %c0_72, %c0_73, %c0_74] : memref<1x1x8x128xf32, #tpu.memory_space<vmem>>, vector<1x1x8x128xf32>
    %117 = vector.shape_cast %116 : vector<1x1x8x128xf32> to vector<8x128xf32>
    %118 = vector.shape_cast %115 : vector<8x128xf32> to vector<1x1x8x128xf32>
    tpu.vector_store %arg10[%c0_71, %c0_72, %c0_73, %c0_74], %118 {strides = array<i32>} : memref<1x1x8x128xf32, #tpu.memory_space<vmem>>, vector<1x1x8x128xf32>,
    return
  }
  func.func @transform_0(%arg0: i32, %arg1: i32) -> (i32, i32, i32, i32) {
    %c0_i32 = arith.constant 0 : i32
    %c0_i32_0 = arith.constant 0 : i32
    %c0_i32_1 = arith.constant 0 : i32
    return %arg0, %arg1, %c0_i32, %c0_i32_0 : i32, i32, i32, i32
  }
  func.func @transform_1(%arg0: i32, %arg1: i32) -> (i32, i32, i32, i32) {
    %c0_i32 = arith.constant 0 : i32
    %c0_i32_0 = arith.constant 0 : i32
    %c0_i32_1 = arith.constant 0 : i32
    return %arg0, %arg1, %c0_i32, %c0_i32_0 : i32, i32, i32, i32
  }
  func.func @transform_2(%arg0: i32, %arg1: i32) -> (i32, i32, i32, i32) {
    %c8_i32 = arith.constant 8 : i32
    %0 = arith.muli %arg1, %c8_i32 : i32
    %c1_i32 = arith.constant 1 : i32
    %1 = arith.subi %0, %c1_i32 : i32
    %c0_i32 = arith.constant 0 : i32
    %2 = arith.maxsi %1, %c0_i32 : i32
    %c0_i32_0 = arith.constant 0 : i32
    %c0_i32_1 = arith.constant 0 : i32
    %c0_i32_2 = arith.constant 0 : i32
    return %arg0, %2, %c0_i32_0, %c0_i32_1 : i32, i32, i32, i32
  }
  func.func @transform_3(%arg0: i32, %arg1: i32) -> (i32, i32, i32, i32) {
    %c8_i32 = arith.constant 8 : i32
    %0 = arith.muli %arg1, %c8_i32 : i32
    %c1_i32 = arith.constant 1 : i32
    %1 = arith.subi %0, %c1_i32 : i32
    %c0_i32 = arith.constant 0 : i32
    %2 = arith.maxsi %1, %c0_i32 : i32
    %c0_i32_0 = arith.constant 0 : i32
    %c0_i32_1 = arith.constant 0 : i32
    %c0_i32_2 = arith.constant 0 : i32
    return %arg0, %2, %c0_i32_0, %c0_i32_1 : i32, i32, i32, i32
  }
  func.func @transform_4(%arg0: i32, %arg1: i32) -> (i32, i32, i32, i32) {
    %c1_i32 = arith.constant 1 : i32
    %0 = arith.addi %arg1, %c1_i32 : i32
    %c8_i32 = arith.constant 8 : i32
    %1 = arith.muli %0, %c8_i32 : i32
    %c7_i32 = arith.constant 7 : i32
    %2 = arith.minsi %1, %c7_i32 : i32
    %c0_i32 = arith.constant 0 : i32
    %c0_i32_0 = arith.constant 0 : i32
    %c0_i32_1 = arith.constant 0 : i32
    return %arg0, %2, %c0_i32, %c0_i32_0 : i32, i32, i32, i32
  }
  func.func @transform_5(%arg0: i32, %arg1: i32) -> (i32, i32, i32, i32) {
    %c1_i32 = arith.constant 1 : i32
    %0 = arith.addi %arg1, %c1_i32 : i32
    %c8_i32 = arith.constant 8 : i32
    %1 = arith.muli %0, %c8_i32 : i32
    %c7_i32 = arith.constant 7 : i32
    %2 = arith.minsi %1, %c7_i32 : i32
    %c0_i32 = arith.constant 0 : i32
    %c0_i32_0 = arith.constant 0 : i32
    %c0_i32_1 = arith.constant 0 : i32
    return %arg0, %2, %c0_i32, %c0_i32_0 : i32, i32, i32, i32
  }
  func.func @transform_6(%arg0: i32, %arg1: i32) -> (i32, i32) {
    %c0_i32 = arith.constant 0 : i32
    %c0_i32_0 = arith.constant 0 : i32
    %c0_i32_1 = arith.constant 0 : i32
    return %c0_i32, %c0_i32_0 : i32, i32
  }
  func.func @transform_7(%arg0: i32, %arg1: i32) -> (i32, i32) {
    %c0_i32 = arith.constant 0 : i32
    %c0_i32_0 = arith.constant 0 : i32
    %c0_i32_1 = arith.constant 0 : i32
    return %c0_i32, %c0_i32_0 : i32, i32
  }
  func.func @transform_8(%arg0: i32, %arg1: i32) -> (i32, i32, i32, i32) {
    %c0_i32 = arith.constant 0 : i32
    %c0_i32_0 = arith.constant 0 : i32
    %c0_i32_1 = arith.constant 0 : i32
    return %arg0, %arg1, %c0_i32, %c0_i32_0 : i32, i32, i32, i32
  }
}

</mosaic_0001>

<bundles_post_ra>
// kernel: tpu_custom_call.1
= control target key start
LH: loop header
LB: loop body
LE: loop exit
PB: predicated region body
PF: predicated region fallthrough
CT: control target
= control target key end

     0   :  { %s7382_s0 = inlined_call_operand.hbm [shape: f32[2,8,16,16], index: 0, kind: input, shape index: {}]   ;;  %s7383_s1 = inlined_call_operand.hbm [shape: f32[2,8,16,16], index: 1, kind: input, shape index: {}]   ;;  %s7384_s2 = inlined_call_operand.hbm [shape: f32[2,8,16,16], index: 2, kind: input, shape index: {}]   ;;  %s7385_s3 = inlined_call_operand.hbm [shape: f32[2,8,16,16], index: 3, kind: input, shape index: {}]   ;;  %s7386_s4 = inlined_call_operand.hbm [shape: f32[2,8,16,16], index: 4, kind: input, shape index: {}]   ;;  %s7387_s5 = inlined_call_operand.hbm [shape: f32[2,8,16,16], index: 5, kind: input, shape index: {}]   ;;  %s7388_s6 = inlined_call_operand.hbm [shape: f32[16,16], index: 6, kind: input, shape index: {}]   ;;  %s7389_s7 = inlined_call_operand.hbm [shape: f32[16,16], index: 7, kind: input, shape index: {}]   ;;  %s7390_s8 = inlined_call_operand.hbm [shape: f32[2,1,8,128], index: 8, kind: output, shape index: {}]  }
   0x1   :  { %7545 = sst [smem:[#allocation141_spill]] %s7382_s0 }
   0x2   :  { %7546 = sst [smem:[#allocation142_spill]] %s7383_s1 }
   0x3   :  { %7547 = sst [smem:[#allocation143_spill]] %s7388_s6 }
   0x4   :  { %13 = vsyncpa [#allocation4], 0 }
   0x5   :  { %15 = vsyncpa [#allocation4 + $0x1], 0 }
   0x6   :  { %16 = vsyncpa [#allocation7], 0 }
   0x7   :  { %18 = vsyncpa [#allocation7 + $0x1], 0 }
   0x8   :  { %19 = vsyncpa [#allocation10], 0 }
   0x9   :  { %21 = vsyncpa [#allocation10 + $0x1], 0 }
   0xa   :  { %22 = vsyncpa [#allocation13], 0 }
   0xb   :  { %24 = vsyncpa [#allocation13 + $0x1], 0 }
   0xc   :  { %25 = vsyncpa [#allocation16], 0 }
   0xd   :  { %26 = vsyncpa [#allocation5], 0 }
   0xe   :  { %28 = vsyncpa [#allocation5 + $0x1], 0  ;;  %s5121_s27 = smov 0   ;;  %s5123_s28 = smov 0  }
   0xf   :  { %s5125_s29 = smov 0   ;;  %s5127_s30 = smov 0  }
  0x10   :  { %s5129_s9 = smov 0   ;;  %s5131_s10 = smov 0  }
  0x11 LB: > { %7548 = sst [smem:[#allocation25_spill]] %s5049_s27  ;;  %s5152_s11 = sadd.s32 4294967295, %s5069_s10   ;;  %s5069_s10 = sphi %s5131_s10, %s34_s10   ;;  %s5065_s9 = sphi %s5129_s9, %s7899_s9   ;;  %s5061_s30 = sphi %s5127_s30, %s7898_s30   ;;  %s5057_s29 = sphi %s5125_s29, %s7897_s29   ;;  %s5053_s28 = sphi %s5123_s28, %s7901_s28   ;;  %s5049_s27 = sphi %s5121_s27, %s7900_s27  }
  0x12   : > { %7549 = sst [smem:[#allocation26_spill]] %s5057_s29  ;;  %s4565_s12 = sadd.s32 4294967294, %s5069_s10  }
  0x13   : > { %7550 = sst [smem:[#allocation27_spill]] %s5065_s9  ;;  %p68_p0 = scmp.ne.s32.totalorder %s5053_s28, %s5049_s27 }
  0x14   : > { %7551 = sst [smem:[#allocation28_spill]] %s5069_s10  ;;  %p69_p1 = scmp.eq.s32.totalorder %s5152_s11, 0 }
  0x15   : > { %p308_p2 = scmp.eq.s32.totalorder %s5152_s11, 1  ;;  %p314_p3 = scmp.eq.s32.totalorder %s4565_s12, 1 }
  0x16   : > { %p5161_p4 = por %p69_p1, %p68_p0  ;;  %p4566_p5 = scmp.ge.s32.totalorder %s5069_s10, 1 }
  0x17   : > { %p5166_p6 = por %p314_p3, %p68_p0  ;;  %p321_p7 = scmp.lt.s32.totalorder %s5069_s10, 3 }
  0x18   : > { %s7555_s6 = sld [smem:[#allocation143_spill]]  ;;  %s5071_s19 = smov [#allocation14]  }
  0x19   : > { %s7553_s14 = scalar_select %p5166_p6, 1, 0 }
  0x1a   : > { %p5174_p8 = pnand %p4566_p5, %p321_p7  ;;  %s334_s20 = sshll.u32 %s5071_s19, 4  ;;  %s335_s20 = int_to_ptr.vmem [resolvable:$true] %s334_s20 }
  0x1b   : > { %7554 = sst [smem:[#allocation29_spill]] %s7553_s14  ;;  %p4569_p11 = scmp.ge.s32.totalorder %s5069_s10, 2 }
  0x1c   : > { %p4638_p9 = pneg %p5174_p8  ;;  %s7391_s22 = smov 128  }
  0x1d   : > { %s7393_s23 = smov 8   ;;  %s46_s24 = sadd.s32 1, %s5065_s9 }
  0x1e   : > { %s332_s17 = sshll.u32 %s7555_s6, 4  ;;  %p5182_p10 = pnand %p4638_p9, %p69_p1  ;;  %s333_s17 = int_to_ptr.hbm [resolvable:$true] %s332_s17 }
  0x1f   : > { %p48_p12 = scmp.ge.s32.totalorder %s46_s24, 2  ;;  %s55_s25 = sadd.s32 1, %s5057_s29 }
  0x20   : > { %4641 = dma.hbm_to_vmem [thread:$0]  (!%p5182_p10), %s333_s17, 256, %s335_s20, [#allocation13], %s7391_s22, %s7391_s22, %s7393_s23  }
  0x21   : > { %p62_p13 = scmp.ne.s32.totalorder %s5057_s29, %s5053_s28  ;;  %p63_p0 = scmp.eq.s32.totalorder %s5069_s10, 0 }
  0x22   : > { %s7903_s24 = smov (%p48_p12, %s46_s24), 0  ;;  %p4670_p7 = scmp.lt.s32.totalorder %s5069_s10, 2 }
  0x23   : > { %7558 = sst [smem:[#allocation30_spill]] %s7903_s24  ;;  %p64_p3 = por %p63_p0, %p62_p13 }
  0x24   : > { %p5201_p5 = por %p308_p2, %p62_p13  ;;  %s50_s12 = ssub.s32 %s5065_s9, %s7903_s24 }
  0x25   : > { %p53_p9 = scmp.eq.s32.totalorder %s50_s12, 0  ;;  %s5209_s15 = sand.u32 1, %s5057_s29  }
  0x26   : > { %s5213_s17 = sshll.u32 %s5065_s9, 7  ;;  %p5218_p12 = pnand %p4670_p7, %p64_p3 }
  0x27   : > { %s5216_s19 = scalar_select %p53_p9, %s5057_s29, %s55_s25  }
  0x28   : > { %s5223_s22 = sand.u32 1, %s5069_s10   ;;  %s7562_s1 = sld [smem:[#allocation142_spill]] }
  0x29   : > { %7560 = sst [smem:[#allocation31_spill]] %s5216_s19  ;;  %s7563_s24 = sshll.u32 %s5209_s15, 7 }
  0x2a   : > { %s391_s25 = scalar_lea.vmem [#allocation6], %s7563_s24  ;;  %s7402_s19 = scalar_lea.sflag [#allocation7], %s5223_s22 }
  0x2b   : > { %s402_s9 = sshll.u32 %s391_s25, 4  ;;  %s7564_s29 = smov 8   ;;  %s403_s9 = int_to_ptr.vmem [resolvable:$true] %s402_s9 }
  0x2c   : > { %s7565_s10 = smov 128   ;;  %s5240_s23 = sshll.u32 %s5209_s15, 4 }
  0x2d   : > { %s444_s25 = scalar_lea.vmem [#allocation9], %s5240_s23  ;;  %s7403_s27 = scalar_lea.sflag [#allocation10], %s5223_s22 }
  0x2e   : > { %s399_s16 = scalar_lea.hbm %s7562_s1, %s5213_s17  ;;  %s458_s14 = sshll.u32 %s444_s25, 4  ;;  %s459_s14 = int_to_ptr.vmem [resolvable:$true] %s458_s14 }
  0x2f   : > { %s400_s6 = sshll.u32 %s399_s16, 4  ;;  %s455_s16 = scalar_lea.hbm %s7385_s3, %s5213_s17  ;;  %s401_s6 = int_to_ptr.hbm [resolvable:$true] %s400_s6 }
  0x30   : > { %4651 = dma.hbm_to_vmem [thread:$0]  (!%p5218_p12), %s401_s6, 2048, %s403_s9, %s7402_s19, %s7565_s10, %s7565_s10, %s7564_s29  }
  0x31   : > { %s456_s24 = sshll.u32 %s455_s16, 4  ;;  %s346_s9 = sshll.u32 %s7389_s7, 4  ;;  %s457_s24 = int_to_ptr.hbm [resolvable:$true] %s456_s24  ;;  %s347_s9 = int_to_ptr.hbm [resolvable:$true] %s346_s9 }
  0x32   : > { %4657 = dma.hbm_to_vmem [thread:$0]  (!%p5218_p12), %s457_s24, 256, %s459_s14, %s7403_s27, %s7565_s10, %s7565_s10, %s7564_s29  }
  0x33   : > { %s5074_s12 = smov [#allocation15]   ;;  %s7566_s0 = sld [smem:[#allocation141_spill]] }
  0x34   : > { %s348_s16 = sshll.u32 %s5074_s12, 4  ;;  %s7567_s6 = sshll.u32 %s5209_s15, 7  ;;  %s349_s16 = int_to_ptr.vmem [resolvable:$true] %s348_s16 }
  0x35   : > { %4644 = dma.hbm_to_vmem [thread:$0]  (!%p5182_p10), %s347_s9, 256, %s349_s16, [#allocation16], %s7565_s10, %s7565_s10, %s7564_s29  }
  0x36   : > { %s366_s1 = scalar_lea.vmem [#allocation3], %s7567_s6  ;;  %s363_s12 = scalar_lea.sflag [#allocation4], %s5209_s15 }
  0x37   : > { %s377_s27 = sshll.u32 %s366_s1, 4  ;;  %s427_s19 = scalar_lea.hbm %s7384_s2, %s5213_s17  ;;  %s378_s27 = int_to_ptr.vmem [resolvable:$true] %s377_s27 }
  0x38   : > { %s428_s16 = sshll.u32 %s427_s19, 4  ;;  %s416_s25 = scalar_lea.vmem [#allocation8], %s5240_s23  ;;  %s429_s16 = int_to_ptr.hbm [resolvable:$true] %s428_s16 }
  0x39   : > { %s374_s14 = scalar_lea.hbm %s7566_s0, %s5213_s17  ;;  %s7568_s15 = scalar_lea.sflag [#allocation7], %s5223_s22 }
  0x3a   : > { %s375_s24 = sshll.u32 %s374_s14, 4  ;;  %s430_s14 = sshll.u32 %s416_s25, 4  ;;  %s376_s24 = int_to_ptr.hbm [resolvable:$true] %s375_s24  ;;  %s431_s14 = int_to_ptr.vmem [resolvable:$true] %s430_s14 }
  0x3b   : > { %4648 = dma.hbm_to_vmem [thread:$0]  (!%p5218_p12), %s376_s24, 2048, %s378_s27, %s363_s12, %s7565_s10, %s7565_s10, %s7564_s29  }
  0x3c   : > { %4654 = dma.hbm_to_vmem [thread:$0]  (!%p5218_p12), %s429_s16, 256, %s431_s14, %s7568_s15, %s7565_s10, %s7565_s10, %s7564_s29  }
  0x3d   : > { %s4607_s6 = sadd.s32 112, %s5213_s17  ;;  %s472_s12 = scalar_lea.vmem [#allocation11], %s5240_s23 }
  0x3e   : > { %s483_s1 = scalar_lea.hbm %s7386_s4, %s4607_s6  ;;  %s486_s21 = sshll.u32 %s472_s12, 4  ;;  %s487_s21 = int_to_ptr.vmem [resolvable:$true] %s486_s21 }
  0x3f   : > { %s484_s9 = sshll.u32 %s483_s1, 4  ;;  %s7569_s19 = scalar_lea.sflag [#allocation10], %s5223_s22  ;;  %s485_s9 = int_to_ptr.hbm [resolvable:$true] %s484_s9 }
  0x40   : > { %4660 = dma.hbm_to_vmem [thread:$0]  (!%p5218_p12), %s485_s9, 256, %s487_s21, %s7569_s19, %s7565_s10, %s7565_s10, %s7564_s29  }
  0x41   : > { %s511_s16 = scalar_lea.hbm %s7387_s5, %s4607_s6  ;;  %s500_s14 = scalar_lea.vmem [#allocation12], %s5240_s23 }
  0x42   : > { %s512_s17 = sshll.u32 %s511_s16, 4  ;;  %s514_s15 = sshll.u32 %s500_s14, 4  ;;  %s513_s17 = int_to_ptr.hbm [resolvable:$true] %s512_s17  ;;  %s515_s15 = int_to_ptr.vmem [resolvable:$true] %s514_s15 }
  0x43   : > { %s497_s27 = scalar_lea.sflag [#allocation13], %s5223_s22  ;;  %526 = sbr.rel (%p5174_p8) target bundleno = 1166 (0x48e), region = 52 }
  0x44   : > { %4663 = dma.hbm_to_vmem [thread:$0]  (!%p5218_p12), %s513_s17, 256, %s515_s15, %s497_s27, %s7565_s10, %s7565_s10, %s7564_s29  }
  0x48   : > { %s5312_s24 = sand.u32 1, %s5053_s28  }
  0x49   : > { %s4589_s0 = sshll.u32 %s5312_s24, 7  ;;  %s529_s23 = scalar_lea.sflag [#allocation4], %s5312_s24 }
  0x4a   : > { %s5316_s6 = scalar_lea.vmem [#allocation3], %s4589_s0 }
  0x4b   : > { %5020 = dma.done.wait (%p5161_p4), %s529_s23, 2048  }
  0x4c   : > { %5022 = vsyncadd (%p5161_p4), %s529_s23, 4294965248  ;;  %s538_s29 = sand.u32 1, %s5152_s11   ;;  %s5323_s18 = scalar_lea.vmem [#allocation6], %s4589_s0 }
  0x4d   : > { %s539_s10 = scalar_lea.sflag [#allocation7], %s538_s29 }
  0x4e   : > { %5024 = dma.done.wait (%p5161_p4), %s539_s10, 2304  }
  0x4f   : > { %5026 = vsyncadd (%p5161_p4), %s539_s10, 4294964992  ;;  %s559_s22 = scalar_lea.sflag [#allocation10], %s538_s29 }
  0x50   : > { %5028 = dma.done.wait (%p5161_p4), %s559_s22, 512  }
  0x51   : > { %5030 = vsyncadd (%p5161_p4), %s559_s22, 4294966784  ;;  %s579_s20 = scalar_lea.sflag [#allocation13], %s538_s29 }
  0x52   : > { %5032 = dma.done.wait (%p5161_p4), %s579_s20, 256  }
  0x53   : > { %5034 = vsyncadd (%p5161_p4), %s579_s20, 4294967040 }
  0x54   : > { %5036 = dma.done.wait (%p69_p1), [#allocation13], 256  }
  0x55   : > { %5038 = vsyncadd (%p69_p1), [#allocation13], 4294967040 }
  0x56   : > { %5040 = dma.done.wait (%p69_p1), [#allocation16], 256  }
  0x57   : > { %5042 = vsyncadd (%p69_p1), [#allocation16], 4294967040  ;;  %vm733_vm0 = vcmask 130048   ;;  %vm774_vm1 = vcmask 122880   ;;  %v5075_v0 = vmov 0.0   ;;  %v873_v1 = vld [vmem:[#allocation15 + $0x8] sm:$0xff] }
  0x58   : > { %775 = vst.msk [vmem:[#allocation2] sm:$0x1] %vm774_vm1, %v5075_v0  ;;  %v872_v2 = vld [vmem:[#allocation15] sm:$0xff]  ;;  %v2023_v3 = vld [vmem:[#allocation14 + $0x8] sm:$0xff]  ;;  %v5359_v4 = vand.u32 4294901760, %v873_v1  ;;  %vm785_vm2 = vcmask 129024  }
  0x59   : > { %820 = vst.msk [vmem:[#allocation2 + $0x1] sm:$0xff] %vm733_vm0, %v5075_v0  ;;  %v5361_v5 = vand.u32 4294901760, %v872_v2  ;;  %v5365_v6 = vand.u32 4294901760, %v2023_v3  ;;  %v669_v25 = vld [vmem:[%s5316_s6] sm:$0xff]  ;;  %v670_v29 = vld [vmem:[%s5316_s6 + $0x8] sm:$0xff]  ;;  %v671_v32 = vld [vmem:[%s5316_s6 + $0x10] sm:$0xff] }
  0x5a   : > { %776 = vst.msk [vmem:[#allocation2 + $0x18] sm:$0x1] %vm774_vm1, %v5075_v0  ;;  %v1238_v8 = vsub.f32 %v873_v1, %v5359_v4  ;;  %1556 = vmatpush.msra.mxu3 %v5359_v4  ;;  %979 = vmatpush.msra.mxu0 %v5359_v4  ;;  %v685_v26 = vld [vmem:[%s5323_s18] sm:$0xff]  ;;  %v686_v30 = vld [vmem:[%s5323_s18 + $0x8] sm:$0xff]  ;;  %v687_v33 = vld [vmem:[%s5323_s18 + $0x10] sm:$0xff]  ;;  %vm3263_vm3 = vcmask 1045504  }
  0x5b   : > { %777 = vst.msk [vmem:[#allocation2 + $0x30] sm:$0x1] %vm774_vm1, %v5075_v0  ;;  %v1244_v9 = vsub.f32 %v872_v2, %v5361_v5  ;;  %v5381_v12 = vsub.f32 %v2023_v3, %v5365_v6  ;;  %v5433_v35 = vsub.f32 %v669_v25, %v685_v26  ;;  %v5438_v37 = vsub.f32 %v670_v29, %v686_v30  ;;  %v672_v43 = vld [vmem:[%s5316_s6 + $0x18] sm:$0xff]  ;;  %v689_v1 = vld [vmem:[%s5323_s18 + $0x20] sm:$0xff]  ;;  %s4597_s11 = sshll.u32 %s5312_s24, 3  ;;  %s4599_s13 = sshll.u32 %s5061_s30, 3 }
  0x5c   : > { %778 = vst.msk [vmem:[#allocation2 + $0x48] sm:$0x1] %vm774_vm1, %v5075_v0  ;;  %1386 = vmatpush.msra.mxu2 %v1238_v8  ;;  %1558 = vmatpush.msra.mxu3 %v5361_v5  ;;  %v1239_v13 = vand.u32 4294901760, %v1238_v8  ;;  %v5447_v40 = vsub.f32 %v671_v32, %v687_v33  ;;  %v688_v44 = vld [vmem:[%s5323_s18 + $0x18] sm:$0xff]  ;;  %vm3142_vm4 = vcmask 1046528   ;;  %vm3454_vm5 = vcmask 1041408   ;;  %s4334_s9 = scalar_lea.hbm %s7390_s8, %s4599_s13 }
  0x5d   : > { %779 = vst.msk [vmem:[#allocation2 + $0x60] sm:$0x1] %vm774_vm1, %v5075_v0  ;;  %v1245_v14 = vand.u32 4294901760, %v1244_v9  ;;  %981 = vmatpush.msra.mxu0 %v5361_v5  ;;  %v7404_v16 = vand.u32 4294901760, %v5381_v12  ;;  %v5468_v46 = vsub.f32 %v672_v43, %v688_v44  ;;  %s650_s19 = scalar_lea.vmem [#allocation17], %s4597_s11  ;;  %s4338_s17 = sshll.u32 %s4334_s9, 4  ;;  %s4339_s17 = int_to_ptr.hbm [resolvable:$true] %s4338_s17 }
  0x5e   : > { %780 = vst.msk [vmem:[#allocation2 + $0x78] sm:$0x1] %vm774_vm1, %v5075_v0  ;;  %1389 = vmatpush.msra.mxu2 %v1244_v9  ;;  %v1240_v17 = vsub.f32 %v1238_v8, %v1239_v13  ;;  %s4336_s25 = sshll.u32 %s650_s19, 4  ;;  %s4323_s30 = scalar_lea.sflag [#allocation5], %s5312_s24  ;;  %s4337_s25 = int_to_ptr.vmem [resolvable:$true] %s4336_s25 }
  0x5f   : > { %781 = vst.msk [vmem:[#allocation2 + $0x90] sm:$0x1] %vm774_vm1, %v5075_v0  ;;  %v1246_v18 = vsub.f32 %v1244_v9, %v1245_v14  ;;  %1757 = vmatpush.msrb.mxu0 %v1239_v13  ;;  %v2300_v20 = vsub.f32 %v5381_v12, %v7404_v16  ;;  %v674_v13 = vld [vmem:[%s5316_s6 + $0x28] sm:$0xff]  ;;  %s4981_s14 = sshra.s32 %s4339_s17, 4  ;;  %s4987_s23 = scalar_lea.hbm %s7390_s8, 16  ;;  %s4982_s14 = int_to_ptr.hbm [resolvable:$true] %s4981_s14 }
  0x60   : > { %v842_v7 = vld [vmem:[#allocation2] sm:$0xff]  ;;  %782 = vst.msk [vmem:[#allocation2 + $0xa8] sm:$0x1] %vm774_vm1, %v5075_v0  ;;  %v1241_v21 = vand.u32 4294901760, %v1240_v17  ;;  %2039 = vmatpush.msrb.mxu2 %v5365_v6  ;;  %s4983_s15 = scalar_lea.hbm %s4982_s14, 8  ;;  %p4988_p8 = scmp.lt.s32.totalorder %s4982_s14, %s7390_s8 }
  0x61   : > { %v875_v10 = vsel %vm733_vm0, %v842_v7, 0  ;;  %783 = vst.msk [vmem:[#allocation2 + $0xc0] sm:$0x1] %vm774_vm1, %v5075_v0  ;;  %v1247_v22 = vand.u32 4294901760, %v1246_v18  ;;  %1761 = vmatpush.msrb.mxu0 %v1245_v14  ;;  %v2301_v24 = vand.u32 4294901760, %v2300_v20  ;;  %v690_v14 = vld [vmem:[%s5323_s18 + $0x28] sm:$0xff]  ;;  %p4984_p1 = scmp.ne.s32.totalorder %s4982_s14, %s4983_s15  ;;  %p4989_p10 = scmp.lt.s32.totalorder %s4987_s23, %s4983_s15 }
  0x62   : > { %v5376_v11 = vand.u32 4294901760, %v875_v10  ;;  %784 = vst.msk [vmem:[#allocation2 + $0xd8] sm:$0x1] %vm774_vm1, %v5075_v0  ;;  %1242 = vmatpush.msra.mxu1 %v1241_v21  ;;  %v5536_v17 = vsub.f32 %v674_v13, %v690_v14 }
  0x63   : > { %821 = vst.msk [vmem:[#allocation2 + $0x9] sm:$0xff] %vm733_vm0, %v5075_v0  ;;  %2302 = vmatpush.msrb.mxu3 %v2301_v24  ;;  %p4985_p2 = pnand %p4984_p1, %p5201_p5  ;;  %p4990_p13 = por %p4989_p10, %p4988_p8 }
  0x64   : > { %v5387_v15 = vsub.f32 %v875_v10, %v5376_v11  ;;  %823 = vst.msk [vmem:[#allocation2 + $0xd9] sm:$0xff] %vm733_vm0, %v5075_v0  ;;  %1248 = vmatpush.msra.mxu1 %v1247_v22 }
  0x65   : > { %824 = vst.msk [vmem:[#allocation2 + $0xe1] sm:$0xff] %vm733_vm0, %v5075_v0  ;;  %1250 = vmatmul.f32.vlgmr.msra.gmra.mxu1 %v5376_v11  ;;  %p4986_p4 = pneg %p4985_p2 }
  0x66   : > { %7570 = vst [vmem:[#allocation32_spill] sm:$0xff] %v5387_v15  ;;  %1392 = vmatmul.f32.vlgmr.msra.gmra.mxu2 %v5387_v15  ;;  %v5397_v19 = vand.u32 4294901760, %v5387_v15  ;;  %1898 = vmatpush.msrb.mxu1 %v5359_v4 }
  0x67   : > { %786 = vst.msk [vmem:[#allocation2 + $0x11] sm:$0x7f] %vm785_vm2, %v5075_v0  ;;  %p4991_p0 = pnand %p4990_p13, %p4986_p4 }
  0x68   : > { %7571 = vst [vmem:[#allocation33_spill] sm:$0xff] %v5397_v19  ;;  %1562 = vmatmul.f32.vlgmr.msra.gmra.mxu3 %v5397_v19  ;;  %v985_v23 = vsub.f32 %v5387_v15, %v5397_v19  ;;  %1900 = vmatpush.msrb.mxu1 %v5361_v5 }
  0x69   : > { %787 = vst.msk [vmem:[#allocation2 + $0x29] sm:$0x7f] %vm785_vm2, %v5075_v0 }
  0x6a   : > { %788 = vst.msk [vmem:[#allocation2 + $0x41] sm:$0x7f] %vm785_vm2, %v5075_v0  ;;  %v5416_v27 = vand.u32 4294901760, %v985_v23  ;;  %v843_v28 = vld [vmem:[#allocation2 + $0x8] sm:$0xff]  ;;  %2616 = vmatpush.msra.mxu1 %v5365_v6 }
  0x6b   : > { %789 = vst.msk [vmem:[#allocation2 + $0x59] sm:$0x7f] %vm785_vm2, %v5075_v0  ;;  %v878_v31 = vsel %vm733_vm0, %v843_v28, 0 }
  0x6c   : > { %790 = vst.msk [vmem:[#allocation2 + $0x71] sm:$0x7f] %vm785_vm2, %v5075_v0  ;;  %987 = vmatmul.f32.vlgmr.msra.gmra.mxu0 %v5416_v27  ;;  %v5429_v34 = vand.u32 4294901760, %v878_v31 }
  0x6d   : > { %791 = vst.msk [vmem:[#allocation2 + $0x89] sm:$0x7f] %vm785_vm2, %v5075_v0  ;;  %2446 = vmatpush.msra.mxu0 %v5381_v12 }
  0x6e   : > { %792 = vst.msk [vmem:[#allocation2 + $0xa1] sm:$0x7f] %vm785_vm2, %v5075_v0  ;;  %v844_v36 = vld [vmem:[#allocation2 + $0x10] sm:$0xff]  ;;  %v5442_v38 = vsub.f32 %v878_v31, %v5429_v34  ;;  %1254 = vmatmul.f32.gmra.mxu1 %v5429_v34 }
  0x6f   : > { %7572 = vst [vmem:[#allocation34_spill] sm:$0xff] %v5433_v35  ;;  %v881_v39 = vsel %vm733_vm0, %v844_v36, 0  ;;  %v675_v36 = vld [vmem:[%s5316_s6 + $0x30] sm:$0xff] }
  0x70   : > { %793 = vst.msk [vmem:[#allocation2 + $0xb9] sm:$0x7f] %vm785_vm2, %v5075_v0  ;;  %v5449_v41 = vand.u32 4294901760, %v881_v39  ;;  %1397 = vmatmul.f32.gmra.mxu2 %v5442_v38  ;;  %v5456_v42 = vand.u32 4294901760, %v5442_v38 }
  0x71   : > { %7573 = vst [vmem:[#allocation35_spill] sm:$0xff] %v5438_v37 }
  0x72   : > { %7574 = vst [vmem:[#allocation36_spill] sm:$0xff] %v5442_v38  ;;  %v5464_v45 = vsub.f32 %v881_v39, %v5449_v41  ;;  %1568 = vmatmul.f32.gmra.mxu3 %v5456_v42  ;;  %v993_v47 = vsub.f32 %v5442_v38, %v5456_v42  ;;  %v691_v39 = vld [vmem:[%s5323_s18 + $0x30] sm:$0xff] }
  0x73   : > { %794 = vst.msk [vmem:[#allocation2 + $0xd1] sm:$0x7f] %vm785_vm2, %v5075_v0  ;;  %v5576_v43 = vsub.f32 %v675_v36, %v691_v39  ;;  %v677_v39 = vld [vmem:[%s5316_s6 + $0x40] sm:$0xff] }
  0x74   : > { %7575 = vst [vmem:[#allocation37_spill] sm:$0xff] %v5447_v40  ;;  %v5476_v48 = vand.u32 4294901760, %v5464_v45  ;;  %v5480_v49 = vand.u32 4294901760, %v993_v47 }
  0x75   : > { %795 = vst.msk [vmem:[#allocation2 + $0xe9] sm:$0x7f] %vm785_vm2, %v5075_v0  ;;  %v673_v0 = vld [vmem:[%s5316_s6 + $0x20] sm:$0xff] }
  0x76   : > { %7576 = vst [vmem:[#allocation38_spill] sm:$0xff] %v5456_v42  ;;  %995 = vmatmul.f32.gmra.mxu0 %v5480_v49  ;;  %v1001_v50 = vsub.f32 %v5464_v45, %v5476_v48  ;;  %1258 = vmatmul.f32.gmra.mxu1 %v5449_v41  ;;  %v5513_v2 = vsub.f32 %v673_v0, %v689_v1 }
  0x77   : > { %826 = vst.msk [vmem:[#allocation2 + $0x19] sm:$0xff] %vm733_vm0, %v5433_v35 }
  0x78   : > { %7577 = vst [vmem:[#allocation39_spill] sm:$0xff] %v5464_v45  ;;  %1402 = vmatmul.f32.gmra.mxu2 %v5464_v45  ;;  %v5492_v56 = vand.u32 4294901760, %v1001_v50 }
  0x79   : > { %827 = vst.msk [vmem:[#allocation2 + $0x21] sm:$0xff] %vm733_vm0, %v5438_v37 }
  0x7a   : > { %7578 = vst [vmem:[#allocation40_spill] sm:$0xff] %v5468_v46  ;;  %1574 = vmatmul.f32.gmra.mxu3 %v5476_v48 }
  0x7b   : > { %828 = vst.msk [vmem:[#allocation2 + $0x31] sm:$0xff] %vm733_vm0, %v5447_v40  ;;  %v7607_v40 = vand.u32 4294901760, %v5381_v12 }
  0x7c   : > { %7579 = vst [vmem:[#allocation41_spill] sm:$0xff] %v5476_v48 }
  0x7d   : > { %829 = vst.msk [vmem:[#allocation2 + $0x39] sm:$0xff] %vm733_vm0, %v5468_v46 }
  0x7e   : > { %v845_v51 = vld [vmem:[#allocation2 + $0x18] sm:$0xff]  ;;  %1003 = vmatmul.f32.gmra.mxu0 %v5492_v56  ;;  %7583 = vst [vmem:[#allocation45_spill] sm:$0xff] %v5513_v2 }
  0x7f   : > { %v884_v52 = vsel %vm733_vm0, %v845_v51, 0  ;;  %830 = vst.msk [vmem:[#allocation2 + $0x49] sm:$0xff] %vm733_vm0, %v5513_v2 }
  0x80   : > { %v846_v53 = vld [vmem:[#allocation2 + $0x20] sm:$0xff]  ;;  %v5488_v54 = vand.u32 4294901760, %v884_v52  ;;  %v847_v59 = vld [vmem:[#allocation2 + $0x28] sm:$0xff]  ;;  %7586 = vst [vmem:[#allocation48_spill] sm:$0xff] %v5536_v17 }
  0x81   : > { %v887_v55 = vsel %vm733_vm0, %v846_v53, 0  ;;  %v890_v63 = vsel %vm733_vm0, %v847_v59, 0  ;;  %831 = vst.msk [vmem:[#allocation2 + $0x51] sm:$0xff] %vm733_vm0, %v5536_v17  ;;  %v676_v59 = vld [vmem:[%s5316_s6 + $0x38] sm:$0xff]  ;;  %v2022_v17 = vld [vmem:[#allocation14] sm:$0xff] }
  0x82   : > { %v5494_v57 = vand.u32 4294901760, %v887_v55  ;;  %v5497_v58 = vsub.f32 %v884_v52, %v5488_v54  ;;  %v5521_v5 = vand.u32 4294901760, %v890_v63  ;;  %1262 = vmatmul.f32.gmra.mxu1 %v5488_v54  ;;  %v848_v7 = vld [vmem:[#allocation2 + $0x30] sm:$0xff]  ;;  %7591 = vst [vmem:[#allocation53_spill] sm:$0xff] %v5576_v43  ;;  %v2040_v2 = vand.u32 4294901760, %v2022_v17 }
  0x83   : > { %v893_v10 = vsel %vm733_vm0, %v848_v7, 0  ;;  %832 = vst.msk [vmem:[#allocation2 + $0x61] sm:$0xff] %vm733_vm0, %v5576_v43 }
  0x84   : > { %7580 = vst [vmem:[#allocation42_spill] sm:$0xff] %v5497_v58  ;;  %v5501_v60 = vand.u32 4294901760, %v5497_v58  ;;  %v5505_v61 = vsub.f32 %v887_v55, %v5494_v57  ;;  %1407 = vmatmul.f32.gmra.mxu2 %v5497_v58  ;;  %v5530_v9 = vsub.f32 %v890_v63, %v5521_v5  ;;  %v5544_v21 = vand.u32 4294901760, %v893_v10  ;;  %v849_v22 = vld [vmem:[#allocation2 + $0x38] sm:$0xff]  ;;  %v850_v30 = vld [vmem:[#allocation2 + $0x40] sm:$0xff]  ;;  %2618 = vmatpush.msra.mxu1 %v2040_v2 }
  0x85   : > { %v896_v25 = vsel %vm733_vm0, %v849_v22, 0  ;;  %v899_v33 = vsel %vm733_vm0, %v850_v30, 0  ;;  %2041 = vmatpush.msrb.mxu2 %v2040_v2  ;;  %v2304_v46 = vsub.f32 %v2022_v17, %v2040_v2 }
  0x86   : > { %7581 = vst [vmem:[#allocation43_spill] sm:$0xff] %v5501_v60  ;;  %v1009_v62 = vsub.f32 %v5497_v58, %v5501_v60  ;;  %1580 = vmatmul.f32.gmra.mxu3 %v5501_v60  ;;  %v5519_v4 = vand.u32 4294901760, %v5505_v61  ;;  %v5542_v20 = vand.u32 4294901760, %v5530_v9  ;;  %v5553_v24 = vsub.f32 %v893_v10, %v5544_v21  ;;  %v851_v51 = vld [vmem:[#allocation2 + $0x48] sm:$0xff] }
  0x87   : > { %7582 = vst [vmem:[#allocation44_spill] sm:$0xff] %v5505_v61  ;;  %v5563_v29 = vand.u32 4294901760, %v896_v25  ;;  %v5584_v50 = vand.u32 4294901760, %v899_v33  ;;  %v902_v55 = vsel %vm733_vm0, %v851_v51, 0  ;;  %v693_v51 = vld [vmem:[%s5323_s18 + $0x40] sm:$0xff]  ;;  %2817 = vmatpush.msra.mxu2 %v7607_v40  ;;  %v2305_v35 = vand.u32 4294901760, %v2304_v46  ;;  %2449 = vmatpush.msra.mxu0 %v2304_v46 }
  0x88   : > { %v5516_v3 = vand.u32 4294901760, %v1009_v62  ;;  %7584 = vst [vmem:[#allocation46_spill] sm:$0xff] %v5519_v4  ;;  %v1017_v8 = vsub.f32 %v5505_v61, %v5519_v4  ;;  %v1025_v23 = vsub.f32 %v5530_v9, %v5542_v20  ;;  %v5561_v28 = vand.u32 4294901760, %v5553_v24  ;;  %v692_v62 = vld [vmem:[%s5323_s18 + $0x38] sm:$0xff]  ;;  %v853_v30 = vld [vmem:[#allocation2 + $0x58] sm:$0xff] }
  0x89   : > { %7585 = vst [vmem:[#allocation47_spill] sm:$0xff] %v5530_v9  ;;  %v5570_v32 = vsub.f32 %v896_v25, %v5563_v29  ;;  %v5593_v53 = vsub.f32 %v899_v33, %v5584_v50  ;;  %v5599_v63 = vsub.f32 %v676_v59, %v692_v62  ;;  %v5607_v7 = vand.u32 4294901760, %v902_v55  ;;  %2821 = vmatpush.msra.mxu2 %v2305_v35 }
  0x8a   : > { %1011 = vmatmul.f32.gmra.mxu0 %v5516_v3  ;;  %v5539_v18 = vand.u32 4294901760, %v1017_v8  ;;  %7587 = vst [vmem:[#allocation49_spill] sm:$0xff] %v5542_v20  ;;  %1266 = vmatmul.f32.gmra.mxu1 %v5494_v57  ;;  %v5558_v26 = vand.u32 4294901760, %v1025_v23  ;;  %v1033_v31 = vsub.f32 %v5553_v24, %v5561_v28  ;;  %v852_v8 = vld [vmem:[#allocation2 + $0x50] sm:$0xff]  ;;  %v908_v36 = vsel %vm733_vm0, %v853_v30, 0 }
  0x8b   : > { %7588 = vst [vmem:[#allocation50_spill] sm:$0xff] %v5553_v24  ;;  %v5582_v47 = vand.u32 4294901760, %v5570_v32  ;;  %v5605_v1 = vand.u32 4294901760, %v5593_v53  ;;  %v5616_v13 = vsub.f32 %v902_v55, %v5607_v7  ;;  %v905_v14 = vsel %vm733_vm0, %v852_v8, 0  ;;  %v854_v8 = vld [vmem:[#allocation2 + $0x60] sm:$0xff] }
  0x8c   : > { %1412 = vmatmul.f32.gmra.mxu2 %v5505_v61  ;;  %7589 = vst [vmem:[#allocation51_spill] sm:$0xff] %v5561_v28  ;;  %v5579_v44 = vand.u32 4294901760, %v1033_v31  ;;  %v5626_v25 = vand.u32 4294901760, %v905_v14  ;;  %v5647_v62 = vand.u32 4294901760, %v908_v36  ;;  %v911_v30 = vsel %vm733_vm0, %v854_v8, 0 }
  0x8d   : > { %7590 = vst [vmem:[#allocation52_spill] sm:$0xff] %v5570_v32  ;;  %v1041_v52 = vsub.f32 %v5570_v32, %v5582_v47  ;;  %v1049_v10 = vsub.f32 %v5593_v53, %v5605_v1  ;;  %v5624_v23 = vand.u32 4294901760, %v5616_v13  ;;  %v2306_v40 = vsub.f32 %v2304_v46, %v2305_v35  ;;  %v680_v35 = vld [vmem:[%s5316_s6 + $0x58] sm:$0xff] }
  0x8e   : > { %1586 = vmatmul.f32.gmra.mxu3 %v5519_v4  ;;  %7592 = vst [vmem:[#allocation54_spill] sm:$0xff] %v5582_v47  ;;  %v5633_v33 = vsub.f32 %v905_v14, %v5626_v25  ;;  %v5656_v14 = vsub.f32 %v908_v36, %v5647_v62  ;;  %v696_v46 = vld [vmem:[%s5323_s18 + $0x58] sm:$0xff] }
  0x8f   : > { %7593 = vst [vmem:[#allocation55_spill] sm:$0xff] %v5593_v53  ;;  %v5602_v0 = vand.u32 4294901760, %v1041_v52  ;;  %v5621_v22 = vand.u32 4294901760, %v1049_v10  ;;  %v1057_v31 = vsub.f32 %v5616_v13, %v5624_v23  ;;  %v5639_v52 = vsub.f32 %v677_v39, %v693_v51  ;;  %v694_v39 = vld [vmem:[%s5323_s18 + $0x48] sm:$0xff] }
  0x90   : > { %7594 = vst [vmem:[#allocation56_spill] sm:$0xff] %v5599_v63  ;;  %v5645_v59 = vand.u32 4294901760, %v5633_v33 }
  0x91   : > { %7595 = vst [vmem:[#allocation57_spill] sm:$0xff] %v5605_v1  ;;  %v5642_v55 = vand.u32 4294901760, %v1057_v31  ;;  %v678_v31 = vld [vmem:[%s5316_s6 + $0x48] sm:$0xff] }
  0x92   : > { %1019 = vmatmul.f32.gmra.mxu0 %v5539_v18  ;;  %1270 = vmatmul.f32.gmra.mxu1 %v5521_v5  ;;  %833 = vst.msk [vmem:[#allocation2 + $0x69] sm:$0xff] %vm733_vm0, %v5599_v63  ;;  %v1065_v10 = vsub.f32 %v5633_v33, %v5645_v59  ;;  %v5662_v51 = vsub.f32 %v678_v31, %v694_v39  ;;  %v5670_v63 = vand.u32 4294901760, %v911_v30 }
  0x93   : > { %7596 = vst [vmem:[#allocation58_spill] sm:$0xff] %v5616_v13 }
  0x94   : > { %1417 = vmatmul.f32.gmra.mxu2 %v5530_v9  ;;  %7597 = vst [vmem:[#allocation59_spill] sm:$0xff] %v5624_v23  ;;  %v5665_v16 = vand.u32 4294901760, %v1065_v10  ;;  %v5679_v31 = vsub.f32 %v911_v30, %v5670_v63 }
  0x95   : > { %7598 = vst [vmem:[#allocation60_spill] sm:$0xff] %v5633_v33 }
  0x96   : > { %1592 = vmatmul.f32.gmra.mxu3 %v5542_v20  ;;  %7599 = vst [vmem:[#allocation61_spill] sm:$0xff] %v5639_v52 }
  0x97   : > { %7600 = vst [vmem:[#allocation62_spill] sm:$0xff] %v5645_v59 }
  0x98   : > { %834 = vst.msk [vmem:[#allocation2 + $0x79] sm:$0xff] %vm733_vm0, %v5639_v52  ;;  %v5668_v52 = vand.u32 4294901760, %v5656_v14 }
  0x99   : > { %7601 = vst [vmem:[#allocation63_spill] sm:$0xff] %v5656_v14  ;;  %v855_v36 = vld [vmem:[#allocation2 + $0x68] sm:$0xff]  ;;  %v856_v30 = vld [vmem:[#allocation2 + $0x70] sm:$0xff] }
  0x9a   : > { %1027 = vmatmul.f32.gmra.mxu0 %v5558_v26  ;;  %1274 = vmatmul.f32.gmra.mxu1 %v5544_v21  ;;  %7602 = vst [vmem:[#allocation64_spill] sm:$0xff] %v5662_v51  ;;  %v1073_v8 = vsub.f32 %v5656_v14, %v5668_v52  ;;  %v914_v10 = vsel %vm733_vm0, %v855_v36, 0  ;;  %v917_v37 = vsel %vm733_vm0, %v856_v30, 0 }
  0x9b   : > { %7603 = vst [vmem:[#allocation65_spill] sm:$0xff] %v5668_v52  ;;  %v5689_v43 = vand.u32 4294901760, %v914_v10  ;;  %v5712_v12 = vand.u32 4294901760, %v917_v37 }
  0x9c   : > { %1422 = vmatmul.f32.gmra.mxu2 %v5553_v24  ;;  %835 = vst.msk [vmem:[#allocation2 + $0x81] sm:$0xff] %vm733_vm0, %v5662_v51  ;;  %v5684_v39 = vand.u32 4294901760, %v1073_v8  ;;  %v5687_v51 = vand.u32 4294901760, %v5679_v31 }
  0x9d   : > { %7604 = vst [vmem:[#allocation66_spill] sm:$0xff] %v5679_v31  ;;  %v5696_v8 = vsub.f32 %v914_v10, %v5689_v43  ;;  %v5721_v30 = vsub.f32 %v917_v37, %v5712_v12 }
  0x9e   : > { %1598 = vmatmul.f32.gmra.mxu3 %v5561_v28  ;;  %7605 = vst [vmem:[#allocation67_spill] sm:$0xff] %v5687_v51  ;;  %v1081_v36 = vsub.f32 %v5679_v31, %v5687_v51 }
  0x9f   : > { %7606 = vst [vmem:[#allocation68_spill] sm:$0xff] %v5696_v8  ;;  %v5710_v17 = vand.u32 4294901760, %v5696_v8 }
  0xa0   : > { %7610 = vst [vmem:[#allocation71_spill] sm:$0xff] %v5721_v30 }
  0xa1   : > { %7609 = vst [vmem:[#allocation70_spill] sm:$0xff] %v5710_v17  ;;  %v1089_v10 = vsub.f32 %v5696_v8, %v5710_v17 }
  0xa2   : > { %1035 = vmatmul.f32.gmra.mxu0 %v5579_v44  ;;  %1278 = vmatmul.f32.gmra.mxu1 %v5563_v29 }
  0xa4   : > { %1427 = vmatmul.f32.gmra.mxu2 %v5570_v32 }
  0xa6   : > { %1604 = vmatmul.f32.gmra.mxu3 %v5582_v47 }
  0xaa   : > { %1043 = vmatmul.f32.gmra.mxu0 %v5602_v0  ;;  %1282 = vmatmul.f32.gmra.mxu1 %v5584_v50 }
  0xac   : > { %1432 = vmatmul.f32.gmra.mxu2 %v5593_v53 }
  0xae   : > { %1610 = vmatmul.f32.gmra.mxu3 %v5605_v1 }
  0xb2   : > { %1051 = vmatmul.f32.gmra.mxu0 %v5621_v22  ;;  %1286 = vmatmul.f32.gmra.mxu1 %v5607_v7 }
  0xb4   : > { %1437 = vmatmul.f32.gmra.mxu2 %v5616_v13 }
  0xb6   : > { %1616 = vmatmul.f32.gmra.mxu3 %v5624_v23 }
  0xba   : > { %1059 = vmatmul.f32.gmra.mxu0 %v5642_v55  ;;  %1290 = vmatmul.f32.gmra.mxu1 %v5626_v25 }
  0xbc   : > { %1442 = vmatmul.f32.gmra.mxu2 %v5633_v33 }
  0xbe   : > { %1622 = vmatmul.f32.gmra.mxu3 %v5645_v59  ;;  %v5707_v59 = vand.u32 4294901760, %v1081_v36 }
  0xc2   : > { %1067 = vmatmul.f32.gmra.mxu0 %v5665_v16  ;;  %1294 = vmatmul.f32.gmra.mxu1 %v5647_v62 }
  0xc4   : > { %1447 = vmatmul.f32.gmra.mxu2 %v5656_v14  ;;  %v679_v14 = vld [vmem:[%s5316_s6 + $0x50] sm:$0xff] }
  0xc6   : > { %1628 = vmatmul.f32.gmra.mxu3 %v5668_v52  ;;  %v695_v52 = vld [vmem:[%s5323_s18 + $0x50] sm:$0xff] }
  0xc7   : > { %v5704_v33 = vsub.f32 %v679_v14, %v695_v52  ;;  %v857_v52 = vld [vmem:[#allocation2 + $0x78] sm:$0xff]  ;;  %v2307_v14 = vand.u32 4294901760, %v2306_v40  ;;  %v5731_v40 = vand.u32 4294901760, %v1089_v10 }
  0xc8   : > { %v920_v36 = vsel %vm733_vm0, %v857_v52, 0 }
  0xc9   : > { %7608 = vst [vmem:[#allocation69_spill] sm:$0xff] %v5704_v33  ;;  %2308 = vmatpush.msrb.mxu3 %v2307_v14  ;;  %v5736_v37 = vand.u32 4294901760, %v920_v36 }
  0xca   : > { %1075 = vmatmul.f32.gmra.mxu0 %v5684_v39  ;;  %836 = vst.msk [vmem:[#allocation2 + $0x91] sm:$0xff] %vm733_vm0, %v5704_v33  ;;  %1298 = vmatmul.f32.gmra.mxu1 %v5670_v63  ;;  %v5728_v33 = vsub.f32 %v680_v35, %v696_v46 }
  0xcb   : > { %2958 = vmatpush.msra.mxu3 %v5365_v6  ;;  %7613 = vst [vmem:[#allocation74_spill] sm:$0xff] %v5736_v37  ;;  %v858_v6 = vld [vmem:[#allocation2 + $0x80] sm:$0xff]  ;;  %v5745_v52 = vsub.f32 %v920_v36, %v5736_v37 }
  0xcc   : > { %1452 = vmatmul.f32.gmra.mxu2 %v5679_v31  ;;  %7611 = vst [vmem:[#allocation72_spill] sm:$0xff] %v5728_v33  ;;  %v5734_v31 = vand.u32 4294901760, %v5721_v30  ;;  %v923_v14 = vsel %vm733_vm0, %v858_v6, 0 }
  0xcd   : > { %2960 = vmatpush.msra.mxu3 %v2040_v2  ;;  %837 = vst.msk [vmem:[#allocation2 + $0x99] sm:$0xff] %vm733_vm0, %v5728_v33  ;;  %v5753_v35 = vand.u32 4294901760, %v5745_v52  ;;  %v5755_v46 = vand.u32 4294901760, %v923_v14  ;;  %v859_v33 = vld [vmem:[#allocation2 + $0x88] sm:$0xff] }
  0xce   : > { %1634 = vmatmul.f32.gmra.mxu3 %v5687_v51  ;;  %7612 = vst [vmem:[#allocation73_spill] sm:$0xff] %v5734_v31  ;;  %v1097_v2 = vsub.f32 %v5721_v30, %v5734_v31 }
  0xcf   : > { %7614 = vst [vmem:[#allocation75_spill] sm:$0xff] %v5745_v52  ;;  %v1105_v36 = vsub.f32 %v5745_v52, %v5753_v35  ;;  %v5762_v6 = vsub.f32 %v923_v14, %v5755_v46 }
  0xd0   : > { %v5750_v10 = vand.u32 4294901760, %v1097_v2  ;;  %7615 = vst [vmem:[#allocation76_spill] sm:$0xff] %v5753_v35  ;;  %v681_v2 = vld [vmem:[%s5316_s6 + $0x60] sm:$0xff] }
  0xd1   : > { %7616 = vst [vmem:[#allocation77_spill] sm:$0xff] %v5755_v46  ;;  %v5774_v51 = vand.u32 4294901760, %v5762_v6 }
  0xd2   : > { %1083 = vmatmul.f32.gmra.mxu0 %v5707_v59  ;;  %1302 = vmatmul.f32.gmra.mxu1 %v5689_v43  ;;  %7617 = vst [vmem:[#allocation78_spill] sm:$0xff] %v5762_v6 }
  0xd3   : > { %7619 = vst [vmem:[#allocation80_spill] sm:$0xff] %v5774_v51 }
  0xd4   : > { %1457 = vmatmul.f32.gmra.mxu2 %v5696_v8 }
  0xd6   : > { %1640 = vmatmul.f32.gmra.mxu3 %v5710_v17  ;;  %v5771_v17 = vand.u32 4294901760, %v1105_v36 }
  0xda   : > { %1091 = vmatmul.f32.gmra.mxu0 %v5731_v40  ;;  %1306 = vmatmul.f32.gmra.mxu1 %v5712_v12 }
  0xdc   : > { %1462 = vmatmul.f32.gmra.mxu2 %v5721_v30  ;;  %v926_v30 = vsel %vm733_vm0, %v859_v33, 0  ;;  %v860_v33 = vld [vmem:[#allocation2 + $0x90] sm:$0xff] }
  0xdd   : > { %v5776_v13 = vand.u32 4294901760, %v926_v30  ;;  %v929_v36 = vsel %vm733_vm0, %v860_v33, 0 }
  0xde   : > { %1646 = vmatmul.f32.gmra.mxu3 %v5734_v31  ;;  %v697_v31 = vld [vmem:[%s5323_s18 + $0x60] sm:$0xff] }
  0xdf   : > { %v5768_v8 = vsub.f32 %v681_v2, %v697_v31  ;;  %7620 = vst [vmem:[#allocation81_spill] sm:$0xff] %v5776_v13  ;;  %v1113_v31 = vsub.f32 %v5762_v6, %v5774_v51  ;;  %v5785_v14 = vsub.f32 %v926_v30, %v5776_v13  ;;  %v682_v2 = vld [vmem:[%s5316_s6 + $0x68] sm:$0xff]  ;;  %v5799_v30 = vand.u32 4294901760, %v929_v36 }
  0xe1   : > { %7618 = vst [vmem:[#allocation79_spill] sm:$0xff] %v5768_v8  ;;  %v5794_v1 = vand.u32 4294901760, %v1113_v31  ;;  %v5797_v47 = vand.u32 4294901760, %v5785_v14  ;;  %v5810_v31 = vsub.f32 %v929_v36, %v5799_v30 }
  0xe2   : > { %1099 = vmatmul.f32.gmra.mxu0 %v5750_v10  ;;  %838 = vst.msk [vmem:[#allocation2 + $0xa9] sm:$0xff] %vm733_vm0, %v5768_v8  ;;  %1310 = vmatmul.f32.gmra.mxu1 %v5736_v37  ;;  %v1251_v23 = vpop.f32.mrf.mxu1 }
  0xe3   : > { %7621 = vst [vmem:[#allocation82_spill] sm:$0xff] %v5785_v14 }
  0xe4   : > { %1467 = vmatmul.f32.gmra.mxu2 %v5745_v52  ;;  %v698_v52 = vld [vmem:[%s5323_s18 + $0x68] sm:$0xff]  ;;  %7623 = vst [vmem:[#allocation84_spill] sm:$0xff] %v5797_v47 }
  0xe5   : > { %v5791_v8 = vsub.f32 %v682_v2, %v698_v52  ;;  %7624 = vst [vmem:[#allocation85_spill] sm:$0xff] %v5799_v30  ;;  %v861_v52 = vld [vmem:[#allocation2 + $0x98] sm:$0xff] }
  0xe6   : > { %1652 = vmatmul.f32.gmra.mxu3 %v5753_v35  ;;  %7625 = vst [vmem:[#allocation86_spill] sm:$0xff] %v5810_v31  ;;  %v932_v2 = vsel %vm733_vm0, %v861_v52, 0  ;;  %v862_v52 = vld [vmem:[#allocation2 + $0xa0] sm:$0xff] }
  0xe7   : > { %7622 = vst [vmem:[#allocation83_spill] sm:$0xff] %v5791_v8  ;;  %v935_v28 = vsel %vm733_vm0, %v862_v52, 0 }
  0xe8   : > { %839 = vst.msk [vmem:[#allocation2 + $0xb1] sm:$0xff] %vm733_vm0, %v5791_v8 }
  0xe9   : > { %v988_v35 = vpop.f32.mrf.mxu0  ;;  %v1393_v32 = vpop.f32.mrf.mxu2 }
  0xea   : > { %1107 = vmatmul.f32.gmra.mxu0 %v5771_v17  ;;  %v1252_v53 = vadd.f32 %v1251_v23, %v988_v35  ;;  %1314 = vmatmul.f32.gmra.mxu1 %v5755_v46  ;;  %v1121_v35 = vsub.f32 %v5785_v14, %v5797_v47 }
  0xeb   : > { %v1563_v33 = vpop.f32.mrf.mxu3 }
  0xec   : > { %1472 = vmatmul.f32.gmra.mxu2 %v5762_v6  ;;  %v1394_v6 = vadd.f32 %v1393_v32, %v1252_v53  ;;  %v5815_v32 = vand.u32 4294901760, %v1121_v35  ;;  %v5818_v53 = vand.u32 4294901760, %v5810_v31 }
  0xee   : > { %1658 = vmatmul.f32.gmra.mxu3 %v5774_v51  ;;  %v5805_v23 = vadd.f32 %v1563_v33, %v1394_v6  ;;  %v1255_v51 = vpop.f32.mrf.mxu1  ;;  %7626 = vst [vmem:[#allocation87_spill] sm:$0xff] %v5818_v53  ;;  %v5820_v6 = vand.u32 4294901760, %v932_v2  ;;  %v1129_v35 = vsub.f32 %v5810_v31, %v5818_v53 }
  0xf0   : > { %7627 = vst [vmem:[#allocation88_spill] sm:$0xff] %v5820_v6 }
  0xf2   : > { %1115 = vmatmul.f32.gmra.mxu0 %v5794_v1  ;;  %1318 = vmatmul.f32.gmra.mxu1 %v5776_v13 }
  0xf3   : > { %v996_v33 = vpop.f32.mrf.mxu0  ;;  %v1398_v8 = vpop.f32.mrf.mxu2 }
  0xf4   : > { %1477 = vmatmul.f32.gmra.mxu2 %v5785_v14  ;;  %v1256_v36 = vadd.f32 %v1255_v51, %v996_v33  ;;  %v683_v51 = vld [vmem:[%s5316_s6 + $0x70] sm:$0xff] }
  0xf5   : > { %v1569_v24 = vpop.f32.mrf.mxu3  ;;  %v699_v33 = vld [vmem:[%s5323_s18 + $0x70] sm:$0xff] }
  0xf6   : > { %1664 = vmatmul.f32.gmra.mxu3 %v5797_v47  ;;  %v1399_v14 = vadd.f32 %v1398_v8, %v1256_v36  ;;  %v5827_v47 = vsub.f32 %v932_v2, %v5820_v6  ;;  %v1259_v20 = vpop.f32.mrf.mxu1  ;;  %v5835_v61 = vsub.f32 %v683_v51, %v699_v33  ;;  %v5838_v8 = vand.u32 4294901760, %v1129_v35  ;;  %v863_v51 = vld [vmem:[#allocation2 + $0xa8] sm:$0xff] }
  0xf7   : > { %v5843_v2 = vand.u32 4294901760, %v935_v28  ;;  %v938_v4 = vsel %vm733_vm0, %v863_v51, 0 }
  0xf8   : > { %7628 = vst [vmem:[#allocation89_spill] sm:$0xff] %v5827_v47  ;;  %v5830_v9 = vadd.f32 %v1569_v24, %v1399_v14  ;;  %v5841_v36 = vand.u32 4294901760, %v5827_v47 }
  0xf9   : > { %7629 = vst [vmem:[#allocation90_spill] sm:$0xff] %v5835_v61 }
  0xfa   : > { %1123 = vmatmul.f32.gmra.mxu0 %v5815_v32  ;;  %7630 = vst [vmem:[#allocation91_spill] sm:$0xff] %v5841_v36  ;;  %1322 = vmatmul.f32.gmra.mxu1 %v5799_v30 }
  0xfb   : > { %7631 = vst [vmem:[#allocation92_spill] sm:$0xff] %v5843_v2  ;;  %v1004_v24 = vpop.f32.mrf.mxu0  ;;  %v1403_v14 = vpop.f32.mrf.mxu2 }
  0xfc   : > { %1482 = vmatmul.f32.gmra.mxu2 %v5810_v31  ;;  %840 = vst.msk [vmem:[#allocation2 + $0xc1] sm:$0xff] %vm733_vm0, %v5835_v61  ;;  %v1260_v52 = vadd.f32 %v1259_v20, %v1004_v24  ;;  %v1137_v31 = vsub.f32 %v5827_v47, %v5841_v36  ;;  %v684_v20 = vld [vmem:[%s5316_s6 + $0x78] sm:$0xff] }
  0xfd   : > { %v1575_v33 = vpop.f32.mrf.mxu3  ;;  %v700_v24 = vld [vmem:[%s5323_s18 + $0x78] sm:$0xff] }
  0xfe   : > { %1670 = vmatmul.f32.gmra.mxu3 %v5818_v53  ;;  %v1404_v35 = vadd.f32 %v1403_v14, %v1260_v52  ;;  %v5852_v53 = vsub.f32 %v935_v28, %v5843_v2  ;;  %v5860_v60 = vsub.f32 %v684_v20, %v700_v24  ;;  %v5863_v14 = vand.u32 4294901760, %v1137_v31 }
  0xff   : > { %v1263_v61 = vpop.f32.mrf.mxu1  ;;  %v5868_v28 = vand.u32 4294901760, %v938_v4 }
 0x100   : > { %7632 = vst [vmem:[#allocation93_spill] sm:$0xff] %v5852_v53  ;;  %v5855_v58 = vadd.f32 %v1575_v33, %v1404_v35  ;;  %v5866_v52 = vand.u32 4294901760, %v5852_v53  ;;  %v864_v35 = vld [vmem:[#allocation2 + $0xb0] sm:$0xff] }
 0x101   : > { %7633 = vst [vmem:[#allocation94_spill] sm:$0xff] %v5860_v60 }
 0x102   : > { %1131 = vmatmul.f32.gmra.mxu0 %v5838_v8  ;;  %7634 = vst [vmem:[#allocation95_spill] sm:$0xff] %v5866_v52  ;;  %1326 = vmatmul.f32.gmra.mxu1 %v5820_v6  ;;  %v1145_v31 = vsub.f32 %v5852_v53, %v5866_v52 }
 0x103   : > { %7635 = vst [vmem:[#allocation96_spill] sm:$0xff] %v5868_v28 }
 0x104   : > { %1487 = vmatmul.f32.gmra.mxu2 %v5827_v47  ;;  %841 = vst.msk [vmem:[#allocation2 + $0xc9] sm:$0xff] %vm733_vm0, %v5860_v60  ;;  %v5877_v47 = vsub.f32 %v938_v4, %v5868_v28 }
 0x106   : > { %1676 = vmatmul.f32.gmra.mxu3 %v5841_v36  ;;  %7636 = vst [vmem:[#allocation97_spill] sm:$0xff] %v5877_v47  ;;  %v941_v36 = vsel %vm733_vm0, %v864_v35, 0  ;;  %v5887_v60 = vand.u32 4294901760, %v5877_v47  ;;  %v865_v35 = vld [vmem:[#allocation2 + $0xb8] sm:$0xff] }
 0x107   : > { %v1012_v45 = vpop.f32.mrf.mxu0  ;;  %v1408_v51 = vpop.f32.mrf.mxu2 }
 0x108   : > { %v1264_v33 = vadd.f32 %v1263_v61, %v1012_v45  ;;  %v1267_v45 = vpop.f32.mrf.mxu1  ;;  %v5884_v61 = vand.u32 4294901760, %v1145_v31  ;;  %7637 = vst [vmem:[#allocation98_spill] sm:$0xff] %v5887_v60 }
 0x109   : > { %v1581_v20 = vpop.f32.mrf.mxu3 }
 0x10a   : > { %1139 = vmatmul.f32.gmra.mxu0 %v5863_v14  ;;  %v1409_v24 = vadd.f32 %v1408_v51, %v1264_v33  ;;  %v5889_v51 = vand.u32 4294901760, %v941_v36  ;;  %1330 = vmatmul.f32.gmra.mxu1 %v5843_v2 }
 0x10c   : > { %v5880_v48 = vadd.f32 %v1581_v20, %v1409_v24  ;;  %1492 = vmatmul.f32.gmra.mxu2 %v5852_v53  ;;  %7638 = vst [vmem:[#allocation99_spill] sm:$0xff] %v5889_v51  ;;  %v1153_v53 = vsub.f32 %v5877_v47, %v5887_v60  ;;  %v5896_v31 = vsub.f32 %v941_v36, %v5889_v51 }
 0x10e   : > { %1682 = vmatmul.f32.gmra.mxu3 %v5866_v52  ;;  %7639 = vst [vmem:[#allocation100_spill] sm:$0xff] %v5896_v31  ;;  %v944_v52 = vsel %vm733_vm0, %v865_v35, 0  ;;  %v5906_v15 = vand.u32 4294901760, %v5896_v31  ;;  %v866_v35 = vld [vmem:[#allocation2 + $0xc0] sm:$0xff] }
 0x10f   : > { %v1020_v33 = vpop.f32.mrf.mxu0  ;;  %v1413_v38 = vpop.f32.mrf.mxu2 }
 0x110   : > { %v1268_v4 = vadd.f32 %v1267_v45, %v1020_v33  ;;  %v1271_v45 = vpop.f32.mrf.mxu1  ;;  %v5903_v33 = vand.u32 4294901760, %v1153_v53  ;;  %7642 = vst [vmem:[#allocation103_spill] sm:$0xff] %v5906_v15 }
 0x111   : > { %v1587_v20 = vpop.f32.mrf.mxu3 }
 0x112   : > { %1147 = vmatmul.f32.gmra.mxu0 %v5884_v61  ;;  %v1414_v24 = vadd.f32 %v1413_v38, %v1268_v4  ;;  %7641 = vst [vmem:[#allocation102_spill] sm:$0xff] %v5903_v33  ;;  %v5908_v38 = vand.u32 4294901760, %v944_v52  ;;  %1334 = vmatmul.f32.gmra.mxu1 %v5868_v28 }
 0x114   : > { %v5899_v42 = vadd.f32 %v1587_v20, %v1414_v24  ;;  %1497 = vmatmul.f32.gmra.mxu2 %v5877_v47  ;;  %7643 = vst [vmem:[#allocation104_spill] sm:$0xff] %v5908_v38  ;;  %v1161_v47 = vsub.f32 %v5896_v31, %v5906_v15  ;;  %v5915_v53 = vsub.f32 %v944_v52, %v5908_v38 }
 0x116   : > { %7640 = vst [vmem:[#allocation101_spill] sm:$0xff] %v5899_v42  ;;  %1688 = vmatmul.f32.gmra.mxu3 %v5887_v60  ;;  %v947_v60 = vsel %vm733_vm0, %v866_v35, 0  ;;  %v5925_v28 = vand.u32 4294901760, %v5915_v53  ;;  %v867_v35 = vld [vmem:[#allocation2 + $0xc8] sm:$0xff] }
 0x117   : > { %v1028_v4 = vpop.f32.mrf.mxu0  ;;  %v1418_v19 = vpop.f32.mrf.mxu2  ;;  %7644 = vst [vmem:[#allocation105_spill] sm:$0xff] %v5915_v53 }
 0x118   : > { %v1272_v36 = vadd.f32 %v1271_v45, %v1028_v4  ;;  %v1275_v45 = vpop.f32.mrf.mxu1  ;;  %v5922_v4 = vand.u32 4294901760, %v1161_v47  ;;  %7647 = vst [vmem:[#allocation108_spill] sm:$0xff] %v5925_v28 }
 0x119   : > { %v1593_v20 = vpop.f32.mrf.mxu3 }
 0x11a   : > { %1155 = vmatmul.f32.gmra.mxu0 %v5903_v33  ;;  %v1419_v24 = vadd.f32 %v1418_v19, %v1272_v36  ;;  %7646 = vst [vmem:[#allocation107_spill] sm:$0xff] %v5922_v4  ;;  %v5927_v19 = vand.u32 4294901760, %v947_v60  ;;  %1338 = vmatmul.f32.gmra.mxu1 %v5889_v51 }
 0x11c   : > { %v5918_v42 = vadd.f32 %v1593_v20, %v1419_v24  ;;  %1502 = vmatmul.f32.gmra.mxu2 %v5896_v31  ;;  %7648 = vst [vmem:[#allocation109_spill] sm:$0xff] %v5927_v19  ;;  %v1169_v31 = vsub.f32 %v5915_v53, %v5925_v28  ;;  %v5934_v47 = vsub.f32 %v947_v60, %v5927_v19 }
 0x11e   : > { %7645 = vst [vmem:[#allocation106_spill] sm:$0xff] %v5918_v42  ;;  %1694 = vmatmul.f32.gmra.mxu3 %v5906_v15  ;;  %v950_v15 = vsel %vm733_vm0, %v867_v35, 0  ;;  %v5944_v51 = vand.u32 4294901760, %v5934_v47  ;;  %v868_v35 = vld [vmem:[#allocation2 + $0xd0] sm:$0xff] }
 0x11f   : > { %v1036_v36 = vpop.f32.mrf.mxu0  ;;  %v1423_v33 = vpop.f32.mrf.mxu2  ;;  %7649 = vst [vmem:[#allocation110_spill] sm:$0xff] %v5934_v47 }
 0x120   : > { %v1276_v52 = vadd.f32 %v1275_v45, %v1036_v36  ;;  %v1279_v45 = vpop.f32.mrf.mxu1  ;;  %v5941_v36 = vand.u32 4294901760, %v1169_v31  ;;  %7652 = vst [vmem:[#allocation113_spill] sm:$0xff] %v5944_v51 }
 0x121   : > { %v1599_v20 = vpop.f32.mrf.mxu3 }
 0x122   : > { %1163 = vmatmul.f32.gmra.mxu0 %v5922_v4  ;;  %v1424_v24 = vadd.f32 %v1423_v33, %v1276_v52  ;;  %7651 = vst [vmem:[#allocation112_spill] sm:$0xff] %v5941_v36  ;;  %v5946_v33 = vand.u32 4294901760, %v950_v15  ;;  %1342 = vmatmul.f32.gmra.mxu1 %v5908_v38 }
 0x124   : > { %v5937_v42 = vadd.f32 %v1599_v20, %v1424_v24  ;;  %1507 = vmatmul.f32.gmra.mxu2 %v5915_v53  ;;  %7653 = vst [vmem:[#allocation114_spill] sm:$0xff] %v5946_v33  ;;  %v1177_v53 = vsub.f32 %v5934_v47, %v5944_v51  ;;  %v5953_v31 = vsub.f32 %v950_v15, %v5946_v33 }
 0x126   : > { %7650 = vst [vmem:[#allocation111_spill] sm:$0xff] %v5937_v42  ;;  %1700 = vmatmul.f32.gmra.mxu3 %v5925_v28  ;;  %v953_v28 = vsel %vm733_vm0, %v868_v35, 0  ;;  %v5963_v38 = vand.u32 4294901760, %v5953_v31  ;;  %v869_v35 = vld [vmem:[#allocation2 + $0xd8] sm:$0xff] }
 0x127   : > { %v1044_v52 = vpop.f32.mrf.mxu0  ;;  %v1428_v4 = vpop.f32.mrf.mxu2  ;;  %7654 = vst [vmem:[#allocation115_spill] sm:$0xff] %v5953_v31 }
 0x128   : > { %v1280_v60 = vadd.f32 %v1279_v45, %v1044_v52  ;;  %v1283_v45 = vpop.f32.mrf.mxu1  ;;  %v5960_v52 = vand.u32 4294901760, %v1177_v53  ;;  %7657 = vst [vmem:[#allocation118_spill] sm:$0xff] %v5963_v38 }
 0x129   : > { %v1605_v20 = vpop.f32.mrf.mxu3 }
 0x12a   : > { %1171 = vmatmul.f32.gmra.mxu0 %v5941_v36  ;;  %v1429_v24 = vadd.f32 %v1428_v4, %v1280_v60  ;;  %7656 = vst [vmem:[#allocation117_spill] sm:$0xff] %v5960_v52  ;;  %v5965_v4 = vand.u32 4294901760, %v953_v28  ;;  %1346 = vmatmul.f32.gmra.mxu1 %v5927_v19 }
 0x12c   : > { %v5956_v42 = vadd.f32 %v1605_v20, %v1429_v24  ;;  %1512 = vmatmul.f32.gmra.mxu2 %v5934_v47  ;;  %7658 = vst [vmem:[#allocation119_spill] sm:$0xff] %v5965_v4  ;;  %v1185_v47 = vsub.f32 %v5953_v31, %v5963_v38  ;;  %v5972_v53 = vsub.f32 %v953_v28, %v5965_v4 }
 0x12e   : > { %7655 = vst [vmem:[#allocation116_spill] sm:$0xff] %v5956_v42  ;;  %1706 = vmatmul.f32.gmra.mxu3 %v5944_v51  ;;  %v956_v51 = vsel %vm733_vm0, %v869_v35, 0  ;;  %v5982_v19 = vand.u32 4294901760, %v5972_v53  ;;  %v870_v35 = vld [vmem:[#allocation2 + $0xe0] sm:$0xff] }
 0x12f   : > { %v1052_v60 = vpop.f32.mrf.mxu0  ;;  %v1433_v36 = vpop.f32.mrf.mxu2  ;;  %7659 = vst [vmem:[#allocation120_spill] sm:$0xff] %v5972_v53 }
 0x130   : > { %v1284_v15 = vadd.f32 %v1283_v45, %v1052_v60  ;;  %v1287_v45 = vpop.f32.mrf.mxu1  ;;  %v5979_v60 = vand.u32 4294901760, %v1185_v47  ;;  %7662 = vst [vmem:[#allocation123_spill] sm:$0xff] %v5982_v19 }
 0x131   : > { %v1611_v20 = vpop.f32.mrf.mxu3 }
 0x132   : > { %1179 = vmatmul.f32.gmra.mxu0 %v5960_v52  ;;  %v1434_v24 = vadd.f32 %v1433_v36, %v1284_v15  ;;  %7661 = vst [vmem:[#allocation122_spill] sm:$0xff] %v5979_v60  ;;  %v5984_v36 = vand.u32 4294901760, %v956_v51  ;;  %1350 = vmatmul.f32.gmra.mxu1 %v5946_v33 }
 0x134   : > { %v5975_v42 = vadd.f32 %v1611_v20, %v1434_v24  ;;  %1517 = vmatmul.f32.gmra.mxu2 %v5953_v31  ;;  %7663 = vst [vmem:[#allocation124_spill] sm:$0xff] %v5984_v36  ;;  %v1193_v31 = vsub.f32 %v5972_v53, %v5982_v19  ;;  %v5991_v47 = vsub.f32 %v956_v51, %v5984_v36 }
 0x136   : > { %7660 = vst [vmem:[#allocation121_spill] sm:$0xff] %v5975_v42  ;;  %1712 = vmatmul.f32.gmra.mxu3 %v5963_v38  ;;  %v959_v38 = vsel %vm733_vm0, %v870_v35, 0  ;;  %v6001_v33 = vand.u32 4294901760, %v5991_v47  ;;  %v871_v35 = vld [vmem:[#allocation2 + $0xe8] sm:$0xff] }
 0x137   : > { %v1060_v15 = vpop.f32.mrf.mxu0  ;;  %v1438_v52 = vpop.f32.mrf.mxu2  ;;  %7664 = vst [vmem:[#allocation125_spill] sm:$0xff] %v5991_v47 }
 0x138   : > { %v1288_v28 = vadd.f32 %v1287_v45, %v1060_v15  ;;  %v1291_v45 = vpop.f32.mrf.mxu1  ;;  %v5998_v15 = vand.u32 4294901760, %v1193_v31  ;;  %7667 = vst [vmem:[#allocation128_spill] sm:$0xff] %v6001_v33 }
 0x139   : > { %v1617_v20 = vpop.f32.mrf.mxu3 }
 0x13a   : > { %1187 = vmatmul.f32.gmra.mxu0 %v5979_v60  ;;  %v1439_v24 = vadd.f32 %v1438_v52, %v1288_v28  ;;  %7666 = vst [vmem:[#allocation127_spill] sm:$0xff] %v5998_v15  ;;  %v6003_v52 = vand.u32 4294901760, %v959_v38  ;;  %1354 = vmatmul.f32.gmra.mxu1 %v5965_v4 }
 0x13c   : > { %v5994_v42 = vadd.f32 %v1617_v20, %v1439_v24  ;;  %1522 = vmatmul.f32.gmra.mxu2 %v5972_v53  ;;  %7668 = vst [vmem:[#allocation129_spill] sm:$0xff] %v6003_v52  ;;  %v1201_v53 = vsub.f32 %v5991_v47, %v6001_v33  ;;  %v6010_v31 = vsub.f32 %v959_v38, %v6003_v52 }
 0x13e   : > { %7665 = vst [vmem:[#allocation126_spill] sm:$0xff] %v5994_v42  ;;  %1718 = vmatmul.f32.gmra.mxu3 %v5982_v19  ;;  %v962_v19 = vsel %vm733_vm0, %v871_v35, 0  ;;  %v6020_v4 = vand.u32 4294901760, %v6010_v31 }
 0x13f   : > { %v1068_v28 = vpop.f32.mrf.mxu0  ;;  %v1443_v60 = vpop.f32.mrf.mxu2  ;;  %7669 = vst [vmem:[#allocation130_spill] sm:$0xff] %v6010_v31 }
 0x140   : > { %v1292_v51 = vadd.f32 %v1291_v45, %v1068_v28  ;;  %v1295_v45 = vpop.f32.mrf.mxu1  ;;  %v6017_v28 = vand.u32 4294901760, %v1201_v53  ;;  %7671 = vst [vmem:[#allocation132_spill] sm:$0xff] %v6020_v4 }
 0x141   : > { %v1623_v20 = vpop.f32.mrf.mxu3 }
 0x142   : > { %1195 = vmatmul.f32.gmra.mxu0 %v5998_v15  ;;  %v1444_v24 = vadd.f32 %v1443_v60, %v1292_v51  ;;  %7670 = vst [vmem:[#allocation131_spill] sm:$0xff] %v6017_v28  ;;  %v6022_v60 = vand.u32 4294901760, %v962_v19  ;;  %1358 = vmatmul.f32.gmra.mxu1 %v5984_v36 }
 0x144   : > { %v6013_v42 = vadd.f32 %v1623_v20, %v1444_v24  ;;  %1527 = vmatmul.f32.gmra.mxu2 %v5991_v47  ;;  %v1209_v24 = vsub.f32 %v6010_v31, %v6020_v4  ;;  %v6029_v53 = vsub.f32 %v962_v19, %v6022_v60 }
 0x146   : > { %1724 = vmatmul.f32.gmra.mxu3 %v6001_v33  ;;  %7672 = vst [vmem:[#allocation133_spill] sm:$0xff] %v6029_v53 }
 0x147   : > { %v1076_v51 = vpop.f32.mrf.mxu0  ;;  %v1448_v15 = vpop.f32.mrf.mxu2 }
 0x148   : > { %v1296_v38 = vadd.f32 %v1295_v45, %v1076_v51  ;;  %v1299_v33 = vpop.f32.mrf.mxu1  ;;  %v6035_v45 = vand.u32 4294901760, %v1209_v24  ;;  %v6038_v51 = vand.u32 4294901760, %v6029_v53 }
 0x149   : > { %v1629_v35 = vpop.f32.mrf.mxu3 }
 0x14a   : > { %1203 = vmatmul.f32.gmra.mxu0 %v6017_v28  ;;  %v1449_v20 = vadd.f32 %v1448_v15, %v1296_v38  ;;  %7673 = vst [vmem:[#allocation134_spill] sm:$0xff] %v6038_v51  ;;  %1362 = vmatmul.f32.gmra.mxu1 %v6003_v52 }
 0x14c   : > { %v6031_v47 = vadd.f32 %v1629_v35, %v1449_v20  ;;  %1532 = vmatmul.f32.gmra.mxu2 %v6010_v31  ;;  %v1217_v35 = vsub.f32 %v6029_v53, %v6038_v51 }
 0x14e   : > { %1730 = vmatmul.f32.gmra.mxu3 %v6020_v4  ;;  %v6048_v31 = vand.u32 4294901760, %v1217_v35 }
 0x14f   : > { %v1084_v36 = vpop.f32.mrf.mxu0  ;;  %v1453_v15 = vpop.f32.mrf.mxu2 }
 0x150   : > { %v1300_v38 = vadd.f32 %v1299_v33, %v1084_v36  ;;  %v1303_v24 = vpop.f32.mrf.mxu1 }
 0x151   : > { %v1635_v28 = vpop.f32.mrf.mxu3 }
 0x152   : > { %1211 = vmatmul.f32.gmra.mxu0 %v6035_v45  ;;  %v1454_v19 = vadd.f32 %v1453_v15, %v1300_v38  ;;  %1366 = vmatmul.f32.gmra.mxu1 %v6022_v60 }
 0x154   : > { %v6044_v20 = vadd.f32 %v1635_v28, %v1454_v19  ;;  %1537 = vmatmul.f32.gmra.mxu2 %v6029_v53 }
 0x156   : > { %1736 = vmatmul.f32.gmra.mxu3 %v6038_v51 }
 0x157   : > { %v1092_v4 = vpop.f32.mrf.mxu0  ;;  %v1458_v33 = vpop.f32.mrf.mxu2 }
 0x158   : > { %v1304_v36 = vadd.f32 %v1303_v24, %v1092_v4  ;;  %v1307_v28 = vpop.f32.mrf.mxu1 }
 0x159   : > { %v1641_v52 = vpop.f32.mrf.mxu3 }
 0x15a   : > { %1219 = vmatmul.f32.gmra.mxu0 %v6048_v31  ;;  %v1459_v15 = vadd.f32 %v1458_v33, %v1304_v36  ;;  %1902 = vmatmul.f32.vlgmr.msrb.gmra.mxu1 %v5376_v11 }
 0x15c   : > { %v6052_v38 = vadd.f32 %v1641_v52, %v1459_v15  ;;  %2047 = vmatmul.f32.vlgmr.msrb.gmra.mxu2 %v5416_v27 }
 0x15e   : > { %2310 = vmatmul.f32.vlgmr.msrb.gmra.mxu3 %v5376_v11 }
 0x15f   : > { %v1100_v19 = vpop.f32.mrf.mxu0  ;;  %v1463_v53 = vpop.f32.mrf.mxu2 }
 0x160   : > { %v1308_v35 = vadd.f32 %v1307_v28, %v1100_v19  ;;  %v1311_v52 = vpop.f32.mrf.mxu1 }
 0x161   : > { %v1647_v51 = vpop.f32.mrf.mxu3 }
 0x162   : > { %v1464_v4 = vadd.f32 %v1463_v53, %v1308_v35  ;;  %1763 = vmatmul.f32.vlgmr.msrb.gmra.mxu0 %v5376_v11  ;;  %1906 = vmatmul.f32.gmra.mxu1 %v5429_v34 }
 0x164   : > { %v6058_v24 = vadd.f32 %v1647_v51, %v1464_v4  ;;  %2055 = vmatmul.f32.gmra.mxu2 %v5480_v49 }
 0x166   : > { %2314 = vmatmul.f32.gmra.mxu3 %v5429_v34 }
 0x167   : > { %v1108_v27 = vpop.f32.mrf.mxu0  ;;  %v1468_v33 = vpop.f32.mrf.mxu2 }
 0x168   : > { %v1312_v36 = vadd.f32 %v1311_v52, %v1108_v27  ;;  %v1315_v53 = vpop.f32.mrf.mxu1 }
 0x169   : > { %v1653_v15 = vpop.f32.mrf.mxu3 }
 0x16a   : > { %v1469_v28 = vadd.f32 %v1468_v33, %v1312_v36  ;;  %1767 = vmatmul.f32.gmra.mxu0 %v5429_v34  ;;  %1910 = vmatmul.f32.gmra.mxu1 %v5449_v41 }
 0x16c   : > { %v6064_v19 = vadd.f32 %v1653_v15, %v1469_v28  ;;  %2063 = vmatmul.f32.gmra.mxu2 %v5492_v56 }
 0x16e   : > { %2318 = vmatmul.f32.gmra.mxu3 %v5449_v41 }
 0x16f   : > { %v1116_v49 = vpop.f32.mrf.mxu0  ;;  %v1473_v51 = vpop.f32.mrf.mxu2 }
 0x170   : > { %v1316_v35 = vadd.f32 %v1315_v53, %v1116_v49  ;;  %v1319_v33 = vpop.f32.mrf.mxu1 }
 0x171   : > { %v1659_v4 = vpop.f32.mrf.mxu3 }
 0x172   : > { %v1474_v52 = vadd.f32 %v1473_v51, %v1316_v35  ;;  %1771 = vmatmul.f32.gmra.mxu0 %v5449_v41  ;;  %1914 = vmatmul.f32.gmra.mxu1 %v5488_v54 }
 0x174   : > { %v6070_v27 = vadd.f32 %v1659_v4, %v1474_v52  ;;  %2071 = vmatmul.f32.gmra.mxu2 %v5516_v3 }
 0x176   : > { %2322 = vmatmul.f32.gmra.mxu3 %v5488_v54 }
 0x177   : > { %v1124_v56 = vpop.f32.mrf.mxu0  ;;  %v1478_v36 = vpop.f32.mrf.mxu2 }
 0x178   : > { %v1320_v15 = vadd.f32 %v1319_v33, %v1124_v56  ;;  %v1323_v51 = vpop.f32.mrf.mxu1 }
 0x179   : > { %v1665_v28 = vpop.f32.mrf.mxu3 }
 0x17a   : > { %v1479_v53 = vadd.f32 %v1478_v36, %v1320_v15  ;;  %1775 = vmatmul.f32.gmra.mxu0 %v5488_v54  ;;  %1918 = vmatmul.f32.gmra.mxu1 %v5494_v57 }
 0x17c   : > { %v6076_v49 = vadd.f32 %v1665_v28, %v1479_v53  ;;  %2079 = vmatmul.f32.gmra.mxu2 %v5539_v18 }
 0x17e   : > { %2326 = vmatmul.f32.gmra.mxu3 %v5494_v57 }
 0x17f   : > { %v1132_v3 = vpop.f32.mrf.mxu0  ;;  %v1483_v35 = vpop.f32.mrf.mxu2 }
 0x180   : > { %v1324_v4 = vadd.f32 %v1323_v51, %v1132_v3  ;;  %v1327_v36 = vpop.f32.mrf.mxu1 }
 0x181   : > { %v1671_v52 = vpop.f32.mrf.mxu3 }
 0x182   : > { %v1484_v33 = vadd.f32 %v1483_v35, %v1324_v4  ;;  %1779 = vmatmul.f32.gmra.mxu0 %v5494_v57  ;;  %1922 = vmatmul.f32.gmra.mxu1 %v5521_v5 }
 0x184   : > { %v6082_v56 = vadd.f32 %v1671_v52, %v1484_v33  ;;  %2087 = vmatmul.f32.gmra.mxu2 %v5558_v26 }
 0x186   : > { %2330 = vmatmul.f32.gmra.mxu3 %v5521_v5 }
 0x187   : > { %v1140_v18 = vpop.f32.mrf.mxu0  ;;  %v1488_v15 = vpop.f32.mrf.mxu2 }
 0x188   : > { %v1328_v28 = vadd.f32 %v1327_v36, %v1140_v18  ;;  %v1331_v35 = vpop.f32.mrf.mxu1 }
 0x189   : > { %v1677_v53 = vpop.f32.mrf.mxu3 }
 0x18a   : > { %v1489_v51 = vadd.f32 %v1488_v15, %v1328_v28  ;;  %1783 = vmatmul.f32.gmra.mxu0 %v5521_v5  ;;  %1926 = vmatmul.f32.gmra.mxu1 %v5544_v21 }
 0x18c   : > { %v6088_v3 = vadd.f32 %v1677_v53, %v1489_v51  ;;  %2095 = vmatmul.f32.gmra.mxu2 %v5579_v44 }
 0x18e   : > { %2334 = vmatmul.f32.gmra.mxu3 %v5544_v21 }
 0x18f   : > { %v1148_v26 = vpop.f32.mrf.mxu0  ;;  %v1493_v4 = vpop.f32.mrf.mxu2 }
 0x190   : > { %v1332_v52 = vadd.f32 %v1331_v35, %v1148_v26  ;;  %v1335_v15 = vpop.f32.mrf.mxu1 }
 0x191   : > { %v1683_v33 = vpop.f32.mrf.mxu3 }
 0x192   : > { %v1494_v36 = vadd.f32 %v1493_v4, %v1332_v52  ;;  %1787 = vmatmul.f32.gmra.mxu0 %v5544_v21  ;;  %1930 = vmatmul.f32.gmra.mxu1 %v5563_v29 }
 0x194   : > { %v6094_v18 = vadd.f32 %v1683_v33, %v1494_v36  ;;  %2103 = vmatmul.f32.gmra.mxu2 %v5602_v0 }
 0x196   : > { %2338 = vmatmul.f32.gmra.mxu3 %v5563_v29 }
 0x197   : > { %v1156_v44 = vpop.f32.mrf.mxu0  ;;  %v1498_v28 = vpop.f32.mrf.mxu2 }
 0x198   : > { %v1336_v53 = vadd.f32 %v1335_v15, %v1156_v44  ;;  %v1339_v4 = vpop.f32.mrf.mxu1 }
 0x199   : > { %v1689_v51 = vpop.f32.mrf.mxu3 }
 0x19a   : > { %v1499_v35 = vadd.f32 %v1498_v28, %v1336_v53  ;;  %1791 = vmatmul.f32.gmra.mxu0 %v5563_v29  ;;  %1934 = vmatmul.f32.gmra.mxu1 %v5584_v50 }
 0x19c   : > { %v6100_v26 = vadd.f32 %v1689_v51, %v1499_v35  ;;  %2111 = vmatmul.f32.gmra.mxu2 %v5621_v22 }
 0x19e   : > { %2342 = vmatmul.f32.gmra.mxu3 %v5584_v50 }
 0x19f   : > { %v1164_v0 = vpop.f32.mrf.mxu0  ;;  %v1503_v52 = vpop.f32.mrf.mxu2 }
 0x1a0   : > { %v1340_v33 = vadd.f32 %v1339_v4, %v1164_v0  ;;  %v1343_v28 = vpop.f32.mrf.mxu1 }
 0x1a1   : > { %v1695_v36 = vpop.f32.mrf.mxu3 }
 0x1a2   : > { %v1504_v15 = vadd.f32 %v1503_v52, %v1340_v33  ;;  %1795 = vmatmul.f32.gmra.mxu0 %v5584_v50  ;;  %1938 = vmatmul.f32.gmra.mxu1 %v5607_v7 }
 0x1a4   : > { %v6106_v44 = vadd.f32 %v1695_v36, %v1504_v15  ;;  %2119 = vmatmul.f32.gmra.mxu2 %v5642_v55 }
 0x1a6   : > { %2346 = vmatmul.f32.gmra.mxu3 %v5607_v7 }
 0x1a7   : > { %v1172_v22 = vpop.f32.mrf.mxu0  ;;  %v1508_v53 = vpop.f32.mrf.mxu2 }
 0x1a8   : > { %v1344_v51 = vadd.f32 %v1343_v28, %v1172_v22  ;;  %v1347_v52 = vpop.f32.mrf.mxu1 }
 0x1a9   : > { %v1701_v35 = vpop.f32.mrf.mxu3 }
 0x1aa   : > { %v1509_v4 = vadd.f32 %v1508_v53, %v1344_v51  ;;  %1799 = vmatmul.f32.gmra.mxu0 %v5607_v7  ;;  %1942 = vmatmul.f32.gmra.mxu1 %v5626_v25 }
 0x1ac   : > { %v6112_v0 = vadd.f32 %v1701_v35, %v1509_v4  ;;  %2127 = vmatmul.f32.gmra.mxu2 %v5665_v16 }
 0x1ae   : > { %2350 = vmatmul.f32.gmra.mxu3 %v5626_v25 }
 0x1af   : > { %v1180_v55 = vpop.f32.mrf.mxu0  ;;  %v1513_v33 = vpop.f32.mrf.mxu2 }
 0x1b0   : > { %v1348_v36 = vadd.f32 %v1347_v52, %v1180_v55  ;;  %v1351_v53 = vpop.f32.mrf.mxu1 }
 0x1b1   : > { %v1707_v15 = vpop.f32.mrf.mxu3 }
 0x1b2   : > { %v1514_v28 = vadd.f32 %v1513_v33, %v1348_v36  ;;  %1803 = vmatmul.f32.gmra.mxu0 %v5626_v25  ;;  %1946 = vmatmul.f32.gmra.mxu1 %v5647_v62 }
 0x1b4   : > { %v6118_v22 = vadd.f32 %v1707_v15, %v1514_v28  ;;  %2135 = vmatmul.f32.gmra.mxu2 %v5684_v39 }
 0x1b6   : > { %2354 = vmatmul.f32.gmra.mxu3 %v5647_v62 }
 0x1b7   : > { %v1188_v16 = vpop.f32.mrf.mxu0  ;;  %v1518_v51 = vpop.f32.mrf.mxu2 }
 0x1b8   : > { %v1352_v35 = vadd.f32 %v1351_v53, %v1188_v16  ;;  %v1355_v33 = vpop.f32.mrf.mxu1 }
 0x1b9   : > { %v1713_v4 = vpop.f32.mrf.mxu3 }
 0x1ba   : > { %v1519_v52 = vadd.f32 %v1518_v51, %v1352_v35  ;;  %1807 = vmatmul.f32.gmra.mxu0 %v5647_v62  ;;  %1950 = vmatmul.f32.gmra.mxu1 %v5670_v63 }
 0x1bc   : > { %v6124_v55 = vadd.f32 %v1713_v4, %v1519_v52  ;;  %2143 = vmatmul.f32.gmra.mxu2 %v5707_v59 }
 0x1be   : > { %2358 = vmatmul.f32.gmra.mxu3 %v5670_v63 }
 0x1bf   : > { %v1196_v39 = vpop.f32.mrf.mxu0  ;;  %v1523_v36 = vpop.f32.mrf.mxu2 }
 0x1c0   : > { %v1356_v15 = vadd.f32 %v1355_v33, %v1196_v39  ;;  %v1359_v51 = vpop.f32.mrf.mxu1 }
 0x1c1   : > { %v1719_v28 = vpop.f32.mrf.mxu3 }
 0x1c2   : > { %v1524_v53 = vadd.f32 %v1523_v36, %v1356_v15  ;;  %1811 = vmatmul.f32.gmra.mxu0 %v5670_v63  ;;  %1954 = vmatmul.f32.gmra.mxu1 %v5689_v43 }
 0x1c4   : > { %v6130_v16 = vadd.f32 %v1719_v28, %v1524_v53  ;;  %2151 = vmatmul.f32.gmra.mxu2 %v5731_v40 }
 0x1c6   : > { %2362 = vmatmul.f32.gmra.mxu3 %v5689_v43 }
 0x1c7   : > { %v1204_v59 = vpop.f32.mrf.mxu0  ;;  %v1528_v35 = vpop.f32.mrf.mxu2 }
 0x1c8   : > { %v1360_v4 = vadd.f32 %v1359_v51, %v1204_v59  ;;  %v1363_v36 = vpop.f32.mrf.mxu1 }
 0x1c9   : > { %v1725_v52 = vpop.f32.mrf.mxu3 }
 0x1ca   : > { %v1529_v33 = vadd.f32 %v1528_v35, %v1360_v4  ;;  %1815 = vmatmul.f32.gmra.mxu0 %v5689_v43  ;;  %1958 = vmatmul.f32.gmra.mxu1 %v5712_v12 }
 0x1cc   : > { %v6136_v39 = vadd.f32 %v1725_v52, %v1529_v33  ;;  %2159 = vmatmul.f32.gmra.mxu2 %v5750_v10 }
 0x1ce   : > { %2366 = vmatmul.f32.gmra.mxu3 %v5712_v12 }
 0x1cf   : > { %v1212_v40 = vpop.f32.mrf.mxu0  ;;  %v1533_v15 = vpop.f32.mrf.mxu2 }
 0x1d0   : > { %v1364_v28 = vadd.f32 %v1363_v36, %v1212_v40  ;;  %v1367_v35 = vpop.f32.mrf.mxu1 }
 0x1d1   : > { %v1731_v53 = vpop.f32.mrf.mxu3 }
 0x1d2   : > { %v1534_v51 = vadd.f32 %v1533_v15, %v1364_v28  ;;  %1819 = vmatmul.f32.gmra.mxu0 %v5712_v12  ;;  %1962 = vmatmul.f32.gmra.mxu1 %v5736_v37 }
 0x1d4   : > { %v6142_v59 = vadd.f32 %v1731_v53, %v1534_v51  ;;  %2167 = vmatmul.f32.gmra.mxu2 %v5771_v17 }
 0x1d6   : > { %7674 = vst [vmem:[#allocation135_spill] sm:$0xff] %v6142_v59  ;;  %2370 = vmatmul.f32.gmra.mxu3 %v5736_v37 }
 0x1d7   : > { %v1220_v10 = vpop.f32.mrf.mxu0  ;;  %v1538_v4 = vpop.f32.mrf.mxu2 }
 0x1d8   : > { %v1368_v52 = vadd.f32 %v1367_v35, %v1220_v10  ;;  %v1903_v15 = vpop.f32.mrf.mxu1 }
 0x1d9   : > { %v1737_v33 = vpop.f32.mrf.mxu3 }
 0x1da   : > { %v1539_v36 = vadd.f32 %v1538_v4, %v1368_v52  ;;  %1823 = vmatmul.f32.gmra.mxu0 %v5736_v37  ;;  %1966 = vmatmul.f32.gmra.mxu1 %v5755_v46 }
 0x1dc   : > { %v6148_v40 = vadd.f32 %v1737_v33, %v1539_v36  ;;  %2175 = vmatmul.f32.gmra.mxu2 %v5794_v1 }
 0x1de   : > { %7675 = vst [vmem:[#allocation136_spill] sm:$0xff] %v6148_v40  ;;  %2374 = vmatmul.f32.gmra.mxu3 %v5755_v46 }
 0x1df   : > { %v1764_v17 = vpop.f32.mrf.mxu0  ;;  %v2048_v28 = vpop.f32.mrf.mxu2 }
 0x1e0   : > { %v1765_v53 = vadd.f32 %v1764_v17, %v5805_v23  ;;  %v1907_v4 = vpop.f32.mrf.mxu1 }
 0x1e1   : > { %v2311_v51 = vpop.f32.mrf.mxu3 }
 0x1e2   : > { %v1904_v35 = vadd.f32 %v1903_v15, %v1765_v53  ;;  %1827 = vmatmul.f32.gmra.mxu0 %v5755_v46  ;;  %v6155_v10 = vadd.f32 %v2311_v51, %v2048_v28  ;;  %1970 = vmatmul.f32.gmra.mxu1 %v5776_v13 }
 0x1e4   : > { %7676 = vst [vmem:[#allocation137_spill] sm:$0xff] %v6155_v10  ;;  %2183 = vmatmul.f32.gmra.mxu2 %v5815_v32  ;;  %v3082_v36 = vmul.f32 3.0, %v1904_v35  ;;  %v3264_v28 = vrot.slane %v1904_v35, 2 }
 0x1e6   : > { %2378 = vmatmul.f32.gmra.mxu3 %v5776_v13  ;;  %v3143_v10 = vrot.slane %v3082_v36, 1 }
 0x1e7   : > { %v1768_v1 = vpop.f32.mrf.mxu0  ;;  %v2056_v52 = vpop.f32.mrf.mxu2 }
 0x1e8   : > { %v1769_v33 = vadd.f32 %v1768_v1, %v5830_v9  ;;  %v1911_v51 = vpop.f32.mrf.mxu1 }
 0x1e9   : > { %v2315_v23 = vpop.f32.mrf.mxu3 }
 0x1ea   : > { %v1908_v17 = vadd.f32 %v1907_v4, %v1769_v33  ;;  %1831 = vmatmul.f32.gmra.mxu0 %v5776_v13  ;;  %v6162_v15 = vadd.f32 %v2315_v23, %v2056_v52  ;;  %1974 = vmatmul.f32.gmra.mxu1 %v5799_v30 }
 0x1ec   : > { %7677 = vst [vmem:[#allocation138_spill] sm:$0xff] %v6162_v15  ;;  %v3083_v53 = vmul.f32 3.0, %v1908_v17  ;;  %v3265_v32 = vrot.slane %v1908_v17, 2  ;;  %2191 = vmatmul.f32.gmra.mxu2 %v5838_v8 }
 0x1ee   : > { %v3144_v46 = vrot.slane %v3083_v53, 1  ;;  %v3266_v9 = vsel %vm3263_vm3, %v3264_v28, %v3265_v32  ;;  %2382 = vmatmul.f32.gmra.mxu3 %v5799_v30 }
 0x1ef   : > { %v1772_v1 = vpop.f32.mrf.mxu0  ;;  %v2064_v4 = vpop.f32.mrf.mxu2 }
 0x1f0   : > { %v3145_v33 = vsel %vm3142_vm4, %v3143_v10, %v3144_v46  ;;  %v1773_v52 = vadd.f32 %v1772_v1, %v5855_v58  ;;  %v1915_v40 = vpop.f32.mrf.mxu1 }
 0x1f1   : > { %v3213_v23 = vadd.f32 %v3145_v33, %v1904_v35  ;;  %v2319_v15 = vpop.f32.mrf.mxu3 }
 0x1f2   : > { %v1912_v13 = vadd.f32 %v1911_v51, %v1773_v52  ;;  %1835 = vmatmul.f32.gmra.mxu0 %v5799_v30  ;;  %v6171_v8 = vadd.f32 %v2319_v15, %v2064_v4  ;;  %1978 = vmatmul.f32.gmra.mxu1 %v5820_v6  ;;  %v7699_v30 = vld [vmem:[#allocation122_spill] sm:$0xff] }
 0x1f3   : > { %v3334_v36 = vadd.f32 %v3266_v9, %v3213_v23 }
 0x1f4   : > { %7678 = vst [vmem:[#allocation139_spill] sm:$0xff] %v6171_v8  ;;  %v3084_v53 = vmul.f32 3.0, %v1912_v13  ;;  %v3267_v28 = vrot.slane %v1912_v13, 2  ;;  %2199 = vmatmul.f32.gmra.mxu2 %v5863_v14 }
 0x1f6   : > { %v3146_v37 = vrot.slane %v3084_v53, 1  ;;  %v3268_v10 = vsel %vm3263_vm3, %v3265_v32, %v3267_v28  ;;  %2386 = vmatmul.f32.gmra.mxu3 %v5820_v6 }
 0x1f7   : > { %v1776_v58 = vpop.f32.mrf.mxu0  ;;  %v2072_v1 = vpop.f32.mrf.mxu2 }
 0x1f8   : > { %v3147_v35 = vsel %vm3142_vm4, %v3144_v46, %v3146_v37  ;;  %v1777_v51 = vadd.f32 %v1776_v58, %v5880_v48  ;;  %v1919_v32 = vpop.f32.mrf.mxu1  ;;  %v7680_v37 = vld [vmem:[#allocation101_spill] sm:$0xff] }
 0x1f9   : > { %v3214_v15 = vadd.f32 %v3147_v35, %v1908_v17  ;;  %v2323_v9 = vpop.f32.mrf.mxu3 }
 0x1fa   : > { %v1916_v4 = vadd.f32 %v1915_v40, %v1777_v51  ;;  %1839 = vmatmul.f32.gmra.mxu0 %v5820_v6  ;;  %v6180_v13 = vadd.f32 %v2323_v9, %v2072_v1  ;;  %1982 = vmatmul.f32.gmra.mxu1 %v5843_v2  ;;  %v7688_v6 = vld [vmem:[#allocation99_spill] sm:$0xff] }
 0x1fb   : > { %v3335_v14 = vadd.f32 %v3268_v10, %v3214_v15  ;;  %v7683_v15 = vld [vmem:[#allocation96_spill] sm:$0xff] }
 0x1fc   : > { %7679 = vst [vmem:[#allocation140_spill] sm:$0xff] %v6180_v13  ;;  %2207 = vmatmul.f32.gmra.mxu2 %v5884_v61  ;;  %v3085_v17 = vmul.f32 3.0, %v1916_v4  ;;  %v3269_v53 = vrot.slane %v1916_v4, 2  ;;  %v7682_v61 = vld [vmem:[#allocation102_spill] sm:$0xff] }
 0x1fe   : > { %2390 = vmatmul.f32.gmra.mxu3 %v5843_v2  ;;  %v3148_v1 = vrot.slane %v3085_v17, 1 }
 0x1ff   : > { %v1780_v33 = vpop.f32.mrf.mxu0  ;;  %v2080_v52 = vpop.f32.mrf.mxu2 }
 0x200   : > { %v1781_v46 = vadd.f32 %v1780_v33, %v7680_v37  ;;  %v1923_v58 = vpop.f32.mrf.mxu1  ;;  %v7685_v37 = vld [vmem:[#allocation106_spill] sm:$0xff] }
 0x201   : > { %v2327_v48 = vpop.f32.mrf.mxu3 }
 0x202   : > { %v1920_v23 = vadd.f32 %v1919_v32, %v1781_v46  ;;  %1843 = vmatmul.f32.gmra.mxu0 %v5843_v2  ;;  %v6187_v40 = vadd.f32 %v2327_v48, %v2080_v52  ;;  %1986 = vmatmul.f32.gmra.mxu1 %v7683_v15  ;;  %v7687_v2 = vld [vmem:[#allocation107_spill] sm:$0xff] }
 0x204   : > { %7681 = vst [vmem:[#allocation101_spill] sm:$0xff] %v6187_v40  ;;  %v3086_v28 = vmul.f32 3.0, %v1920_v23  ;;  %v3270_v10 = vrot.slane %v1920_v23, 2  ;;  %2215 = vmatmul.f32.gmra.mxu2 %v7682_v61 }
 0x206   : > { %v3149_v35 = vrot.slane %v3086_v28, 1  ;;  %v3271_v51 = vsel %vm3263_vm3, %v3269_v53, %v3270_v10  ;;  %2394 = vmatmul.f32.gmra.mxu3 %v7683_v15 }
 0x207   : > { %v1784_v9 = vpop.f32.mrf.mxu0  ;;  %v2088_v33 = vpop.f32.mrf.mxu2 }
 0x208   : > { %v6193_v32 = vsel %vm3142_vm4, %v3148_v1, %v3149_v35  ;;  %v1785_v52 = vadd.f32 %v1784_v9, %v7685_v37  ;;  %v1927_v13 = vpop.f32.mrf.mxu1 }
 0x209   : > { %7684 = vst [vmem:[#allocation102_spill] sm:$0xff] %v6193_v32  ;;  %v3215_v46 = vadd.f32 %v6193_v32, %v1916_v4  ;;  %v2331_v48 = vpop.f32.mrf.mxu3  ;;  %v7705_v32 = vld [vmem:[#allocation127_spill] sm:$0xff] }
 0x20a   : > { %v1924_v61 = vadd.f32 %v1923_v58, %v1785_v52  ;;  %1847 = vmatmul.f32.gmra.mxu0 %v7683_v15  ;;  %v6199_v17 = vadd.f32 %v2331_v48, %v2088_v33  ;;  %1990 = vmatmul.f32.gmra.mxu1 %v7688_v6 }
 0x20b   : > { %v6201_v53 = vadd.f32 %v3271_v51, %v3215_v46  ;;  %v7690_v51 = vld [vmem:[#allocation111_spill] sm:$0xff] }
 0x20c   : > { %7686 = vst [vmem:[#allocation106_spill] sm:$0xff] %v6199_v17  ;;  %v3087_v28 = vmul.f32 3.0, %v1924_v61  ;;  %v3272_v40 = vrot.slane %v1924_v61, 2  ;;  %2223 = vmatmul.f32.gmra.mxu2 %v7687_v2  ;;  %v7694_v17 = vld [vmem:[#allocation116_spill] sm:$0xff] }
 0x20d   : > { %v3354_v1 = vmul.f32 3.0, %v6201_v53 }
 0x20e   : > { %v3151_v9 = vrot.slane %v3087_v28, 1  ;;  %v3273_v37 = vsel %vm3263_vm3, %v3270_v10, %v3272_v40  ;;  %2398 = vmatmul.f32.gmra.mxu3 %v7688_v6 }
 0x20f   : > { %v3370_v4 = vadd.f32 %v3354_v1, %v3334_v36  ;;  %v1788_v58 = vpop.f32.mrf.mxu0  ;;  %v2096_v52 = vpop.f32.mrf.mxu2  ;;  %v7692_v36 = vld [vmem:[#allocation112_spill] sm:$0xff] }
 0x210   : > { %v6208_v33 = vsel %vm3142_vm4, %v3149_v35, %v3151_v9  ;;  %v1789_v46 = vadd.f32 %v1788_v58, %v7690_v51  ;;  %v1931_v35 = vpop.f32.mrf.mxu1  ;;  %v7693_v1 = vld [vmem:[#allocation104_spill] sm:$0xff] }
 0x211   : > { %7689 = vst [vmem:[#allocation107_spill] sm:$0xff] %v6208_v33  ;;  %v3216_v2 = vadd.f32 %v6208_v33, %v1920_v23  ;;  %v2335_v48 = vpop.f32.mrf.mxu3 }
 0x212   : > { %v1928_v61 = vadd.f32 %v1927_v13, %v1789_v46  ;;  %1851 = vmatmul.f32.gmra.mxu0 %v7688_v6  ;;  %v6214_v28 = vadd.f32 %v2335_v48, %v2096_v52  ;;  %1994 = vmatmul.f32.gmra.mxu1 %v7693_v1 }
 0x213   : > { %v6216_v40 = vadd.f32 %v3273_v37, %v3216_v2 }
 0x214   : > { %7691 = vst [vmem:[#allocation111_spill] sm:$0xff] %v6214_v28  ;;  %2231 = vmatmul.f32.gmra.mxu2 %v7692_v36  ;;  %v3088_v46 = vmul.f32 3.0, %v1928_v61  ;;  %v3274_v2 = vrot.slane %v1928_v61, 2  ;;  %v7696_v28 = vld [vmem:[#allocation117_spill] sm:$0xff] }
 0x215   : > { %v3355_v10 = vmul.f32 3.0, %v6216_v40 }
 0x216   : > { %2402 = vmatmul.f32.gmra.mxu3 %v7693_v1 }
 0x217   : > { %v3371_v9 = vadd.f32 %v3355_v10, %v3335_v14  ;;  %v1792_v58 = vpop.f32.mrf.mxu0  ;;  %v2104_v51 = vpop.f32.mrf.mxu2  ;;  %v3153_v14 = vrot.slane %v3088_v46, 1 }
 0x218   : > { %v1793_v23 = vadd.f32 %v1792_v58, %v7694_v17  ;;  %v1935_v6 = vpop.f32.mrf.mxu1  ;;  %v7697_v17 = vld [vmem:[#allocation109_spill] sm:$0xff] }
 0x219   : > { %v2339_v13 = vpop.f32.mrf.mxu3 }
 0x21a   : > { %v1932_v52 = vadd.f32 %v1931_v35, %v1793_v23  ;;  %1855 = vmatmul.f32.gmra.mxu0 %v7693_v1  ;;  %v6224_v37 = vadd.f32 %v2339_v13, %v2104_v51  ;;  %v7698_v23 = vld [vmem:[#allocation121_spill] sm:$0xff]  ;;  %1998 = vmatmul.f32.gmra.mxu1 %v7697_v17 }
 0x21c   : > { %7695 = vst [vmem:[#allocation112_spill] sm:$0xff] %v6224_v37  ;;  %v3089_v48 = vmul.f32 3.0, %v1932_v52  ;;  %v3275_v36 = vrot.slane %v1932_v52, 2  ;;  %2239 = vmatmul.f32.gmra.mxu2 %v7696_v28 }
 0x21e   : > { %v3154_v10 = vrot.slane %v3089_v48, 1  ;;  %v3276_v15 = vsel %vm3263_vm3, %v3274_v2, %v3275_v36  ;;  %2406 = vmatmul.f32.gmra.mxu3 %v7697_v17 }
 0x21f   : > { %v1796_v58 = vpop.f32.mrf.mxu0  ;;  %v2112_v8 = vpop.f32.mrf.mxu2 }
 0x220   : > { %v6230_v35 = vsel %vm3142_vm4, %v3153_v14, %v3154_v10  ;;  %v1797_v51 = vadd.f32 %v1796_v58, %v7698_v23  ;;  %v1939_v23 = vpop.f32.mrf.mxu1 }
 0x221   : > { %v3217_v13 = vadd.f32 %v6230_v35, %v1928_v61  ;;  %v2343_v37 = vpop.f32.mrf.mxu3 }
 0x222   : > { %v1936_v28 = vadd.f32 %v1935_v6, %v1797_v51  ;;  %1859 = vmatmul.f32.gmra.mxu0 %v7697_v17  ;;  %v6236_v46 = vadd.f32 %v2343_v37, %v2112_v8  ;;  %v7701_v6 = vld [vmem:[#allocation114_spill] sm:$0xff] }
 0x223   : > { %v6238_v2 = vadd.f32 %v3276_v15, %v3217_v13  ;;  %v7703_v13 = vld [vmem:[#allocation126_spill] sm:$0xff]  ;;  %2002 = vmatmul.f32.gmra.mxu1 %v7701_v6 }
 0x224   : > { %v3090_v48 = vmul.f32 3.0, %v1936_v28  ;;  %v3277_v1 = vrot.slane %v1936_v28, 2  ;;  %2247 = vmatmul.f32.gmra.mxu2 %v7699_v30 }
 0x225   : > { %v3356_v14 = vmul.f32 3.0, %v6238_v2  ;;  %v6243_v58 = vadd.f32 %v3370_v4, %v6238_v2 }
 0x226   : > { %v3156_v59 = vrot.slane %v3090_v48, 1  ;;  %v3278_v61 = vsel %vm3263_vm3, %v3275_v36, %v3277_v1  ;;  %2410 = vmatmul.f32.gmra.mxu3 %v7701_v6 }
 0x227   : > { %7700 = vst [vmem:[#allocation116_spill] sm:$0xff] %v6243_v58  ;;  %v1800_v15 = vpop.f32.mrf.mxu0  ;;  %v2120_v37 = vpop.f32.mrf.mxu2  ;;  %v3372_v51 = vadd.f32 %v3356_v14, %v6201_v53  ;;  %v7707_v14 = vld [vmem:[#allocation119_spill] sm:$0xff] }
 0x228   : > { %v6251_v30 = vsel %vm3142_vm4, %v3154_v10, %v3156_v59  ;;  %v1801_v28 = vadd.f32 %v1800_v15, %v7703_v13  ;;  %v1943_v10 = vpop.f32.mrf.mxu1 }
 0x229   : > { %7702 = vst [vmem:[#allocation117_spill] sm:$0xff] %v6251_v30  ;;  %v3218_v4 = vadd.f32 %v6251_v30, %v1932_v52  ;;  %v2347_v48 = vpop.f32.mrf.mxu3 }
 0x22a   : > { %v1940_v1 = vadd.f32 %v1939_v23, %v1801_v28  ;;  %1863 = vmatmul.f32.gmra.mxu0 %v7701_v6  ;;  %v6257_v36 = vadd.f32 %v2347_v48, %v2120_v37 }
 0x22b   : > { %v6259_v8 = vadd.f32 %v3278_v61, %v3218_v4  ;;  %2006 = vmatmul.f32.gmra.mxu1 %v7707_v14 }
 0x22c   : > { %7704 = vst [vmem:[#allocation109_spill] sm:$0xff] %v6257_v36  ;;  %2255 = vmatmul.f32.gmra.mxu2 %v7705_v32  ;;  %v3091_v13 = vmul.f32 3.0, %v1940_v1  ;;  %v3279_v4 = vrot.slane %v1940_v1, 2  ;;  %v7709_v36 = vld [vmem:[#allocation131_spill] sm:$0xff] }
 0x22d   : > { %v3357_v53 = vmul.f32 3.0, %v6259_v8  ;;  %v6264_v59 = vadd.f32 %v3371_v9, %v6259_v8 }
 0x22e   : > { %2414 = vmatmul.f32.gmra.mxu3 %v7707_v14  ;;  %v3158_v33 = vrot.slane %v3091_v13, 1 }
 0x22f   : > { %7706 = vst [vmem:[#allocation121_spill] sm:$0xff] %v6264_v59  ;;  %v1804_v23 = vpop.f32.mrf.mxu0  ;;  %v2128_v15 = vpop.f32.mrf.mxu2  ;;  %v3373_v37 = vadd.f32 %v3357_v53, %v6216_v40 }
 0x230   : > { %v1805_v61 = vadd.f32 %v1804_v23, %v6013_v42  ;;  %v1947_v52 = vpop.f32.mrf.mxu1  ;;  %v7710_v42 = vld [vmem:[#allocation124_spill] sm:$0xff] }
 0x231   : > { %v2351_v32 = vpop.f32.mrf.mxu3 }
 0x232   : > { %v1944_v28 = vadd.f32 %v1943_v10, %v1805_v61  ;;  %1867 = vmatmul.f32.gmra.mxu0 %v7707_v14  ;;  %v6273_v9 = vadd.f32 %v2351_v32, %v2128_v15 }
 0x233   : > { %2010 = vmatmul.f32.gmra.mxu1 %v7710_v42 }
 0x234   : > { %7708 = vst [vmem:[#allocation122_spill] sm:$0xff] %v6273_v9  ;;  %v3092_v48 = vmul.f32 3.0, %v1944_v28  ;;  %v3280_v58 = vrot.slane %v1944_v28, 2  ;;  %2263 = vmatmul.f32.gmra.mxu2 %v7709_v36 }
 0x236   : > { %v3159_v59 = vrot.slane %v3092_v48, 1  ;;  %v3281_v40 = vsel %vm3263_vm3, %v3279_v4, %v3280_v58  ;;  %2418 = vmatmul.f32.gmra.mxu3 %v7710_v42 }
 0x237   : > { %v1808_v53 = vpop.f32.mrf.mxu0  ;;  %v2136_v23 = vpop.f32.mrf.mxu2 }
 0x238   : > { %v6279_v10 = vsel %vm3142_vm4, %v3158_v33, %v3159_v59  ;;  %v1809_v15 = vadd.f32 %v1808_v53, %v6031_v47  ;;  %v1951_v53 = vpop.f32.mrf.mxu1 }
 0x239   : > { %v3219_v61 = vadd.f32 %v6279_v10, %v1940_v1  ;;  %v2355_v32 = vpop.f32.mrf.mxu3 }
 0x23a   : > { %v1948_v36 = vadd.f32 %v1947_v52, %v1809_v15  ;;  %1871 = vmatmul.f32.gmra.mxu0 %v7710_v42  ;;  %v6285_v13 = vadd.f32 %v2355_v32, %v2136_v23  ;;  %v7711_v52 = vld [vmem:[#allocation129_spill] sm:$0xff] }
 0x23b   : > { %v6287_v4 = vadd.f32 %v3281_v40, %v3219_v61  ;;  %2014 = vmatmul.f32.gmra.mxu1 %v7711_v52 }
 0x23c   : > { %v3093_v48 = vmul.f32 3.0, %v1948_v36  ;;  %v3282_v9 = vrot.slane %v1948_v36, 2  ;;  %2271 = vmatmul.f32.gmra.mxu2 %v6035_v45 }
 0x23d   : > { %v3358_v33 = vmul.f32 3.0, %v6287_v4  ;;  %v6292_v47 = vadd.f32 %v3372_v51, %v6287_v4 }
 0x23e   : > { %v3161_v14 = vrot.slane %v3093_v48, 1  ;;  %v3283_v1 = vsel %vm3263_vm3, %v3280_v58, %v3282_v9  ;;  %2422 = vmatmul.f32.gmra.mxu3 %v7711_v52 }
 0x23f   : > { %v1812_v40 = vpop.f32.mrf.mxu0  ;;  %v2144_v15 = vpop.f32.mrf.mxu2  ;;  %v3374_v61 = vadd.f32 %v3358_v33, %v6238_v2 }
 0x240   : > { %v6300_v45 = vsel %vm3142_vm4, %v3159_v59, %v3161_v14  ;;  %v1813_v32 = vadd.f32 %v1812_v40, %v6044_v20  ;;  %v1955_v20 = vpop.f32.mrf.mxu1 }
 0x241   : > { %7712 = vst [vmem:[#allocation114_spill] sm:$0xff] %v6300_v45  ;;  %v3220_v51 = vadd.f32 %v6300_v45, %v1944_v28  ;;  %v2359_v36 = vpop.f32.mrf.mxu3 }
 0x242   : > { %v1952_v58 = vadd.f32 %v1951_v53, %v1813_v32  ;;  %1875 = vmatmul.f32.gmra.mxu0 %v7711_v52  ;;  %v6306_v9 = vadd.f32 %v2359_v36, %v2144_v15 }
 0x243   : > { %v6308_v48 = vadd.f32 %v3283_v1, %v3220_v51  ;;  %2018 = vmatmul.f32.gmra.mxu1 %v6022_v60 }
 0x244   : > { %2279 = vmatmul.f32.gmra.mxu2 %v6048_v31  ;;  %v3094_v40 = vmul.f32 3.0, %v1952_v58  ;;  %v3284_v32 = vrot.slane %v1952_v58, 2 }
 0x245   : > { %v3359_v2 = vmul.f32 3.0, %v6308_v48  ;;  %v6313_v59 = vadd.f32 %v3373_v37, %v6308_v48 }
 0x246   : > { %2426 = vmatmul.f32.gmra.mxu3 %v6022_v60  ;;  %v3163_v23 = vrot.slane %v3094_v40, 1 }
 0x247   : > { %7713 = vst [vmem:[#allocation126_spill] sm:$0xff] %v6313_v59  ;;  %v1816_v28 = vpop.f32.mrf.mxu0  ;;  %v2152_v33 = vpop.f32.mrf.mxu2  ;;  %v3375_v53 = vadd.f32 %v3359_v2, %v6259_v8 }
 0x248   : > { %v1817_v1 = vadd.f32 %v1816_v28, %v6052_v38  ;;  %v1959_v14 = vpop.f32.mrf.mxu1 }
 0x249   : > { %v2363_v31 = vpop.f32.mrf.mxu3 }
 0x24a   : > { %v1956_v15 = vadd.f32 %v1955_v20, %v1817_v1  ;;  %1879 = vmatmul.f32.gmra.mxu0 %v6022_v60  ;;  %v6322_v37 = vadd.f32 %v2363_v31, %v2152_v33  ;;  %v7715_v33 = vld [vmem:[#allocation33_spill] sm:$0xff] }
 0x24b   : > { %2622 = vmatmul.f32.vlgmr.msra.gmra.mxu1 %v7715_v33 }
 0x24c   : > { %7714 = vst [vmem:[#allocation127_spill] sm:$0xff] %v6322_v37  ;;  %v3095_v51 = vmul.f32 3.0, %v1956_v15  ;;  %v3285_v36 = vrot.slane %v1956_v15, 2  ;;  %2823 = vmatmul.f32.vlgmr.msra.gmra.mxu2 %v5376_v11  ;;  %v7716_v37 = vld [vmem:[#allocation32_spill] sm:$0xff] }
 0x24e   : > { %v3164_v30 = vrot.slane %v3095_v51, 1  ;;  %v3286_v8 = vsel %vm3263_vm3, %v3284_v32, %v3285_v36  ;;  %2962 = vmatmul.f32.vlgmr.msra.gmra.mxu3 %v5376_v11 }
 0x24f   : > { %v1820_v38 = vpop.f32.mrf.mxu0  ;;  %v2160_v2 = vpop.f32.mrf.mxu2 }
 0x250   : > { %v6328_v20 = vsel %vm3142_vm4, %v3163_v23, %v3164_v30  ;;  %v1821_v28 = vadd.f32 %v1820_v38, %v6058_v24  ;;  %v1963_v38 = vpop.f32.mrf.mxu1 }
 0x251   : > { %v3221_v1 = vadd.f32 %v6328_v20, %v1952_v58  ;;  %v2367_v31 = vpop.f32.mrf.mxu3 }
 0x252   : > { %v1960_v59 = vadd.f32 %v1959_v14, %v1821_v28  ;;  %2452 = vmatmul.f32.vlgmr.msra.gmra.mxu0 %v7716_v37  ;;  %v6334_v40 = vadd.f32 %v2367_v31, %v2160_v2 }
 0x253   : > { %v6336_v32 = vadd.f32 %v3286_v8, %v3221_v1 }
 0x254   : > { %v3096_v11 = vmul.f32 3.0, %v1960_v59  ;;  %v3287_v51 = vrot.slane %v1960_v59, 2  ;;  %2827 = vmatmul.f32.gmra.mxu2 %v5429_v34 }
 0x255   : > { %v3360_v23 = vmul.f32 3.0, %v6336_v32  ;;  %v6341_v24 = vadd.f32 %v3374_v61, %v6336_v32  ;;  %v7718_v61 = vld [vmem:[#allocation38_spill] sm:$0xff] }
 0x256   : > { %v3166_v33 = vrot.slane %v3096_v11, 1  ;;  %v3288_v58 = vsel %vm3263_vm3, %v3285_v36, %v3287_v51  ;;  %2966 = vmatmul.f32.gmra.mxu3 %v5429_v34  ;;  %2628 = vmatmul.f32.gmra.mxu1 %v7718_v61  ;;  %v7719_v11 = vld [vmem:[#allocation36_spill] sm:$0xff] }
 0x257   : > { %v1824_v37 = vpop.f32.mrf.mxu0  ;;  %v2168_v8 = vpop.f32.mrf.mxu2  ;;  %v3376_v59 = vadd.f32 %v3360_v23, %v6287_v4 }
 0x258   : > { %v6349_v2 = vsel %vm3142_vm4, %v3164_v30, %v3166_v33  ;;  %v1825_v28 = vadd.f32 %v1824_v37, %v6064_v19  ;;  %v1967_v19 = vpop.f32.mrf.mxu1  ;;  %v7720_v37 = vld [vmem:[#allocation41_spill] sm:$0xff] }
 0x259   : > { %7717 = vst [vmem:[#allocation131_spill] sm:$0xff] %v6349_v2  ;;  %v3222_v1 = vadd.f32 %v6349_v2, %v1956_v15  ;;  %v2371_v31 = vpop.f32.mrf.mxu3 }
 0x25a   : > { %v1964_v36 = vadd.f32 %v1963_v38, %v1825_v28  ;;  %2457 = vmatmul.f32.gmra.mxu0 %v7719_v11  ;;  %v6355_v34 = vadd.f32 %v2371_v31, %v2168_v8 }
 0x25b   : > { %v6357_v51 = vadd.f32 %v3288_v58, %v3222_v1  ;;  %v7721_v1 = vld [vmem:[#allocation39_spill] sm:$0xff] }
 0x25c   : > { %2831 = vmatmul.f32.gmra.mxu2 %v5449_v41  ;;  %v3097_v28 = vmul.f32 3.0, %v1964_v36  ;;  %v3289_v31 = vrot.slane %v1964_v36, 2 }
 0x25d   : > { %v3361_v4 = vmul.f32 3.0, %v6357_v51  ;;  %v6362_v30 = vadd.f32 %v3375_v53, %v6357_v51 }
 0x25e   : > { %2970 = vmatmul.f32.gmra.mxu3 %v5449_v41  ;;  %2634 = vmatmul.f32.gmra.mxu1 %v7720_v37  ;;  %v3168_v14 = vrot.slane %v3097_v28, 1 }
 0x25f   : > { %v1828_v23 = vpop.f32.mrf.mxu0  ;;  %v2176_v38 = vpop.f32.mrf.mxu2  ;;  %v3377_v33 = vadd.f32 %v3361_v4, %v6308_v48 }
 0x260   : > { %v1829_v58 = vadd.f32 %v1828_v23, %v6070_v27  ;;  %v1971_v15 = vpop.f32.mrf.mxu1 }
 0x261   : > { %v2375_v8 = vpop.f32.mrf.mxu3 }
 0x262   : > { %v1968_v61 = vadd.f32 %v1967_v19, %v1829_v58  ;;  %2462 = vmatmul.f32.gmra.mxu0 %v7721_v1  ;;  %v6371_v53 = vadd.f32 %v2375_v8, %v2176_v38  ;;  %v7723_v38 = vld [vmem:[#allocation43_spill] sm:$0xff]  ;;  %v7724_v1 = vld [vmem:[#allocation42_spill] sm:$0xff] }
 0x264   : > { %v3098_v41 = vmul.f32 3.0, %v1968_v61  ;;  %v3290_v11 = vrot.slane %v1968_v61, 2  ;;  %2835 = vmatmul.f32.gmra.mxu2 %v5488_v54 }
 0x266   : > { %v3169_v45 = vrot.slane %v3098_v41, 1  ;;  %v3291_v48 = vsel %vm3263_vm3, %v3289_v31, %v3290_v11  ;;  %2974 = vmatmul.f32.gmra.mxu3 %v5488_v54  ;;  %2640 = vmatmul.f32.gmra.mxu1 %v7723_v38 }
 0x267   : > { %v1832_v27 = vpop.f32.mrf.mxu0  ;;  %v2184_v4 = vpop.f32.mrf.mxu2 }
 0x268   : > { %v6377_v19 = vsel %vm3142_vm4, %v3168_v14, %v3169_v45  ;;  %v1833_v23 = vadd.f32 %v1832_v27, %v6076_v49  ;;  %v1975_v27 = vpop.f32.mrf.mxu1 }
 0x269   : > { %7722 = vst [vmem:[#allocation124_spill] sm:$0xff] %v6377_v19  ;;  %v3223_v58 = vadd.f32 %v6377_v19, %v1964_v36  ;;  %v2379_v37 = vpop.f32.mrf.mxu3 }
 0x26a   : > { %v1972_v8 = vadd.f32 %v1971_v15, %v1833_v23  ;;  %2467 = vmatmul.f32.gmra.mxu0 %v7724_v1  ;;  %v6383_v28 = vadd.f32 %v2379_v37, %v2184_v4 }
 0x26b   : > { %v6385_v31 = vadd.f32 %v3291_v48, %v3223_v58 }
 0x26c   : > { %v3099_v54 = vmul.f32 3.0, %v1972_v8  ;;  %v3292_v41 = vrot.slane %v1972_v8, 2  ;;  %2839 = vmatmul.f32.gmra.mxu2 %v5494_v57 }
 0x26d   : > { %v3362_v14 = vmul.f32 3.0, %v6385_v31  ;;  %v6390_v49 = vadd.f32 %v3376_v59, %v6385_v31  ;;  %v7726_v59 = vld [vmem:[#allocation46_spill] sm:$0xff] }
 0x26e   : > { %v3171_v38 = vrot.slane %v3099_v54, 1  ;;  %v3293_v36 = vsel %vm3263_vm3, %v3290_v11, %v3292_v41  ;;  %2978 = vmatmul.f32.gmra.mxu3 %v5494_v57  ;;  %2646 = vmatmul.f32.gmra.mxu1 %v7726_v59  ;;  %v7727_v54 = vld [vmem:[#allocation44_spill] sm:$0xff] }
 0x26f   : > { %v1836_v48 = vpop.f32.mrf.mxu0  ;;  %v2192_v4 = vpop.f32.mrf.mxu2  ;;  %v3378_v23 = vadd.f32 %v3362_v14, %v6336_v32 }
 0x270   : > { %v6398_v58 = vsel %vm3142_vm4, %v3169_v45, %v3171_v38  ;;  %v1837_v37 = vadd.f32 %v1836_v48, %v6082_v56  ;;  %v1979_v56 = vpop.f32.mrf.mxu1  ;;  %v7728_v48 = vld [vmem:[#allocation49_spill] sm:$0xff] }
 0x271   : > { %7725 = vst [vmem:[#allocation129_spill] sm:$0xff] %v6398_v58  ;;  %v3224_v8 = vadd.f32 %v6398_v58, %v1968_v61  ;;  %v2383_v1 = vpop.f32.mrf.mxu3  ;;  %v7812_v58 = vld [vmem:[#allocation109_spill] sm:$0xff] }
 0x272   : > { %v1976_v11 = vadd.f32 %v1975_v27, %v1837_v37  ;;  %2472 = vmatmul.f32.gmra.mxu0 %v7727_v54  ;;  %v6404_v57 = vadd.f32 %v2383_v1, %v2192_v4 }
 0x273   : > { %v6406_v41 = vadd.f32 %v3293_v36, %v3224_v8  ;;  %v7729_v8 = vld [vmem:[#allocation47_spill] sm:$0xff] }
 0x274   : > { %2843 = vmatmul.f32.gmra.mxu2 %v5521_v5  ;;  %v3100_v37 = vmul.f32 3.0, %v1976_v11  ;;  %v3294_v1 = vrot.slane %v1976_v11, 2 }
 0x275   : > { %v3363_v32 = vmul.f32 3.0, %v6406_v41  ;;  %v6411_v45 = vadd.f32 %v3377_v33, %v6406_v41 }
 0x276   : > { %2982 = vmatmul.f32.gmra.mxu3 %v5521_v5  ;;  %2652 = vmatmul.f32.gmra.mxu1 %v7728_v48  ;;  %v3173_v15 = vrot.slane %v3100_v37, 1 }
 0x277   : > { %v1840_v14 = vpop.f32.mrf.mxu0  ;;  %v2200_v27 = vpop.f32.mrf.mxu2  ;;  %v3379_v38 = vadd.f32 %v3363_v32, %v6357_v51 }
 0x278   : > { %v1841_v36 = vadd.f32 %v1840_v14, %v6088_v3  ;;  %v1983_v61 = vpop.f32.mrf.mxu1 }
 0x279   : > { %v2387_v4 = vpop.f32.mrf.mxu3 }
 0x27a   : > { %v1980_v59 = vadd.f32 %v1979_v56, %v1841_v36  ;;  %2477 = vmatmul.f32.gmra.mxu0 %v7729_v8  ;;  %v6420_v33 = vadd.f32 %v2387_v4, %v2200_v27  ;;  %v7731_v27 = vld [vmem:[#allocation51_spill] sm:$0xff]  ;;  %v7732_v8 = vld [vmem:[#allocation50_spill] sm:$0xff] }
 0x27c   : > { %v3101_v5 = vmul.f32 3.0, %v1980_v59  ;;  %v3295_v54 = vrot.slane %v1980_v59, 2  ;;  %2847 = vmatmul.f32.gmra.mxu2 %v5544_v21 }
 0x27e   : > { %v3174_v2 = vrot.slane %v3101_v5, 1  ;;  %v3296_v51 = vsel %vm3263_vm3, %v3294_v1, %v3295_v54  ;;  %2986 = vmatmul.f32.gmra.mxu3 %v5544_v21  ;;  %2658 = vmatmul.f32.gmra.mxu1 %v7731_v27 }
 0x27f   : > { %v1844_v3 = vpop.f32.mrf.mxu0  ;;  %v2208_v32 = vpop.f32.mrf.mxu2 }
 0x280   : > { %v6426_v56 = vsel %vm3142_vm4, %v3173_v15, %v3174_v2  ;;  %v1845_v14 = vadd.f32 %v1844_v3, %v6094_v18  ;;  %v1987_v3 = vpop.f32.mrf.mxu1 }
 0x281   : > { %7730 = vst [vmem:[#allocation33_spill] sm:$0xff] %v6426_v56  ;;  %v3225_v36 = vadd.f32 %v6426_v56, %v1976_v11  ;;  %v2391_v48 = vpop.f32.mrf.mxu3 }
 0x282   : > { %v1984_v4 = vadd.f32 %v1983_v61, %v1845_v14  ;;  %2482 = vmatmul.f32.gmra.mxu0 %v7732_v8  ;;  %v6432_v37 = vadd.f32 %v2391_v48, %v2208_v32 }
 0x283   : > { %v6434_v1 = vadd.f32 %v3296_v51, %v3225_v36 }
 0x284   : > { %v3102_v21 = vmul.f32 3.0, %v1984_v4  ;;  %v3297_v5 = vrot.slane %v1984_v4, 2  ;;  %2851 = vmatmul.f32.gmra.mxu2 %v5563_v29 }
 0x285   : > { %v3364_v15 = vmul.f32 3.0, %v6434_v1  ;;  %v6439_v18 = vadd.f32 %v3378_v23, %v6434_v1  ;;  %v7735_v23 = vld [vmem:[#allocation54_spill] sm:$0xff] }
 0x286   : > { %v3176_v27 = vrot.slane %v3102_v21, 1  ;;  %v3298_v11 = vsel %vm3263_vm3, %v3295_v54, %v3297_v5  ;;  %2990 = vmatmul.f32.gmra.mxu3 %v5563_v29  ;;  %2664 = vmatmul.f32.gmra.mxu1 %v7735_v23  ;;  %v7736_v21 = vld [vmem:[#allocation52_spill] sm:$0xff] }
 0x287   : > { %7733 = vst [vmem:[#allocation32_spill] sm:$0xff] %v6439_v18  ;;  %v1848_v51 = vpop.f32.mrf.mxu0  ;;  %v2216_v32 = vpop.f32.mrf.mxu2  ;;  %v3380_v14 = vadd.f32 %v3364_v15, %v6385_v31 }
 0x288   : > { %v6447_v36 = vsel %vm3142_vm4, %v3174_v2, %v3176_v27  ;;  %v1849_v48 = vadd.f32 %v1848_v51, %v6100_v26  ;;  %v1991_v26 = vpop.f32.mrf.mxu1  ;;  %v7739_v51 = vld [vmem:[#allocation57_spill] sm:$0xff] }
 0x289   : > { %7734 = vst [vmem:[#allocation38_spill] sm:$0xff] %v6447_v36  ;;  %v3226_v4 = vadd.f32 %v6447_v36, %v1980_v59  ;;  %v2395_v8 = vpop.f32.mrf.mxu3 }
 0x28a   : > { %v1988_v54 = vadd.f32 %v1987_v3, %v1849_v48  ;;  %2487 = vmatmul.f32.gmra.mxu0 %v7736_v21  ;;  %v6453_v29 = vadd.f32 %v2395_v8, %v2216_v32 }
 0x28b   : > { %v6455_v5 = vadd.f32 %v3298_v11, %v3226_v4  ;;  %v7740_v4 = vld [vmem:[#allocation55_spill] sm:$0xff] }
 0x28c   : > { %7737 = vst [vmem:[#allocation36_spill] sm:$0xff] %v6453_v29  ;;  %2855 = vmatmul.f32.gmra.mxu2 %v5584_v50  ;;  %v3103_v48 = vmul.f32 3.0, %v1988_v54  ;;  %v3299_v8 = vrot.slane %v1988_v54, 2 }
 0x28d   : > { %v3365_v31 = vmul.f32 3.0, %v6455_v5  ;;  %v6460_v2 = vadd.f32 %v3379_v38, %v6455_v5 }
 0x28e   : > { %2994 = vmatmul.f32.gmra.mxu3 %v5584_v50  ;;  %2670 = vmatmul.f32.gmra.mxu1 %v7739_v51  ;;  %v3178_v61 = vrot.slane %v3103_v48, 1 }
 0x28f   : > { %7738 = vst [vmem:[#allocation41_spill] sm:$0xff] %v6460_v2  ;;  %v1852_v15 = vpop.f32.mrf.mxu0  ;;  %v2224_v3 = vpop.f32.mrf.mxu2  ;;  %v3381_v27 = vadd.f32 %v3365_v31, %v6406_v41  ;;  %v3619_v2 = vld [vmem:[#allocation2 + $0x32] sm:$0xff] }
 0x290   : > { %v1853_v11 = vadd.f32 %v1852_v15, %v6106_v44  ;;  %v1995_v59 = vpop.f32.mrf.mxu1 }
 0x291   : > { %v2399_v32 = vpop.f32.mrf.mxu3 }
 0x292   : > { %v1992_v23 = vadd.f32 %v1991_v26, %v1853_v11  ;;  %2492 = vmatmul.f32.gmra.mxu0 %v7740_v4  ;;  %v6469_v38 = vadd.f32 %v2399_v32, %v2224_v3  ;;  %v7743_v3 = vld [vmem:[#allocation59_spill] sm:$0xff]  ;;  %v7744_v4 = vld [vmem:[#allocation58_spill] sm:$0xff] }
 0x294   : > { %7741 = vst [vmem:[#allocation39_spill] sm:$0xff] %v6469_v38  ;;  %v3104_v50 = vmul.f32 3.0, %v1992_v23  ;;  %v3300_v21 = vrot.slane %v1992_v23, 2  ;;  %2859 = vmatmul.f32.gmra.mxu2 %v5607_v7 }
 0x296   : > { %v3179_v29 = vrot.slane %v3104_v50, 1  ;;  %v3301_v41 = vsel %vm3263_vm3, %v3299_v8, %v3300_v21  ;;  %2998 = vmatmul.f32.gmra.mxu3 %v5607_v7  ;;  %2676 = vmatmul.f32.gmra.mxu1 %v7743_v3 }
 0x297   : > { %v1856_v44 = vpop.f32.mrf.mxu0  ;;  %v2232_v31 = vpop.f32.mrf.mxu2 }
 0x298   : > { %v6475_v26 = vsel %vm3142_vm4, %v3178_v61, %v3179_v29  ;;  %v1857_v15 = vadd.f32 %v1856_v44, %v6112_v0  ;;  %v1999_v44 = vpop.f32.mrf.mxu1 }
 0x299   : > { %7742 = vst [vmem:[#allocation43_spill] sm:$0xff] %v6475_v26  ;;  %v3227_v11 = vadd.f32 %v6475_v26, %v1988_v54  ;;  %v2403_v51 = vpop.f32.mrf.mxu3 }
 0x29a   : > { %v1996_v32 = vadd.f32 %v1995_v59, %v1857_v15  ;;  %2497 = vmatmul.f32.gmra.mxu0 %v7744_v4  ;;  %v6481_v48 = vadd.f32 %v2403_v51, %v2232_v31 }
 0x29b   : > { %v6483_v8 = vadd.f32 %v3301_v41, %v3227_v11 }
 0x29c   : > { %7745 = vst [vmem:[#allocation42_spill] sm:$0xff] %v6481_v48  ;;  %v3105_v7 = vmul.f32 3.0, %v1996_v32  ;;  %v3302_v50 = vrot.slane %v1996_v32, 2  ;;  %2863 = vmatmul.f32.gmra.mxu2 %v5626_v25 }
 0x29d   : > { %v3366_v61 = vmul.f32 3.0, %v6483_v8  ;;  %v6488_v0 = vadd.f32 %v3380_v14, %v6483_v8  ;;  %v7748_v14 = vld [vmem:[#allocation62_spill] sm:$0xff] }
 0x29e   : > { %v3181_v3 = vrot.slane %v3105_v7, 1  ;;  %v3303_v54 = vsel %vm3263_vm3, %v3300_v21, %v3302_v50  ;;  %3002 = vmatmul.f32.gmra.mxu3 %v5626_v25  ;;  %2682 = vmatmul.f32.gmra.mxu1 %v7748_v14  ;;  %v7749_v7 = vld [vmem:[#allocation60_spill] sm:$0xff] }
 0x29f   : > { %7746 = vst [vmem:[#allocation46_spill] sm:$0xff] %v6488_v0  ;;  %v1860_v41 = vpop.f32.mrf.mxu0  ;;  %v2240_v31 = vpop.f32.mrf.mxu2  ;;  %v3382_v15 = vadd.f32 %v3366_v61, %v6434_v1 }
 0x2a0   : > { %v6496_v11 = vsel %vm3142_vm4, %v3179_v29, %v3181_v3  ;;  %v1861_v51 = vadd.f32 %v1860_v41, %v6118_v22  ;;  %v2003_v22 = vpop.f32.mrf.mxu1  ;;  %v7752_v41 = vld [vmem:[#allocation65_spill] sm:$0xff] }
 0x2a1   : > { %7747 = vst [vmem:[#allocation44_spill] sm:$0xff] %v6496_v11  ;;  %v3228_v32 = vadd.f32 %v6496_v11, %v1992_v23  ;;  %v2407_v4 = vpop.f32.mrf.mxu3  ;;  %v7774_v11 = vld [vmem:[#allocation77_spill] sm:$0xff] }
 0x2a2   : > { %v2000_v21 = vadd.f32 %v1999_v44, %v1861_v51  ;;  %2502 = vmatmul.f32.gmra.mxu0 %v7749_v7  ;;  %v6502_v25 = vadd.f32 %v2407_v4, %v2240_v31 }
 0x2a3   : > { %v6504_v50 = vadd.f32 %v3303_v54, %v3228_v32  ;;  %v7753_v32 = vld [vmem:[#allocation63_spill] sm:$0xff] }
 0x2a4   : > { %7750 = vst [vmem:[#allocation49_spill] sm:$0xff] %v6502_v25  ;;  %2867 = vmatmul.f32.gmra.mxu2 %v5647_v62  ;;  %v3106_v51 = vmul.f32 3.0, %v2000_v21  ;;  %v3304_v4 = vrot.slane %v2000_v21, 2 }
 0x2a5   : > { %v3367_v1 = vmul.f32 3.0, %v6504_v50  ;;  %v6509_v29 = vadd.f32 %v3381_v27, %v6504_v50 }
 0x2a6   : > { %3006 = vmatmul.f32.gmra.mxu3 %v5647_v62  ;;  %2688 = vmatmul.f32.gmra.mxu1 %v7752_v41  ;;  %v3183_v59 = vrot.slane %v3106_v51, 1 }
 0x2a7   : > { %7751 = vst [vmem:[#allocation47_spill] sm:$0xff] %v6509_v29  ;;  %v1864_v61 = vpop.f32.mrf.mxu0  ;;  %v2248_v44 = vpop.f32.mrf.mxu2  ;;  %v3383_v3 = vadd.f32 %v3367_v1, %v6455_v5  ;;  %v7810_v29 = vld [vmem:[#allocation110_spill] sm:$0xff] }
 0x2a8   : > { %v1865_v54 = vadd.f32 %v1864_v61, %v6124_v55  ;;  %v2007_v23 = vpop.f32.mrf.mxu1 }
 0x2a9   : > { %v2411_v31 = vpop.f32.mrf.mxu3 }
 0x2aa   : > { %v2004_v14 = vadd.f32 %v2003_v22, %v1865_v54  ;;  %2507 = vmatmul.f32.gmra.mxu0 %v7753_v32  ;;  %v6518_v27 = vadd.f32 %v2411_v31, %v2248_v44  ;;  %v7756_v44 = vld [vmem:[#allocation67_spill] sm:$0xff]  ;;  %v7757_v32 = vld [vmem:[#allocation66_spill] sm:$0xff] }
 0x2ac   : > { %7754 = vst [vmem:[#allocation51_spill] sm:$0xff] %v6518_v27  ;;  %v3107_v62 = vmul.f32 3.0, %v2004_v14  ;;  %v3305_v7 = vrot.slane %v2004_v14, 2  ;;  %2871 = vmatmul.f32.gmra.mxu2 %v5670_v63 }
 0x2ae   : > { %v3184_v25 = vrot.slane %v3107_v62, 1  ;;  %v3306_v5 = vsel %vm3263_vm3, %v3304_v4, %v3305_v7  ;;  %3010 = vmatmul.f32.gmra.mxu3 %v5670_v63  ;;  %2694 = vmatmul.f32.gmra.mxu1 %v7756_v44 }
 0x2af   : > { %v1868_v55 = vpop.f32.mrf.mxu0  ;;  %v2256_v1 = vpop.f32.mrf.mxu2 }
 0x2b0   : > { %v6524_v22 = vsel %vm3142_vm4, %v3183_v59, %v3184_v25  ;;  %v1869_v61 = vadd.f32 %v1868_v55, %v6130_v16  ;;  %v2011_v48 = vpop.f32.mrf.mxu1 }
 0x2b1   : > { %7755 = vst [vmem:[#allocation50_spill] sm:$0xff] %v6524_v22  ;;  %v3229_v54 = vadd.f32 %v6524_v22, %v2000_v21  ;;  %v2415_v41 = vpop.f32.mrf.mxu3 }
 0x2b2   : > { %v2008_v31 = vadd.f32 %v2007_v23, %v1869_v61  ;;  %2512 = vmatmul.f32.gmra.mxu0 %v7757_v32  ;;  %v6530_v51 = vadd.f32 %v2415_v41, %v2256_v1 }
 0x2b3   : > { %v3350_v4 = vadd.f32 %v3306_v5, %v3229_v54  ;;  %v7772_v5 = vld [vmem:[#allocation75_spill] sm:$0xff] }
 0x2b4   : > { %7758 = vst [vmem:[#allocation54_spill] sm:$0xff] %v6530_v51  ;;  %v3108_v62 = vmul.f32 3.0, %v2008_v31  ;;  %v3307_v63 = vrot.slane %v2008_v31, 2  ;;  %2875 = vmatmul.f32.gmra.mxu2 %v5689_v43  ;;  %v7762_v31 = vld [vmem:[#allocation68_spill] sm:$0xff] }
 0x2b5   : > { %v3368_v27 = vmul.f32 3.0, %v3350_v4  ;;  %v6533_v59 = vadd.f32 %v3382_v15, %v3350_v4  ;;  %v7761_v15 = vld [vmem:[#allocation70_spill] sm:$0xff] }
 0x2b6   : > { %v3186_v16 = vrot.slane %v3108_v62, 1  ;;  %v3308_v55 = vsel %vm3263_vm3, %v3305_v7, %v3307_v63  ;;  %3014 = vmatmul.f32.gmra.mxu3 %v5689_v43  ;;  %2700 = vmatmul.f32.gmra.mxu1 %v7761_v15 }
 0x2b7   : > { %7759 = vst [vmem:[#allocation52_spill] sm:$0xff] %v6533_v59  ;;  %v1872_v21 = vpop.f32.mrf.mxu0  ;;  %v2264_v23 = vpop.f32.mrf.mxu2  ;;  %v3384_v61 = vadd.f32 %v3368_v27, %v6483_v8  ;;  %v7800_v59 = vld [vmem:[#allocation99_spill] sm:$0xff] }
 0x2b8   : > { %v6541_v1 = vsel %vm3142_vm4, %v3184_v25, %v3186_v16  ;;  %v1873_v44 = vadd.f32 %v1872_v21, %v6136_v39  ;;  %v2015_v25 = vpop.f32.mrf.mxu1  ;;  %v7766_v16 = vld [vmem:[#allocation73_spill] sm:$0xff] }
 0x2b9   : > { %7760 = vst [vmem:[#allocation57_spill] sm:$0xff] %v6541_v1  ;;  %v3230_v54 = vadd.f32 %v6541_v1, %v2004_v14  ;;  %v2419_v41 = vpop.f32.mrf.mxu3  ;;  %v7765_v14 = vld [vmem:[#allocation135_spill] sm:$0xff] }
 0x2ba   : > { %v2012_v7 = vadd.f32 %v2011_v48, %v1873_v44  ;;  %2517 = vmatmul.f32.gmra.mxu0 %v7762_v31  ;;  %v6547_v43 = vadd.f32 %v2419_v41, %v2264_v23  ;;  %v7767_v44 = vld [vmem:[#allocation71_spill] sm:$0xff]  ;;  %v7769_v41 = vld [vmem:[#allocation74_spill] sm:$0xff] }
 0x2bb   : > { %v3351_v32 = vadd.f32 %v3308_v55, %v3230_v54 }
 0x2bc   : > { %7763 = vst [vmem:[#allocation55_spill] sm:$0xff] %v6547_v43  ;;  %2879 = vmatmul.f32.gmra.mxu2 %v5712_v12  ;;  %v3109_v21 = vmul.f32 3.0, %v2012_v7  ;;  %v3309_v15 = vrot.slane %v2012_v7, 2 }
 0x2bd   : > { %v3369_v8 = vmul.f32 3.0, %v3351_v32  ;;  %v6550_v27 = vadd.f32 %v3383_v3, %v3351_v32 }
 0x2be   : > { %3018 = vmatmul.f32.gmra.mxu3 %v5712_v12  ;;  %2706 = vmatmul.f32.gmra.mxu1 %v7766_v16  ;;  %v3188_v31 = vrot.slane %v3109_v21, 1 }
 0x2bf   : > { %7764 = vst [vmem:[#allocation59_spill] sm:$0xff] %v6550_v27  ;;  %v1876_v39 = vpop.f32.mrf.mxu0  ;;  %v2272_v4 = vpop.f32.mrf.mxu2  ;;  %v3385_v62 = vadd.f32 %v3369_v8, %v6504_v50 }
 0x2c0   : > { %v1877_v63 = vadd.f32 %v1876_v39, %v7765_v14  ;;  %v2019_v50 = vpop.f32.mrf.mxu1 }
 0x2c1   : > { %v2423_v55 = vpop.f32.mrf.mxu3 }
 0x2c2   : > { %v2016_v23 = vadd.f32 %v2015_v25, %v1877_v63  ;;  %2522 = vmatmul.f32.gmra.mxu0 %v7767_v44  ;;  %v6559_v3 = vadd.f32 %v2423_v55, %v2272_v4  ;;  %v7770_v63 = vld [vmem:[#allocation136_spill] sm:$0xff] }
 0x2c3   : > { %v7771_v4 = vld [vmem:[#allocation76_spill] sm:$0xff] }
 0x2c4   : > { %7768 = vst [vmem:[#allocation58_spill] sm:$0xff] %v6559_v3  ;;  %v3110_v12 = vmul.f32 3.0, %v2016_v23  ;;  %v3310_v54 = vrot.slane %v2016_v23, 2  ;;  %2883 = vmatmul.f32.gmra.mxu2 %v7769_v41 }
 0x2c6   : > { %v3189_v32 = vrot.slane %v3110_v12, 1  ;;  %v3311_v8 = vsel %vm3263_vm3, %v3309_v15, %v3310_v54  ;;  %3022 = vmatmul.f32.gmra.mxu3 %v7769_v41  ;;  %2712 = vmatmul.f32.gmra.mxu1 %v7771_v4  ;;  %v7778_v4 = vld [vmem:[#allocation78_spill] sm:$0xff] }
 0x2c7   : > { %v1880_v39 = vpop.f32.mrf.mxu0  ;;  %v2280_v14 = vpop.f32.mrf.mxu2 }
 0x2c8   : > { %v3190_v25 = vsel %vm3142_vm4, %v3188_v31, %v3189_v32  ;;  %v1881_v16 = vadd.f32 %v1880_v39, %v7770_v63  ;;  %v2623_v41 = vpop.f32.mrf.mxu1 }
 0x2c9   : > { %v3231_v55 = vadd.f32 %v3190_v25, %v2012_v7  ;;  %v2427_v44 = vpop.f32.mrf.mxu3 }
 0x2ca   : > { %v2020_v48 = vadd.f32 %v2019_v50, %v1881_v16  ;;  %2527 = vmatmul.f32.gmra.mxu0 %v7772_v5  ;;  %v6568_v3 = vadd.f32 %v2427_v44, %v2280_v14  ;;  %v7779_v44 = vld [vmem:[#allocation81_spill] sm:$0xff] }
 0x2cb   : > { %v3352_v21 = vadd.f32 %v3311_v8, %v3231_v55  ;;  %v7776_v8 = vld [vmem:[#allocation137_spill] sm:$0xff] }
 0x2cc   : > { %7773 = vst [vmem:[#allocation62_spill] sm:$0xff] %v6568_v3  ;;  %v3111_v12 = vmul.f32 3.0, %v2020_v48  ;;  %v3312_v15 = vrot.slane %v2020_v48, 2  ;;  %2887 = vmatmul.f32.gmra.mxu2 %v7774_v11  ;;  %v7777_v48 = vld [vmem:[#allocation80_spill] sm:$0xff] }
 0x2cd   : > { %v6571_v27 = vadd.f32 %v3384_v61, %v3352_v21 }
 0x2ce   : > { %v3191_v31 = vrot.slane %v3111_v12, 1  ;;  %v3313_v39 = vsel %vm3263_vm3, %v3310_v54, %v3312_v15  ;;  %3026 = vmatmul.f32.gmra.mxu3 %v7774_v11  ;;  %2718 = vmatmul.f32.gmra.mxu1 %v7777_v48 }
 0x2cf   : > { %7775 = vst [vmem:[#allocation60_spill] sm:$0xff] %v6571_v27  ;;  %v2453_v7 = vpop.f32.mrf.mxu0  ;;  %v2824_v25 = vpop.f32.mrf.mxu2 }
 0x2d0   : > { %v3192_v50 = vsel %vm3142_vm4, %v3189_v32, %v3191_v31  ;;  %v2454_v14 = vadd.f32 %v2453_v7, %v7776_v8  ;;  %v7781_v31 = vld [vmem:[#allocation138_spill] sm:$0xff]  ;;  %v7782_v7 = vld [vmem:[#allocation84_spill] sm:$0xff] }
 0x2d1   : > { %v3232_v63 = vadd.f32 %v3192_v50, %v2016_v23  ;;  %v2963_v16 = vpop.f32.mrf.mxu3  ;;  %v7783_v50 = vld [vmem:[#allocation82_spill] sm:$0xff]  ;;  %v7789_v23 = vld [vmem:[#allocation140_spill] sm:$0xff] }
 0x2d2   : > { %v2624_v61 = vadd.f32 %v2623_v41, %v2454_v14  ;;  %2532 = vmatmul.f32.gmra.mxu0 %v7778_v4 }
 0x2d3   : > { %v3353_v55 = vadd.f32 %v3313_v39, %v3232_v63  ;;  %v2629_v11 = vpop.f32.mrf.mxu1 }
 0x2d4   : > { %v2825_v54 = vadd.f32 %v2824_v25, %v2624_v61  ;;  %2891 = vmatmul.f32.gmra.mxu2 %v7779_v44 }
 0x2d5   : > { %v6582_v21 = vadd.f32 %v3385_v62, %v3353_v55  ;;  %v7784_v62 = vld [vmem:[#allocation85_spill] sm:$0xff] }
 0x2d6   : > { %v6584_v12 = vadd.f32 %v2963_v16, %v2825_v54  ;;  %3030 = vmatmul.f32.gmra.mxu3 %v7779_v44  ;;  %2724 = vmatmul.f32.gmra.mxu1 %v7782_v7 }
 0x2d7   : > { %7780 = vst [vmem:[#allocation65_spill] sm:$0xff] %v6582_v21  ;;  %v2458_v32 = vpop.f32.mrf.mxu0  ;;  %v2828_v15 = vpop.f32.mrf.mxu2 }
 0x2d8   : > { %v2459_v41 = vadd.f32 %v2458_v32, %v7781_v31  ;;  %v3889_v14 = vmul.f32 3.0, %v6584_v12  ;;  %v3455_v16 = vrot.slane %v6584_v12, 6  ;;  %v4049_v61 = vrot.slane %v6584_v12, 2 }
 0x2d9   : > { %v2967_v39 = vpop.f32.mrf.mxu3 }
 0x2da   : > { %v2630_v25 = vadd.f32 %v2629_v11, %v2459_v41  ;;  %2537 = vmatmul.f32.gmra.mxu0 %v7783_v50  ;;  %v7785_v11 = vld [vmem:[#allocation139_spill] sm:$0xff]  ;;  %v3949_v41 = vrot.slane %v3889_v14, 1 }
 0x2db   : > { %v2635_v48 = vpop.f32.mrf.mxu1 }
 0x2dc   : > { %v2829_v8 = vadd.f32 %v2828_v15, %v2630_v25  ;;  %2895 = vmatmul.f32.gmra.mxu2 %v7784_v62  ;;  %v7786_v15 = vld [vmem:[#allocation87_spill] sm:$0xff] }
 0x2de   : > { %v6594_v63 = vadd.f32 %v2967_v39, %v2829_v8  ;;  %3034 = vmatmul.f32.gmra.mxu3 %v7784_v62  ;;  %2730 = vmatmul.f32.gmra.mxu1 %v7786_v15  ;;  %v7787_v8 = vld [vmem:[#allocation86_spill] sm:$0xff]  ;;  %v7788_v15 = vld [vmem:[#allocation88_spill] sm:$0xff] }
 0x2df   : > { %v2463_v4 = vpop.f32.mrf.mxu0  ;;  %v2832_v55 = vpop.f32.mrf.mxu2 }
 0x2e0   : > { %v3890_v54 = vmul.f32 3.0, %v6594_v63  ;;  %v4050_v44 = vrot.slane %v6594_v63, 2  ;;  %v2464_v32 = vadd.f32 %v2463_v4, %v7785_v11  ;;  %v3456_v31 = vrot.slane %v6594_v63, 6 }
 0x2e1   : > { %v2971_v7 = vpop.f32.mrf.mxu3 }
 0x2e2   : > { %v3950_v39 = vrot.slane %v3890_v54, 1  ;;  %v4051_v25 = vsel %vm3263_vm3, %v4049_v61, %v4050_v44  ;;  %v2636_v50 = vadd.f32 %v2635_v48, %v2464_v32  ;;  %2542 = vmatmul.f32.gmra.mxu0 %v7787_v8  ;;  %v6607_v62 = vsel %vm3454_vm5, %v3455_v16, %v3456_v31 }
 0x2e3   : > { %v2641_v5 = vpop.f32.mrf.mxu1 }
 0x2e4   : > { %v3951_v4 = vsel %vm3142_vm4, %v3949_v41, %v3950_v39  ;;  %v2833_v11 = vadd.f32 %v2832_v55, %v2636_v50  ;;  %2899 = vmatmul.f32.gmra.mxu2 %v7788_v15  ;;  %v7790_v41 = vld [vmem:[#allocation91_spill] sm:$0xff] }
 0x2e5   : > { %v4019_v14 = vadd.f32 %v3951_v4, %v6584_v12 }
 0x2e6   : > { %v2972_v54 = vadd.f32 %v2971_v7, %v2833_v11  ;;  %3038 = vmatmul.f32.gmra.mxu3 %v7788_v15  ;;  %2736 = vmatmul.f32.gmra.mxu1 %v7790_v41  ;;  %v7791_v7 = vld [vmem:[#allocation89_spill] sm:$0xff]  ;;  %v7792_v15 = vld [vmem:[#allocation92_spill] sm:$0xff] }
 0x2e7   : > { %v6615_v48 = vadd.f32 %v4051_v25, %v4019_v14  ;;  %v2468_v61 = vpop.f32.mrf.mxu0  ;;  %v2836_v32 = vpop.f32.mrf.mxu2 }
 0x2e8   : > { %v6617_v8 = vsub.f32 %v2972_v54, %v3456_v31  ;;  %v3891_v1 = vmul.f32 3.0, %v2972_v54  ;;  %v4052_v21 = vrot.slane %v2972_v54, 2  ;;  %v2469_v22 = vadd.f32 %v2468_v61, %v7789_v23 }
 0x2e9   : > { %v2975_v55 = vpop.f32.mrf.mxu3 }
 0x2ea   : > { %v3952_v50 = vrot.slane %v3891_v1, 1  ;;  %v4053_v4 = vsel %vm3263_vm3, %v4050_v44, %v4052_v21  ;;  %v2642_v27 = vadd.f32 %v2641_v5, %v2469_v22  ;;  %2547 = vmatmul.f32.gmra.mxu0 %v7791_v7  ;;  %v7793_v21 = vld [vmem:[#allocation101_spill] sm:$0xff]  ;;  %v7794_v5 = vld [vmem:[#allocation95_spill] sm:$0xff] }
 0x2eb   : > { %v2647_v14 = vpop.f32.mrf.mxu1 }
 0x2ec   : > { %v3953_v25 = vsel %vm3142_vm4, %v3950_v39, %v3952_v50  ;;  %v2837_v11 = vadd.f32 %v2836_v32, %v2642_v27  ;;  %2903 = vmatmul.f32.gmra.mxu2 %v7792_v15  ;;  %v7795_v32 = vld [vmem:[#allocation93_spill] sm:$0xff]  ;;  %v3515_v50 = vsub.f32 %v6584_v12, %v3455_v16  ;;  %v7798_v12 = vld [vmem:[#allocation98_spill] sm:$0xff] }
 0x2ed   : > { %v4020_v31 = vadd.f32 %v3953_v25, %v6594_v63 }
 0x2ee   : > { %v2976_v54 = vadd.f32 %v2975_v55, %v2837_v11  ;;  %3042 = vmatmul.f32.gmra.mxu3 %v7792_v15  ;;  %2742 = vmatmul.f32.gmra.mxu1 %v7794_v5 }
 0x2ef   : > { %v6627_v23 = vadd.f32 %v4053_v4, %v4020_v31  ;;  %v2473_v61 = vpop.f32.mrf.mxu0  ;;  %v2840_v1 = vpop.f32.mrf.mxu2  ;;  %v7796_v4 = vld [vmem:[#allocation96_spill] sm:$0xff] }
 0x2f0   : > { %v3458_v41 = vrot.slane %v2976_v54, 6  ;;  %v2474_v22 = vadd.f32 %v2473_v61, %v7793_v21  ;;  %v3892_v25 = vmul.f32 3.0, %v2976_v54  ;;  %v4054_v61 = vrot.slane %v2976_v54, 2 }
 0x2f1   : > { %v2979_v44 = vpop.f32.mrf.mxu3 }
 0x2f2   : > { %v6631_v39 = vsub.f32 %v2976_v54, %v3458_v41  ;;  %v2648_v27 = vadd.f32 %v2647_v14, %v2474_v22  ;;  %2552 = vmatmul.f32.gmra.mxu0 %v7795_v32  ;;  %v7797_v32 = vld [vmem:[#allocation106_spill] sm:$0xff] }
 0x2f3   : > { %v2653_v11 = vpop.f32.mrf.mxu1 }
 0x2f4   : > { %v3545_v55 = vmul.f32 3.0, %v6631_v39  ;;  %v2841_v7 = vadd.f32 %v2840_v1, %v2648_v27  ;;  %2907 = vmatmul.f32.gmra.mxu2 %v7796_v4  ;;  %v3954_v1 = vrot.slane %v3892_v25, 1 }
 0x2f6   : > { %v6637_v15 = vadd.f32 %v3545_v55, %v3515_v50  ;;  %v2980_v31 = vadd.f32 %v2979_v44, %v2841_v7  ;;  %3046 = vmatmul.f32.gmra.mxu3 %v7796_v4  ;;  %2748 = vmatmul.f32.gmra.mxu1 %v7798_v12  ;;  %v7799_v55 = vld [vmem:[#allocation97_spill] sm:$0xff] }
 0x2f7   : > { %v2478_v21 = vpop.f32.mrf.mxu0  ;;  %v2844_v5 = vpop.f32.mrf.mxu2 }
 0x2f8   : > { %v3893_v14 = vmul.f32 3.0, %v2980_v31  ;;  %v4055_v22 = vrot.slane %v2980_v31, 2  ;;  %v2479_v3 = vadd.f32 %v2478_v21, %v7797_v32  ;;  %v3459_v16 = vrot.slane %v2980_v31, 6 }
 0x2f9   : > { %v2983_v27 = vpop.f32.mrf.mxu3 }
 0x2fa   : > { %v3955_v43 = vrot.slane %v3893_v14, 1  ;;  %v4056_v51 = vsel %vm3263_vm3, %v4054_v61, %v4055_v22  ;;  %v2654_v50 = vadd.f32 %v2653_v11, %v2479_v3  ;;  %2557 = vmatmul.f32.gmra.mxu0 %v7799_v55  ;;  %v3460_v44 = vsel %vm3454_vm5, %v3458_v41, %v3459_v16 }
 0x2fb   : > { %v6645_v7 = vsub.f32 %v2980_v31, %v3460_v44  ;;  %v2659_v25 = vpop.f32.mrf.mxu1  ;;  %v7801_v3 = vsub.f32 %v6594_v63, %v6607_v62  ;;  %v7803_v44 = vld [vmem:[#allocation103_spill] sm:$0xff]  ;;  %v7804_v63 = vld [vmem:[#allocation100_spill] sm:$0xff] }
 0x2fc   : > { %v3956_v4 = vsel %vm3142_vm4, %v3954_v1, %v3955_v43  ;;  %v2845_v26 = vadd.f32 %v2844_v5, %v2654_v50  ;;  %2911 = vmatmul.f32.gmra.mxu2 %v7800_v59 }
 0x2fd   : > { %v4021_v21 = vadd.f32 %v3956_v4, %v2976_v54  ;;  %v3546_v32 = vmul.f32 3.0, %v6645_v7  ;;  %v7802_v54 = vld [vmem:[#allocation111_spill] sm:$0xff] }
 0x2fe   : > { %v2984_v12 = vadd.f32 %v2983_v27, %v2845_v26  ;;  %3050 = vmatmul.f32.gmra.mxu3 %v7800_v59  ;;  %2754 = vmatmul.f32.gmra.mxu1 %v7803_v44 }
 0x2ff   : > { %v6651_v61 = vadd.f32 %v4056_v51, %v4021_v21  ;;  %v6656_v41 = vadd.f32 %v3546_v32, %v7801_v3  ;;  %v2483_v11 = vpop.f32.mrf.mxu0  ;;  %v2848_v14 = vpop.f32.mrf.mxu2  ;;  %v3617_v32 = vld [vmem:[#allocation2 + $0x1a] sm:$0xff] }
 0x300   : > { %v6658_v1 = vsub.f32 %v2984_v12, %v3459_v16  ;;  %v3894_v5 = vmul.f32 3.0, %v2984_v12  ;;  %v4057_v50 = vrot.slane %v2984_v12, 2  ;;  %v2484_v55 = vadd.f32 %v2483_v11, %v7802_v54  ;;  %v3633_v12 = vld [vmem:[#allocation2 + $0x18] sm:$0xff]  ;;  %v7805_v3 = vld [vmem:[#allocation104_spill] sm:$0xff] }
 0x301   : > { %v2987_v26 = vpop.f32.mrf.mxu3 }
 0x302   : > { %v3547_v59 = vmul.f32 3.0, %v6658_v1  ;;  %v3957_v51 = vrot.slane %v3894_v5, 1  ;;  %v4058_v27 = vsel %vm3263_vm3, %v4055_v22, %v4057_v50  ;;  %v2660_v4 = vadd.f32 %v2659_v25, %v2484_v55  ;;  %2562 = vmatmul.f32.gmra.mxu0 %v7804_v63  ;;  %v3618_v5 = vld [vmem:[#allocation2 + $0x22] sm:$0xff] }
 0x303   : > { %v2665_v54 = vpop.f32.mrf.mxu1  ;;  %v3634_v22 = vld [vmem:[#allocation2 + $0x20] sm:$0xff]  ;;  %v3649_v50 = vsub.f32 %v3617_v32, %v3633_v12 }
 0x304   : > { %v6666_v62 = vadd.f32 %v3547_v59, %v6617_v8  ;;  %v3958_v16 = vsel %vm3142_vm4, %v3955_v43, %v3957_v51  ;;  %v2849_v21 = vadd.f32 %v2848_v14, %v2660_v4  ;;  %2915 = vmatmul.f32.gmra.mxu2 %v7805_v3  ;;  %v7806_v63 = vld [vmem:[#allocation112_spill] sm:$0xff]  ;;  %v3650_v4 = vsub.f32 %v3618_v5, %v3634_v22 }
 0x305   : > { %v4022_v11 = vadd.f32 %v3958_v16, %v2980_v31  ;;  %v7807_v14 = vld [vmem:[#allocation108_spill] sm:$0xff]  ;;  %v3665_v16 = vmul.f32 3.0, %v3649_v50 }
 0x306   : > { %v2988_v44 = vadd.f32 %v2987_v26, %v2849_v21  ;;  %3054 = vmatmul.f32.gmra.mxu3 %v7805_v3  ;;  %2760 = vmatmul.f32.gmra.mxu1 %v7807_v14  ;;  %v7808_v26 = vld [vmem:[#allocation105_spill] sm:$0xff]  ;;  %v6682_v3 = vmul.f32 3.0, %v3650_v4 }
 0x307   : > { %v6671_v25 = vadd.f32 %v4058_v27, %v4022_v11  ;;  %v2488_v55 = vpop.f32.mrf.mxu0  ;;  %v2852_v8 = vpop.f32.mrf.mxu2  ;;  %v3697_v5 = vrot.slane %v3665_v16, 6  ;;  %v4172_v14 = vld [vmem:[#allocation2 + $0x1] sm:$0xff] }
 0x308   : > { %v3461_v59 = vrot.slane %v2988_v44, 6  ;;  %v2489_v43 = vadd.f32 %v2488_v55, %v7806_v63  ;;  %v3895_v11 = vmul.f32 3.0, %v2988_v44  ;;  %v4059_v63 = vrot.slane %v2988_v44, 2 }
 0x309   : > { %v2991_v51 = vpop.f32.mrf.mxu3 }
 0x30a   : > { %v6675_v36 = vsub.f32 %v2988_v44, %v3461_v59  ;;  %v2666_v31 = vadd.f32 %v2665_v54, %v2489_v43  ;;  %2567 = vmatmul.f32.gmra.mxu0 %v7808_v26  ;;  %v6692_v43 = vld [vmem:[#allocation2 + $0x31] sm:$0xff]  ;;  %v3959_v26 = vrot.slane %v3895_v11, 1 }
 0x30b   : > { %v2671_v12 = vpop.f32.mrf.mxu1  ;;  %v4188_v0 = vsub.f32 %v6692_v43, %v4172_v14 }
 0x30c   : > { %v3548_v21 = vmul.f32 3.0, %v6675_v36  ;;  %v3593_v27 = vadd.f32 %v6637_v15, %v6675_v36  ;;  %v2853_v32 = vadd.f32 %v2852_v8, %v2666_v31  ;;  %2919 = vmatmul.f32.gmra.mxu2 %v7697_v17 }
 0x30d   : > { %v4204_v14 = vmul.f32 3.0, %v4188_v0 }
 0x30e   : > { %v6684_v55 = vadd.f32 %v2991_v51, %v2853_v32  ;;  %3058 = vmatmul.f32.gmra.mxu3 %v7697_v17  ;;  %v6688_v54 = vadd.f32 %v3548_v21, %v6631_v39  ;;  %v7809_v51 = vld [vmem:[#allocation113_spill] sm:$0xff]  ;;  %v3698_v39 = vrot.slane %v6682_v3, 6  ;;  %v3745_v56 = vsub.f32 %v3593_v27, %v3697_v5 }
 0x30f   : > { %v2493_v22 = vpop.f32.mrf.mxu0  ;;  %v2856_v50 = vpop.f32.mrf.mxu2  ;;  %2766 = vmatmul.f32.gmra.mxu1 %v7809_v51 }
 0x310   : > { %v3896_v15 = vmul.f32 3.0, %v6684_v55  ;;  %v4060_v8 = vrot.slane %v6684_v55, 2  ;;  %v2494_v4 = vadd.f32 %v2493_v22, %v6236_v46  ;;  %v3462_v17 = vrot.slane %v6684_v55, 6 }
 0x311   : > { %v2995_v31 = vpop.f32.mrf.mxu3  ;;  %v3699_v11 = vsel %vm3454_vm5, %v3697_v5, %v3698_v39 }
 0x312   : > { %v3960_v16 = vrot.slane %v3896_v15, 1  ;;  %v4061_v21 = vsel %vm3263_vm3, %v4059_v63, %v4060_v8  ;;  %v2672_v32 = vadd.f32 %v2671_v12, %v2494_v4  ;;  %2572 = vmatmul.f32.gmra.mxu0 %v7810_v29  ;;  %v3463_v38 = vsel %vm3454_vm5, %v3461_v59, %v3462_v17  ;;  %v6711_v15 = vld [vmem:[#allocation2 + $0x39] sm:$0xff]  ;;  %v4173_v59 = vld [vmem:[#allocation2 + $0x9] sm:$0xff] }
 0x313   : > { %v6704_v51 = vsub.f32 %v6684_v55, %v3463_v38  ;;  %v2677_v63 = vpop.f32.mrf.mxu1 }
 0x314   : > { %v3961_v46 = vsel %vm3142_vm4, %v3959_v26, %v3960_v16  ;;  %v2857_v22 = vadd.f32 %v2856_v50, %v2672_v32  ;;  %2923 = vmatmul.f32.gmra.mxu2 %v7701_v6  ;;  %v3769_v50 = vand.u32 2147483647, %v3745_v56 }
 0x315   : > { %v4023_v3 = vadd.f32 %v3961_v46, %v2988_v44  ;;  %v3549_v29 = vmul.f32 3.0, %v6704_v51  ;;  %v3594_v27 = vadd.f32 %v6656_v41, %v6704_v51  ;;  %v7811_v46 = vld [vmem:[#allocation118_spill] sm:$0xff] }
 0x316   : > { %v2996_v12 = vadd.f32 %v2995_v31, %v2857_v22  ;;  %3062 = vmatmul.f32.gmra.mxu3 %v7701_v6  ;;  %v4189_v22 = vsub.f32 %v6711_v15, %v4173_v59 }
 0x317   : > { %v6714_v38 = vadd.f32 %v4061_v21, %v4023_v3  ;;  %v2498_v4 = vpop.f32.mrf.mxu0  ;;  %v2860_v44 = vpop.f32.mrf.mxu2  ;;  %v3746_v5 = vsub.f32 %v3594_v27, %v3699_v11  ;;  %2772 = vmatmul.f32.gmra.mxu1 %v7811_v46  ;;  %v6724_v21 = vadd.f32 %v3549_v29, %v6645_v7  ;;  %v3817_v27 = vrot.slane %v3769_v50, 2  ;;  %v7814_v29 = vld [vmem:[#allocation119_spill] sm:$0xff] }
 0x318   : > { %v6716_v26 = vsub.f32 %v2996_v12, %v3462_v17  ;;  %v3897_v31 = vmul.f32 3.0, %v2996_v12  ;;  %v4062_v32 = vrot.slane %v2996_v12, 2  ;;  %v2499_v6 = vadd.f32 %v2498_v4, %v7812_v58  ;;  %v7813_v12 = vld [vmem:[#allocation115_spill] sm:$0xff]  ;;  %v3635_v58 = vld [vmem:[#allocation2 + $0x30] sm:$0xff] }
 0x319   : > { %v4139_v41 = vsub.f32 %v6714_v38, %v6615_v48  ;;  %v2999_v56 = vpop.f32.mrf.mxu3  ;;  %v3770_v3 = vand.u32 2147483647, %v3746_v5  ;;  %v7816_v5 = vld [vmem:[#allocation102_spill] sm:$0xff] }
 0x31a   : > { %v3550_v0 = vmul.f32 3.0, %v6716_v26  ;;  %v3595_v17 = vadd.f32 %v6666_v62, %v6716_v26  ;;  %v3962_v11 = vrot.slane %v3897_v31, 1  ;;  %2577 = vmatmul.f32.gmra.mxu0 %v7813_v12  ;;  %v4063_v48 = vsel %vm3263_vm3, %v4060_v8, %v4062_v32  ;;  %v7815_v62 = vld [vmem:[#allocation116_spill] sm:$0xff] }
 0x31b   : > { %v4220_v46 = vsub.f32 %v4139_v41, %v4204_v14  ;;  %v2678_v59 = vadd.f32 %v2677_v63, %v2499_v6  ;;  %v3818_v19 = vrot.slane %v3770_v3, 2  ;;  %v7817_v31 = vsub.f32 %v7815_v62, %v7816_v5  ;;  %v2683_v63 = vpop.f32.mrf.mxu1  ;;  %v3620_v32 = vld [vmem:[#allocation2 + $0x3a] sm:$0xff]  ;;  %v7818_v5 = vld [vmem:[#allocation122_spill] sm:$0xff] }
 0x31c   : > { %v3747_v4 = vsub.f32 %v3595_v17, %v3698_v39  ;;  %v3963_v7 = vsel %vm3142_vm4, %v3960_v16, %v3962_v11  ;;  %2927 = vmatmul.f32.gmra.mxu2 %v7814_v29  ;;  %v6734_v18 = vadd.f32 %v3550_v0, %v6658_v1  ;;  %v3636_v41 = vld [vmem:[#allocation2 + $0x38] sm:$0xff]  ;;  %v3651_v16 = vsub.f32 %v3619_v2, %v3635_v58 }
 0x31d   : > { %v3418_v12 = vand.u32 2147483647, %v7817_v31  ;;  %v4236_v50 = vand.u32 2147483647, %v4220_v46  ;;  %v4024_v14 = vadd.f32 %v3963_v7, %v6684_v55  ;;  %v2861_v8 = vadd.f32 %v2860_v44, %v2678_v59  ;;  %v7819_v44 = vld [vmem:[#allocation123_spill] sm:$0xff]  ;;  %v7820_v7 = vld [vmem:[#allocation121_spill] sm:$0xff] }
 0x31e   : > { %v3771_v39 = vand.u32 2147483647, %v3747_v4  ;;  %v3819_v6 = vsel %vm3263_vm3, %v3817_v27, %v3818_v19  ;;  %3066 = vmatmul.f32.gmra.mxu3 %v7814_v29  ;;  %v4205_v0 = vmul.f32 3.0, %v4189_v22  ;;  %v3652_v59 = vsub.f32 %v3620_v32, %v3636_v41  ;;  %v7821_v4 = vld [vmem:[#allocation107_spill] sm:$0xff] }
 0x31f   : > { %v3873_v17 = vadd.f32 %v3819_v6, %v3418_v12  ;;  %v6742_v1 = vadd.f32 %v4063_v48, %v4024_v14  ;;  %v3000_v3 = vadd.f32 %v2999_v56, %v2861_v8  ;;  %v2503_v11 = vpop.f32.mrf.mxu0  ;;  %v2864_v62 = vpop.f32.mrf.mxu2  ;;  %2778 = vmatmul.f32.gmra.mxu1 %v7819_v44  ;;  %v7822_v31 = vsub.f32 %v7820_v7, %v7821_v4  ;;  %v7823_v12 = vld [vmem:[#allocation120_spill] sm:$0xff] }
 0x320   : > { %v3820_v46 = vrot.slane %v3771_v39, 2  ;;  %v2504_v55 = vadd.f32 %v2503_v11, %v7818_v5  ;;  %v3667_v32 = vmul.f32 3.0, %v3651_v16  ;;  %v6756_v6 = vmul.f32 3.0, %v3652_v59  ;;  %v4174_v7 = vld [vmem:[#allocation2 + $0x19] sm:$0xff] }
 0x321   : > { %v3419_v27 = vand.u32 2147483647, %v7822_v31  ;;  %v4140_v2 = vsub.f32 %v6742_v1, %v6627_v23  ;;  %v4252_v58 = vadd.f32 %v4236_v50, %v3873_v17  ;;  %v3464_v48 = vrot.slane %v3000_v3, 6  ;;  %v3003_v29 = vpop.f32.mrf.mxu3  ;;  %v7824_v31 = vld [vmem:[#allocation128_spill] sm:$0xff] }
 0x322   : > { %v3821_v22 = vsel %vm3263_vm3, %v3818_v19, %v3820_v46  ;;  %v2684_v56 = vadd.f32 %v2683_v63, %v2504_v55  ;;  %2582 = vmatmul.f32.gmra.mxu0 %v7823_v12  ;;  %v3898_v19 = vmul.f32 3.0, %v3000_v3  ;;  %v3700_v46 = vrot.slane %v3667_v32, 6 }
 0x323   : > { %v3874_v14 = vadd.f32 %v3821_v22, %v3419_v27  ;;  %v4221_v8 = vsub.f32 %v4140_v2, %v4205_v0  ;;  %v6753_v39 = vsub.f32 %v3000_v3, %v3464_v48  ;;  %v2689_v63 = vpop.f32.mrf.mxu1  ;;  %v4064_v16 = vrot.slane %v3000_v3, 2 }
 0x324   : > { %v2865_v41 = vadd.f32 %v2864_v62, %v2684_v56  ;;  %2931 = vmatmul.f32.gmra.mxu2 %v7710_v42  ;;  %v4268_v27 = vsel %vm733_vm0, %v4252_v58, 0.0  ;;  %v3701_v22 = vrot.slane %v6756_v6, 6 }
 0x325   : > { %v4237_v11 = vand.u32 2147483647, %v4221_v8  ;;  %v3551_v23 = vmul.f32 3.0, %v6753_v39  ;;  %v3596_v50 = vadd.f32 %v6688_v54, %v6753_v39  ;;  %v4158_v54 = vld [vmem:[#allocation2 + $0x49] sm:$0xff] }
 0x326   : > { %v6761_v17 = vadd.f32 %v3003_v29, %v2865_v41  ;;  %3070 = vmatmul.f32.gmra.mxu3 %v7710_v42  ;;  %v3964_v29 = vrot.slane %v3898_v19, 1  ;;  %v4190_v41 = vsub.f32 %v4158_v54, %v4174_v7 }
 0x327   : > { %v4253_v0 = vadd.f32 %v4237_v11, %v3874_v14  ;;  %v2508_v62 = vpop.f32.mrf.mxu0  ;;  %v2868_v5 = vpop.f32.mrf.mxu2  ;;  %v6765_v55 = vadd.f32 %v3551_v23, %v6675_v36  ;;  %2784 = vmatmul.f32.gmra.mxu1 %v7824_v31  ;;  %v3748_v32 = vsub.f32 %v3596_v50, %v3700_v46 }
 0x328   : > { %v6768_v44 = vmul.f32 3.0, %v6761_v17  ;;  %v4065_v59 = vrot.slane %v6761_v17, 2  ;;  %v2509_v4 = vadd.f32 %v2508_v62, %v6285_v13  ;;  %v3465_v42 = vrot.slane %v6761_v17, 6  ;;  %v7825_v13 = vld [vmem:[#allocation125_spill] sm:$0xff] }
 0x329   : > { %v4269_v2 = vsel %vm733_vm0, %v4253_v0, 0.0  ;;  %v3007_v36 = vpop.f32.mrf.mxu3  ;;  %v3702_v0 = vsel %vm3454_vm5, %v3700_v46, %v3701_v22  ;;  %v4206_v7 = vmul.f32 3.0, %v4190_v41 }
 0x32a   : > { %v6777_v56 = vadd.f32 %v4269_v2, %v4268_v27  ;;  %v3965_v12 = vrot.slane %v6768_v44, 1  ;;  %v4066_v14 = vsel %vm3263_vm3, %v4064_v16, %v4065_v59  ;;  %v2690_v8 = vadd.f32 %v2689_v63, %v2509_v4  ;;  %2587 = vmatmul.f32.gmra.mxu0 %v7825_v13  ;;  %v6792_v44 = vld [vmem:[#allocation2 + $0x51] sm:$0xff] }
 0x32b   : > { %v3466_v11 = vsel %vm3454_vm5, %v3464_v48, %v3465_v42  ;;  %v2695_v62 = vpop.f32.mrf.mxu1  ;;  %v4175_v48 = vld [vmem:[#allocation2 + $0x21] sm:$0xff] }
 0x32c   : > { %v3966_v58 = vsel %vm3142_vm4, %v3964_v29, %v3965_v12  ;;  %v2869_v23 = vadd.f32 %v2868_v5, %v2690_v8  ;;  %v6785_v19 = vsub.f32 %v6761_v17, %v3466_v11  ;;  %2935 = vmatmul.f32.gmra.mxu2 %v7711_v52  ;;  %v3772_v5 = vand.u32 2147483647, %v3748_v32  ;;  %v7826_v29 = vld [vmem:[#allocation132_spill] sm:$0xff]  ;;  %v7827_v11 = vld [vmem:[#allocation130_spill] sm:$0xff] }
 0x32d   : > { %v4025_v6 = vadd.f32 %v3966_v58, %v3000_v3 }
 0x32e   : > { %v3008_v16 = vadd.f32 %v3007_v36, %v2869_v23  ;;  %v3552_v63 = vmul.f32 3.0, %v6785_v19  ;;  %v3597_v50 = vadd.f32 %v6724_v21, %v6785_v19  ;;  %3074 = vmatmul.f32.gmra.mxu3 %v7711_v52  ;;  %v4191_v36 = vsub.f32 %v6792_v44, %v4175_v48 }
 0x32f   : > { %v6795_v54 = vadd.f32 %v4066_v14, %v4025_v6  ;;  %v2513_v4 = vpop.f32.mrf.mxu0  ;;  %v2872_v3 = vpop.f32.mrf.mxu2  ;;  %2790 = vmatmul.f32.gmra.mxu1 %v7826_v29  ;;  %v3822_v58 = vrot.slane %v3772_v5, 2 }
 0x330   : > { %v6797_v31 = vsub.f32 %v3008_v16, %v3465_v42  ;;  %v3749_v46 = vsub.f32 %v3597_v50, %v3702_v0  ;;  %v3900_v27 = vmul.f32 3.0, %v3008_v16  ;;  %v4067_v2 = vrot.slane %v3008_v16, 2  ;;  %v3621_v0 = vld [vmem:[#allocation2 + $0x4a] sm:$0xff] }
 0x331   : > { %v4141_v21 = vsub.f32 %v6795_v54, %v6651_v61  ;;  %v2514_v52 = vadd.f32 %v2513_v4, %v6306_v9  ;;  %v3011_v8 = vpop.f32.mrf.mxu3  ;;  %v6805_v14 = vadd.f32 %v3552_v63, %v6704_v51  ;;  %v3637_v9 = vld [vmem:[#allocation2 + $0x48] sm:$0xff]  ;;  %v3622_v4 = vld [vmem:[#allocation2 + $0x52] sm:$0xff]  ;;  %v4207_v29 = vmul.f32 3.0, %v4191_v36 }
 0x332   : > { %v3553_v13 = vmul.f32 3.0, %v6797_v31  ;;  %v3598_v42 = vadd.f32 %v6734_v18, %v6797_v31  ;;  %v3773_v32 = vand.u32 2147483647, %v3749_v46  ;;  %v3967_v41 = vrot.slane %v3900_v27, 1  ;;  %2592 = vmatmul.f32.gmra.mxu0 %v7827_v11  ;;  %v3638_v46 = vld [vmem:[#allocation2 + $0x50] sm:$0xff] }
 0x333   : > { %v4222_v23 = vsub.f32 %v4141_v21, %v4206_v7  ;;  %v4068_v61 = vsel %vm3263_vm3, %v4065_v59, %v4067_v2  ;;  %v2696_v6 = vadd.f32 %v2695_v62, %v2514_v52  ;;  %v7828_v18 = vsub.f32 %v6292_v47, %v6230_v35  ;;  %v2701_v62 = vpop.f32.mrf.mxu1 }
 0x334   : > { %v3750_v16 = vsub.f32 %v3598_v42, %v3701_v22  ;;  %v3823_v50 = vrot.slane %v3773_v32, 2  ;;  %v3968_v51 = vsel %vm3142_vm4, %v3965_v12, %v3967_v41  ;;  %2939 = vmatmul.f32.gmra.mxu2 %v6022_v60  ;;  %v6815_v63 = vadd.f32 %v3553_v13, %v6716_v26  ;;  %v7829_v13 = vld [vmem:[#allocation127_spill] sm:$0xff]  ;;  %v7831_v32 = vld [vmem:[#allocation126_spill] sm:$0xff]  ;;  %v7832_v41 = vld [vmem:[#allocation117_spill] sm:$0xff] }
 0x335   : > { %v3420_v48 = vand.u32 2147483647, %v7828_v18  ;;  %v4238_v5 = vand.u32 2147483647, %v4222_v23  ;;  %v4026_v7 = vadd.f32 %v3968_v51, %v6761_v17  ;;  %v2873_v59 = vadd.f32 %v2872_v3, %v2696_v6  ;;  %v7830_v3 = vld [vmem:[#allocation134_spill] sm:$0xff] }
 0x336   : > { %v3774_v22 = vand.u32 2147483647, %v3750_v16  ;;  %v3824_v27 = vsel %vm3263_vm3, %v3822_v58, %v3823_v50  ;;  %v3653_v12 = vsub.f32 %v3621_v0, %v3637_v9  ;;  %3078 = vmatmul.f32.gmra.mxu3 %v6022_v60  ;;  %v3654_v42 = vsub.f32 %v3622_v4, %v3638_v46  ;;  %v7834_v9 = vld [vmem:[#allocation133_spill] sm:$0xff] }
 0x337   : > { %v3875_v2 = vadd.f32 %v3824_v27, %v3420_v48  ;;  %v6823_v26 = vadd.f32 %v4068_v61, %v4026_v7  ;;  %v3012_v21 = vadd.f32 %v3011_v8, %v2873_v59  ;;  %v2518_v35 = vpop.f32.mrf.mxu0  ;;  %v2876_v47 = vpop.f32.mrf.mxu2  ;;  %2796 = vmatmul.f32.gmra.mxu1 %v7830_v3  ;;  %v7833_v11 = vsub.f32 %v7831_v32, %v7832_v41 }
 0x338   : > { %v3825_v52 = vrot.slane %v3774_v22, 2  ;;  %v2519_v17 = vadd.f32 %v2518_v35, %v7829_v13  ;;  %v3669_v8 = vmul.f32 3.0, %v3653_v12  ;;  %v6838_v4 = vmul.f32 3.0, %v3654_v42  ;;  %v4160_v13 = vld [vmem:[#allocation2 + $0x61] sm:$0xff] }
 0x339   : > { %v3421_v58 = vand.u32 2147483647, %v7833_v11  ;;  %v4142_v60 = vsub.f32 %v6823_v26, %v6671_v25  ;;  %v4254_v23 = vadd.f32 %v4238_v5, %v3875_v2  ;;  %v3467_v61 = vrot.slane %v3012_v21, 6  ;;  %v3015_v6 = vpop.f32.mrf.mxu3 }
 0x33a   : > { %v3826_v36 = vsel %vm3263_vm3, %v3823_v50, %v3825_v52  ;;  %v2702_v0 = vadd.f32 %v2701_v62, %v2519_v17  ;;  %2597 = vmatmul.f32.gmra.mxu0 %v7834_v9  ;;  %v3901_v62 = vmul.f32 3.0, %v3012_v21  ;;  %v3703_v12 = vrot.slane %v3669_v8, 6 }
 0x33b   : > { %v3876_v16 = vadd.f32 %v3826_v36, %v3421_v58  ;;  %v4223_v51 = vsub.f32 %v4142_v60, %v4207_v29  ;;  %v4271_v18 = vsel %vm733_vm0, %v4254_v23, 0.0  ;;  %v6835_v48 = vsub.f32 %v3012_v21, %v3467_v61  ;;  %v2707_v46 = vpop.f32.mrf.mxu1 }
 0x33c   : > { %v4272_v7 = vadd.f32 %v4271_v18, %v6777_v56  ;;  %v2877_v59 = vadd.f32 %v2876_v47, %v2702_v0  ;;  %v4069_v2 = vrot.slane %v3012_v21, 2  ;;  %v3969_v42 = vrot.slane %v3901_v62, 1 }
 0x33d   : > { %v4239_v25 = vand.u32 2147483647, %v4223_v51  ;;  %v3554_v5 = vmul.f32 3.0, %v6835_v48  ;;  %v3599_v50 = vadd.f32 %v6765_v55, %v6835_v48  ;;  %v3704_v41 = vrot.slane %v6838_v4, 6  ;;  %v6867_v4 = vld [vmem:[#allocation2 + $0x69] sm:$0xff] }
 0x33e   : > { %v6843_v22 = vadd.f32 %v3015_v6, %v2877_v59  ;;  %v4192_v6 = vsub.f32 %v4160_v13, %v6692_v43 }
 0x33f   : > { %v4255_v27 = vadd.f32 %v4239_v25, %v3876_v16  ;;  %v2523_v29 = vpop.f32.mrf.mxu0  ;;  %v2880_v35 = vpop.f32.mrf.mxu2  ;;  %v6846_v56 = vadd.f32 %v3554_v5, %v6753_v39  ;;  %v3751_v23 = vsub.f32 %v3599_v50, %v3703_v12  ;;  %v3705_v16 = vsel %vm3454_vm5, %v3703_v12, %v3704_v41 }
 0x340   : > { %v3902_v47 = vmul.f32 3.0, %v6843_v22  ;;  %v4070_v52 = vrot.slane %v6843_v22, 2  ;;  %v2524_v17 = vadd.f32 %v2523_v29, %v6334_v40  ;;  %v3468_v55 = vrot.slane %v6843_v22, 6 }
 0x341   : > { %v4273_v3 = vsel %vm733_vm0, %v4255_v27, 0.0  ;;  %v3019_v32 = vpop.f32.mrf.mxu3  ;;  %v3775_v43 = vand.u32 2147483647, %v3751_v23  ;;  %v4208_v25 = vmul.f32 3.0, %v4192_v6  ;;  %v7835_v6 = vsub.f32 %v6341_v24, %v6279_v10 }
 0x342   : > { %v6854_v11 = vadd.f32 %v4273_v3, %v4272_v7  ;;  %v3970_v58 = vrot.slane %v3902_v47, 1  ;;  %v4071_v39 = vsel %vm3263_vm3, %v4069_v2, %v4070_v52  ;;  %v2708_v60 = vadd.f32 %v2707_v46, %v2524_v17 }
 0x343   : > { %v3469_v36 = vsel %vm3454_vm5, %v3467_v61, %v3468_v55  ;;  %v2713_v51 = vpop.f32.mrf.mxu1  ;;  %v4193_v2 = vsub.f32 %v6867_v4, %v6711_v15  ;;  %v3827_v3 = vrot.slane %v3775_v43, 2  ;;  %v3639_v15 = vld [vmem:[#allocation2 + $0x60] sm:$0xff] }
 0x344   : > { %v3971_v40 = vsel %vm3142_vm4, %v3969_v42, %v3970_v58  ;;  %v2881_v8 = vadd.f32 %v2880_v35, %v2708_v60  ;;  %v6861_v0 = vsub.f32 %v6843_v22, %v3469_v36 }
 0x345   : > { %v4027_v9 = vadd.f32 %v3971_v40, %v3012_v21 }
 0x346   : > { %v3020_v18 = vadd.f32 %v3019_v32, %v2881_v8  ;;  %v3555_v7 = vmul.f32 3.0, %v6861_v0  ;;  %v3600_v59 = vadd.f32 %v6805_v14, %v6861_v0 }
 0x347   : > { %v6869_v61 = vadd.f32 %v4071_v39, %v4027_v9  ;;  %v2528_v5 = vpop.f32.mrf.mxu0  ;;  %v2884_v50 = vpop.f32.mrf.mxu2  ;;  %v3623_v39 = vld [vmem:[#allocation2 + $0x62] sm:$0xff] }
 0x348   : > { %v6871_v62 = vsub.f32 %v3020_v18, %v3468_v55  ;;  %v3752_v21 = vsub.f32 %v3600_v59, %v3705_v16  ;;  %v3903_v46 = vmul.f32 3.0, %v3020_v18  ;;  %v4072_v27 = vrot.slane %v3020_v18, 2  ;;  %v3640_v16 = vld [vmem:[#allocation2 + $0x68] sm:$0xff] }
 0x349   : > { %v4143_v12 = vsub.f32 %v6869_v61, %v6714_v38  ;;  %v2529_v14 = vadd.f32 %v2528_v5, %v6355_v34  ;;  %v3023_v29 = vpop.f32.mrf.mxu3  ;;  %v6879_v35 = vadd.f32 %v3555_v7, %v6785_v19  ;;  %v3655_v18 = vsub.f32 %v3623_v39, %v3639_v15 }
 0x34a   : > { %v3556_v47 = vmul.f32 3.0, %v6871_v62  ;;  %v3601_v13 = vadd.f32 %v6815_v63, %v6871_v62  ;;  %v3776_v17 = vand.u32 2147483647, %v3752_v21  ;;  %v3972_v55 = vrot.slane %v3903_v46, 1 }
 0x34b   : > { %v4224_v42 = vsub.f32 %v4143_v12, %v4208_v25  ;;  %v4073_v38 = vsel %vm3263_vm3, %v4070_v52, %v4072_v27  ;;  %v2714_v32 = vadd.f32 %v2713_v51, %v2529_v14  ;;  %v3422_v63 = vand.u32 2147483647, %v7835_v6  ;;  %v2719_v9 = vpop.f32.mrf.mxu1  ;;  %v3624_v52 = vld [vmem:[#allocation2 + $0x6a] sm:$0xff] }
 0x34c   : > { %v3753_v60 = vsub.f32 %v3601_v13, %v3704_v41  ;;  %v3828_v34 = vrot.slane %v3776_v17, 2  ;;  %v3973_v23 = vsel %vm3142_vm4, %v3970_v58, %v3972_v55  ;;  %v6887_v19 = vadd.f32 %v3556_v47, %v6797_v31 }
 0x34d   : > { %v4240_v36 = vand.u32 2147483647, %v4224_v42  ;;  %v4028_v40 = vadd.f32 %v3973_v23, %v6843_v22  ;;  %v2885_v8 = vadd.f32 %v2884_v50, %v2714_v32  ;;  %v4209_v31 = vmul.f32 3.0, %v4193_v2  ;;  %v7836_v22 = vld [vmem:[#allocation114_spill] sm:$0xff] }
 0x34e   : > { %v3777_v51 = vand.u32 2147483647, %v3753_v60  ;;  %v3829_v41 = vsel %vm3263_vm3, %v3827_v3, %v3828_v34  ;;  %v3656_v5 = vsub.f32 %v3624_v52, %v3640_v16  ;;  %v7837_v50 = vsub.f32 %v6362_v30, %v7836_v22 }
 0x34f   : > { %v3877_v7 = vadd.f32 %v3829_v41, %v3422_v63  ;;  %v6894_v58 = vadd.f32 %v4073_v38, %v4028_v40  ;;  %v3024_v59 = vadd.f32 %v3023_v29, %v2885_v8  ;;  %v2533_v43 = vpop.f32.mrf.mxu0  ;;  %v2888_v25 = vpop.f32.mrf.mxu2  ;;  %v3671_v2 = vmul.f32 3.0, %v3655_v18 }
 0x350   : > { %v3830_v10 = vrot.slane %v3777_v51, 2  ;;  %v2534_v24 = vadd.f32 %v2533_v43, %v6371_v53  ;;  %v3423_v21 = vand.u32 2147483647, %v7837_v50  ;;  %v6907_v42 = vmul.f32 3.0, %v3656_v5  ;;  %v6926_v43 = vld [vmem:[#allocation2 + $0x79] sm:$0xff]  ;;  %v6933_v50 = vld [vmem:[#allocation2 + $0x81] sm:$0xff] }
 0x351   : > { %v4144_v46 = vsub.f32 %v6894_v58, %v6742_v1  ;;  %v4256_v27 = vadd.f32 %v4240_v36, %v3877_v7  ;;  %v3470_v12 = vrot.slane %v3024_v59, 6  ;;  %v3027_v14 = vpop.f32.mrf.mxu3  ;;  %v3904_v39 = vmul.f32 3.0, %v3024_v59 }
 0x352   : > { %v3831_v47 = vsel %vm3263_vm3, %v3828_v34, %v3830_v10  ;;  %v2720_v29 = vadd.f32 %v2719_v9, %v2534_v24  ;;  %v3706_v23 = vrot.slane %v3671_v2, 6  ;;  %v4074_v6 = vrot.slane %v3024_v59, 2 }
 0x353   : > { %v3878_v13 = vadd.f32 %v3831_v47, %v3423_v21  ;;  %v4225_v17 = vsub.f32 %v4144_v46, %v4209_v31  ;;  %v4275_v55 = vsel %vm733_vm0, %v4256_v27, 0.0  ;;  %v6904_v53 = vsub.f32 %v3024_v59, %v3470_v12  ;;  %v2725_v15 = vpop.f32.mrf.mxu1 }
 0x354   : > { %v4276_v3 = vadd.f32 %v4275_v55, %v6854_v11  ;;  %v2889_v30 = vadd.f32 %v2888_v25, %v2720_v29  ;;  %v3974_v16 = vrot.slane %v3904_v39, 1  ;;  %v3707_v41 = vrot.slane %v6907_v42, 6  ;;  %v4178_v25 = vld [vmem:[#allocation2 + $0x49] sm:$0xff] }
 0x355   : > { %v4241_v38 = vand.u32 2147483647, %v4225_v17  ;;  %v3557_v1 = vmul.f32 3.0, %v6904_v53  ;;  %v3602_v32 = vadd.f32 %v6846_v56, %v6904_v53 }
 0x356   : > { %v6912_v60 = vadd.f32 %v3027_v14, %v2889_v30  ;;  %v3708_v21 = vsel %vm3454_vm5, %v3706_v23, %v3707_v41  ;;  %v4194_v14 = vsub.f32 %v6926_v43, %v4178_v25 }
 0x357   : > { %v4257_v34 = vadd.f32 %v4241_v38, %v3878_v13  ;;  %v2538_v63 = vpop.f32.mrf.mxu0  ;;  %v2892_v36 = vpop.f32.mrf.mxu2  ;;  %v6915_v11 = vadd.f32 %v3557_v1, %v6835_v48  ;;  %v3754_v10 = vsub.f32 %v3602_v32, %v3706_v23  ;;  %v4195_v13 = vsub.f32 %v6933_v50, %v6792_v44  ;;  %v3625_v1 = vld [vmem:[#allocation2 + $0x7a] sm:$0xff] }
 0x358   : > { %v3905_v40 = vmul.f32 3.0, %v6912_v60  ;;  %v4075_v8 = vrot.slane %v6912_v60, 2  ;;  %v2539_v9 = vadd.f32 %v2538_v63, %v6383_v28  ;;  %v3471_v56 = vrot.slane %v6912_v60, 6  ;;  %v3641_v32 = vld [vmem:[#allocation2 + $0x78] sm:$0xff] }
 0x359   : > { %v4277_v52 = vsel %vm733_vm0, %v4257_v34, 0.0  ;;  %v3031_v51 = vpop.f32.mrf.mxu3  ;;  %v3778_v29 = vand.u32 2147483647, %v3754_v10  ;;  %v4210_v34 = vmul.f32 3.0, %v4194_v14 }
 0x35a   : > { %v6923_v18 = vadd.f32 %v4277_v52, %v4276_v3  ;;  %v3975_v7 = vrot.slane %v3905_v40, 1  ;;  %v4076_v48 = vsel %vm3263_vm3, %v4074_v6, %v4075_v8  ;;  %v2726_v31 = vadd.f32 %v2725_v15, %v2539_v9 }
 0x35b   : > { %v3472_v28 = vsel %vm3454_vm5, %v3470_v12, %v3471_v56  ;;  %v2731_v46 = vpop.f32.mrf.mxu1  ;;  %v3832_v40 = vrot.slane %v3778_v29, 2 }
 0x35c   : > { %v3976_v24 = vsel %vm3142_vm4, %v3974_v16, %v3975_v7  ;;  %v2893_v5 = vadd.f32 %v2892_v36, %v2726_v31  ;;  %v6931_v22 = vsub.f32 %v6912_v60, %v3472_v28  ;;  %v7838_v31 = vsub.f32 %v6390_v49, %v6328_v20 }
 0x35d   : > { %v4029_v27 = vadd.f32 %v3976_v24, %v3024_v59 }
 0x35e   : > { %v3032_v47 = vadd.f32 %v3031_v51, %v2893_v5  ;;  %v3558_v2 = vmul.f32 3.0, %v6931_v22  ;;  %v3603_v12 = vadd.f32 %v6879_v35, %v6931_v22  ;;  %v4211_v5 = vmul.f32 3.0, %v4195_v13 }
 0x35f   : > { %v2543_v17 = vpop.f32.mrf.mxu0  ;;  %v2896_v55 = vpop.f32.mrf.mxu2  ;;  %v6942_v3 = vadd.f32 %v4076_v48, %v4029_v27  ;;  %v3642_v48 = vld [vmem:[#allocation2 + $0x80] sm:$0xff] }
 0x360   : > { %v6944_v30 = vsub.f32 %v3032_v47, %v3471_v56  ;;  %v3755_v42 = vsub.f32 %v3603_v12, %v3708_v21  ;;  %v3906_v59 = vmul.f32 3.0, %v3032_v47  ;;  %v4077_v38 = vrot.slane %v3032_v47, 2 }
 0x361   : > { %v2544_v39 = vadd.f32 %v2543_v17, %v6404_v57  ;;  %v3035_v15 = vpop.f32.mrf.mxu3  ;;  %v6948_v35 = vadd.f32 %v3558_v2, %v6861_v0  ;;  %v4145_v44 = vsub.f32 %v6942_v3, %v6795_v54  ;;  %v3657_v57 = vsub.f32 %v3625_v1, %v3641_v32  ;;  %v3626_v54 = vld [vmem:[#allocation2 + $0x82] sm:$0xff] }
 0x362   : > { %v3559_v23 = vmul.f32 3.0, %v6944_v30  ;;  %v3604_v6 = vadd.f32 %v6887_v19, %v6944_v30  ;;  %v3779_v63 = vand.u32 2147483647, %v3755_v42  ;;  %v3977_v36 = vrot.slane %v3906_v59, 1 }
 0x363   : > { %v4078_v9 = vsel %vm3263_vm3, %v4075_v8, %v4077_v38  ;;  %v2732_v56 = vadd.f32 %v2731_v46, %v2544_v39  ;;  %v3424_v19 = vand.u32 2147483647, %v7838_v31  ;;  %v2737_v28 = vpop.f32.mrf.mxu1  ;;  %v4226_v8 = vsub.f32 %v4145_v44, %v4210_v34 }
 0x364   : > { %v3756_v52 = vsub.f32 %v3604_v6, %v3707_v41  ;;  %v3833_v16 = vrot.slane %v3779_v63, 2  ;;  %v3978_v0 = vsel %vm3142_vm4, %v3975_v7, %v3977_v36  ;;  %v6958_v51 = vadd.f32 %v3559_v23, %v6871_v62 }
 0x365   : > { %v4030_v25 = vadd.f32 %v3978_v0, %v6912_v60  ;;  %v2897_v10 = vadd.f32 %v2896_v55, %v2732_v56  ;;  %v3658_v27 = vsub.f32 %v3626_v54, %v3642_v48  ;;  %v3673_v2 = vmul.f32 3.0, %v3657_v57  ;;  %v7839_v60 = vld [vmem:[#allocation131_spill] sm:$0xff] }
 0x366   : > { %v3780_v24 = vand.u32 2147483647, %v3756_v52  ;;  %v3834_v41 = vsel %vm3263_vm3, %v3832_v40, %v3833_v16  ;;  %v4242_v49 = vand.u32 2147483647, %v4226_v8  ;;  %v7840_v12 = vsub.f32 %v6411_v45, %v7839_v60  ;;  %v3627_v48 = vld [vmem:[#allocation2 + $0x92] sm:$0xff]  ;;  %v4180_v8 = vld [vmem:[#allocation2 + $0x61] sm:$0xff] }
 0x367   : > { %v6965_v21 = vadd.f32 %v4078_v9, %v4030_v25  ;;  %v3036_v7 = vadd.f32 %v3035_v15, %v2897_v10  ;;  %v2548_v62 = vpop.f32.mrf.mxu0  ;;  %v2900_v46 = vpop.f32.mrf.mxu2  ;;  %v3879_v14 = vadd.f32 %v3834_v41, %v3424_v19  ;;  %v3709_v15 = vrot.slane %v3673_v2, 6  ;;  %v3643_v10 = vld [vmem:[#allocation2 + $0x90] sm:$0xff] }
 0x368   : > { %v3835_v47 = vrot.slane %v3780_v24, 2  ;;  %v2549_v20 = vadd.f32 %v2548_v62, %v6420_v33  ;;  %v3425_v29 = vand.u32 2147483647, %v7840_v12  ;;  %v6978_v33 = vmul.f32 3.0, %v3658_v27  ;;  %v3628_v62 = vld [vmem:[#allocation2 + $0x9a] sm:$0xff] }
 0x369   : > { %v4146_v17 = vsub.f32 %v6965_v21, %v6823_v26  ;;  %v3473_v13 = vrot.slane %v3036_v7, 6  ;;  %v3039_v55 = vpop.f32.mrf.mxu3  ;;  %v6974_v38 = vadd.f32 %v4242_v49, %v3879_v14  ;;  %v3907_v23 = vmul.f32 3.0, %v3036_v7 }
 0x36a   : > { %v3836_v42 = vsel %vm3263_vm3, %v3833_v16, %v3835_v47  ;;  %v2738_v59 = vadd.f32 %v2737_v28, %v2549_v20  ;;  %v4079_v40 = vrot.slane %v3036_v7, 2  ;;  %v3710_v57 = vrot.slane %v6978_v33, 6  ;;  %v6995_v28 = vld [vmem:[#allocation2 + $0x91] sm:$0xff] }
 0x36b   : > { %v3880_v1 = vadd.f32 %v3836_v42, %v3425_v29  ;;  %v4227_v32 = vsub.f32 %v4146_v17, %v4211_v5  ;;  %v6976_v39 = vsub.f32 %v3036_v7, %v3473_v13  ;;  %v2743_v6 = vpop.f32.mrf.mxu1  ;;  %v3979_v19 = vrot.slane %v3907_v23, 1 }
 0x36c   : > { %v2901_v44 = vadd.f32 %v2900_v46, %v2738_v59  ;;  %v3644_v46 = vld [vmem:[#allocation2 + $0x98] sm:$0xff]  ;;  %v4196_v27 = vsub.f32 %v6995_v28, %v4180_v8  ;;  %v3711_v2 = vsel %vm3454_vm5, %v3709_v15, %v3710_v57  ;;  %v3659_v20 = vsub.f32 %v3627_v48, %v3643_v10 }
 0x36d   : > { %v4243_v45 = vand.u32 2147483647, %v4227_v32  ;;  %v3560_v34 = vmul.f32 3.0, %v6976_v39  ;;  %v3605_v26 = vadd.f32 %v6915_v11, %v6976_v39  ;;  %v3660_v29 = vsub.f32 %v3628_v62, %v3644_v46  ;;  %v7845_v32 = vld [vmem:[#allocation129_spill] sm:$0xff] }
 0x36e   : > { %v6983_v63 = vadd.f32 %v3039_v55, %v2901_v44  ;;  %v7842_v55 = vld [vmem:[#allocation124_spill] sm:$0xff]  ;;  %v7024_v10 = vmul.f32 3.0, %v3659_v20 }
 0x36f   : > { %v6985_v36 = vadd.f32 %v4243_v45, %v3880_v1  ;;  %v2553_v9 = vpop.f32.mrf.mxu0  ;;  %v2904_v56 = vpop.f32.mrf.mxu2  ;;  %v6989_v52 = vadd.f32 %v3560_v34, %v6904_v53  ;;  %v3757_v31 = vsub.f32 %v3605_v26, %v3709_v15  ;;  %v7844_v1 = vld [vmem:[#allocation41_spill] sm:$0xff] }
 0x370   : > { %v3908_v16 = vmul.f32 3.0, %v6983_v63  ;;  %v4080_v0 = vrot.slane %v6983_v63, 2  ;;  %v2554_v11 = vadd.f32 %v2553_v9, %v6432_v37  ;;  %v3474_v54 = vrot.slane %v6983_v63, 6 }
 0x371   : > { %v3043_v25 = vpop.f32.mrf.mxu3  ;;  %v7846_v33 = vsub.f32 %v7844_v1, %v7845_v32  ;;  %v3781_v45 = vand.u32 2147483647, %v3757_v31  ;;  %v7026_v31 = vmul.f32 3.0, %v3660_v29  ;;  %v4281_v32 = vsel %vm733_vm0, %v6985_v36, 0.0 }
 0x372   : > { %v3980_v24 = vrot.slane %v3908_v16, 1  ;;  %v4081_v53 = vsel %vm3263_vm3, %v4079_v40, %v4080_v0  ;;  %v2744_v41 = vadd.f32 %v2743_v6, %v2554_v11  ;;  %v3475_v5 = vsel %vm3454_vm5, %v3473_v13, %v3474_v54  ;;  %v7841_v13 = vld [vmem:[#allocation32_spill] sm:$0xff] }
 0x373   : > { %v7000_v37 = vsub.f32 %v6983_v63, %v3475_v5  ;;  %v2749_v12 = vpop.f32.mrf.mxu1  ;;  %v7843_v42 = vsub.f32 %v7841_v13, %v7842_v55  ;;  %v7014_v44 = vand.u32 2147483647, %v7846_v33  ;;  %v7847_v16 = vld [vmem:[#allocation36_spill] sm:$0xff]  ;;  %v3645_v5 = vld [vmem:[#allocation2 + $0xa8] sm:$0xff]  ;;  %v3837_v62 = vrot.slane %v3781_v45, 2  ;;  %v7044_v13 = vld [vmem:[#allocation2 + $0xb1] sm:$0xff] }
 0x374   : > { %v3981_v14 = vsel %vm3142_vm4, %v3979_v19, %v3980_v24  ;;  %v2905_v47 = vadd.f32 %v2904_v56, %v2744_v41  ;;  %v3629_v41 = vld [vmem:[#allocation2 + $0xaa] sm:$0xff]  ;;  %v7848_v45 = vld [vmem:[#allocation39_spill] sm:$0xff] }
 0x375   : > { %v3561_v49 = vmul.f32 3.0, %v7000_v37  ;;  %v3606_v60 = vadd.f32 %v6948_v35, %v7000_v37  ;;  %v4031_v17 = vadd.f32 %v3981_v14, %v3036_v7  ;;  %v3426_v59 = vand.u32 2147483647, %v7843_v42 }
 0x376   : > { %v3044_v15 = vadd.f32 %v3043_v25, %v2905_v47  ;;  %v4212_v7 = vmul.f32 3.0, %v4196_v27  ;;  %v4279_v14 = vsel %vm733_vm0, %v6974_v38, 0.0  ;;  %v3661_v29 = vsub.f32 %v3629_v41, %v3645_v5 }
 0x377   : > { %v3758_v34 = vsub.f32 %v3606_v60, %v3711_v2  ;;  %v2558_v26 = vpop.f32.mrf.mxu0  ;;  %v2908_v23 = vpop.f32.mrf.mxu2  ;;  %v7017_v6 = vadd.f32 %v3561_v49, %v6931_v22  ;;  %v7019_v35 = vadd.f32 %v4081_v53, %v4031_v17 }
 0x378   : > { %v7021_v40 = vsub.f32 %v3044_v15, %v3474_v54  ;;  %v3909_v9 = vmul.f32 3.0, %v3044_v15  ;;  %v4082_v56 = vrot.slane %v3044_v15, 2  ;;  %v2559_v11 = vadd.f32 %v2558_v26, %v7847_v16  ;;  %v3630_v16 = vld [vmem:[#allocation2 + $0xb2] sm:$0xff] }
 0x379   : > { %v3782_v48 = vand.u32 2147483647, %v3758_v34  ;;  %v3047_v19 = vpop.f32.mrf.mxu3  ;;  %v4147_v25 = vsub.f32 %v7019_v35, %v6869_v61  ;;  %v7037_v61 = vld [vmem:[#allocation2 + $0x99] sm:$0xff] }
 0x37a   : > { %v3562_v22 = vmul.f32 3.0, %v7021_v40  ;;  %v3607_v8 = vadd.f32 %v6958_v51, %v7021_v40  ;;  %v3982_v54 = vrot.slane %v3909_v9, 1  ;;  %v4083_v53 = vsel %vm3263_vm3, %v4080_v0, %v4082_v56 }
 0x37b   : > { %v3838_v46 = vrot.slane %v3782_v48, 2  ;;  %v2750_v27 = vadd.f32 %v2749_v12, %v2559_v11  ;;  %v4228_v51 = vsub.f32 %v4147_v25, %v4212_v7  ;;  %v2755_v60 = vpop.f32.mrf.mxu1  ;;  %v4199_v7 = vsub.f32 %v7044_v13, %v6933_v50  ;;  %v3646_v11 = vld [vmem:[#allocation2 + $0xb0] sm:$0xff] }
 0x37c   : > { %v3759_v47 = vsub.f32 %v3607_v8, %v3710_v57  ;;  %v3983_v2 = vsel %vm3142_vm4, %v3980_v24, %v3982_v54  ;;  %v7040_v20 = vadd.f32 %v3562_v22, %v6944_v30  ;;  %v4280_v24 = vadd.f32 %v4279_v14, %v6923_v18  ;;  %v7850_v22 = vld [vmem:[#allocation33_spill] sm:$0xff]  ;;  %v7852_v54 = vld [vmem:[#allocation47_spill] sm:$0xff] }
 0x37d   : > { %v4032_v49 = vadd.f32 %v3983_v2, %v6983_v63  ;;  %v2909_v0 = vadd.f32 %v2908_v23, %v2750_v27  ;;  %v3839_v17 = vsel %vm3263_vm3, %v3837_v62, %v3838_v46  ;;  %v4244_v57 = vand.u32 2147483647, %v4228_v51  ;;  %v7856_v27 = vld [vmem:[#allocation43_spill] sm:$0xff] }
 0x37e   : > { %v3783_v12 = vand.u32 2147483647, %v3759_v47  ;;  %v3881_v38 = vadd.f32 %v3839_v17, %v3426_v59  ;;  %v4197_v30 = vsub.f32 %v7037_v61, %v6867_v4  ;;  %v3713_v59 = vrot.slane %v7026_v31, 6 }
 0x37f   : > { %v7047_v55 = vadd.f32 %v4083_v53, %v4032_v49  ;;  %v7051_v42 = vadd.f32 %v3047_v19, %v2909_v0  ;;  %v2563_v63 = vpop.f32.mrf.mxu0  ;;  %v2912_v1 = vpop.f32.mrf.mxu2  ;;  %v7057_v34 = vadd.f32 %v4281_v32, %v4280_v24  ;;  %v3712_v4 = vrot.slane %v7024_v10, 6  ;;  %v7849_v10 = vld [vmem:[#allocation46_spill] sm:$0xff]  ;;  %v7859_v32 = vld [vmem:[#allocation35_spill] sm:$0xff] }
 0x380   : > { %v3840_v33 = vrot.slane %v3783_v12, 2  ;;  %v2564_v15 = vadd.f32 %v2563_v63, %v7848_v45  ;;  %v7066_v56 = vmul.f32 3.0, %v3661_v29  ;;  %v7068_v48 = vadd.f32 %v4244_v57, %v3881_v38  ;;  %v7853_v53 = vld [vmem:[#allocation38_spill] sm:$0xff] }
 0x381   : > { %v4148_v18 = vsub.f32 %v7047_v55, %v6894_v58  ;;  %v3476_v26 = vrot.slane %v7051_v42, 6  ;;  %v3051_v23 = vpop.f32.mrf.mxu3  ;;  %v4213_v58 = vmul.f32 3.0, %v4197_v30  ;;  %v7851_v8 = vsub.f32 %v7849_v10, %v7850_v22 }
 0x382   : > { %v3841_v36 = vsel %vm3263_vm3, %v3838_v46, %v3840_v33  ;;  %v2756_v9 = vadd.f32 %v2755_v60, %v2564_v15  ;;  %v7854_v41 = vsub.f32 %v7852_v54, %v7853_v53  ;;  %v7855_v46 = vld [vmem:[#allocation52_spill] sm:$0xff]  ;;  %v3910_v49 = vmul.f32 3.0, %v7051_v42 }
 0x383   : > { %v7071_v19 = vadd.f32 %v3841_v36, %v7014_v44  ;;  %v7074_v25 = vsub.f32 %v7051_v42, %v3476_v26  ;;  %v7079_v50 = vand.u32 2147483647, %v7851_v8  ;;  %v7089_v44 = vsel %vm3454_vm5, %v3712_v4, %v3713_v59  ;;  %v2761_v0 = vpop.f32.mrf.mxu1 }
 0x384   : > { %v7084_v5 = vand.u32 2147483647, %v7854_v41  ;;  %v2913_v62 = vadd.f32 %v2912_v1, %v2756_v9  ;;  %v7857_v14 = vsub.f32 %v7855_v46, %v7856_v27  ;;  %v3662_v60 = vsub.f32 %v3630_v16, %v3646_v11 }
 0x385   : > { %v3563_v2 = vmul.f32 3.0, %v7074_v25  ;;  %v3608_v51 = vadd.f32 %v6989_v52, %v7074_v25  ;;  %v4084_v29 = vrot.slane %v7051_v42, 2  ;;  %v7103_v12 = vmul.f32 3.0, %v4199_v7  ;;  %v7858_v52 = vld [vmem:[#allocation34_spill] sm:$0xff] }
 0x386   : > { %v7094_v47 = vand.u32 2147483647, %v7857_v14  ;;  %v7101_v17 = vadd.f32 %v3051_v23, %v2913_v62  ;;  %v3715_v38 = vrot.slane %v7066_v56, 6  ;;  %v7106_v57 = vsub.f32 %v4148_v18, %v4213_v58  ;;  %v7860_v23 = vld [vmem:[#allocation42_spill] sm:$0xff]  ;;  %v7862_v62 = vld [vmem:[#allocation40_spill] sm:$0xff] }
 0x387   : > { %v2568_v24 = vpop.f32.mrf.mxu0  ;;  %v2916_v30 = vpop.f32.mrf.mxu2  ;;  %v7109_v63 = vadd.f32 %v3563_v2, %v6976_v39  ;;  %v717_v1 = vmul.f32 %v7858_v52, %v7858_v52  ;;  %v718_v33 = vmul.f32 %v7859_v32, %v7859_v32  ;;  %v3984_v36 = vrot.slane %v3910_v49, 1  ;;  %v7861_v39 = vld [vmem:[#allocation37_spill] sm:$0xff] }
 0x388   : > { %v3911_v45 = vmul.f32 3.0, %v7101_v17  ;;  %v4085_v15 = vrot.slane %v7101_v17, 2  ;;  %v2569_v7 = vadd.f32 %v2568_v24, %v7860_v23  ;;  %v3477_v18 = vrot.slane %v7101_v17, 6 }
 0x389   : > { %v3055_v9 = vpop.f32.mrf.mxu3  ;;  %v7119_v16 = vmul.f32 3.0, %v3662_v60  ;;  %v719_v11 = vmul.f32 %v7861_v39, %v7861_v39  ;;  %v734_v58 = vsel %vm733_vm0, %v717_v1, 0.0  ;;  %v735_v54 = vsel %vm733_vm0, %v718_v33, 0.0 }
 0x38a   : > { %v3985_v10 = vrot.slane %v3911_v45, 1  ;;  %v2762_v22 = vadd.f32 %v2761_v0, %v2569_v7  ;;  %v3478_v8 = vsel %vm3454_vm5, %v3476_v26, %v3477_v18  ;;  %v3760_v53 = vsub.f32 %v3608_v51, %v3712_v4  ;;  %v7863_v0 = vld [vmem:[#allocation45_spill] sm:$0xff] }
 0x38b   : > { %v7127_v41 = vsub.f32 %v7101_v17, %v3478_v8  ;;  %v720_v46 = vmul.f32 %v7862_v62, %v7862_v62  ;;  %v736_v27 = vadd.f32 %v735_v54, %v734_v58  ;;  %v737_v2 = vsel %vm733_vm0, %v719_v11, 0.0  ;;  %v7866_v62 = vld [vmem:[#allocation53_spill] sm:$0xff] }
 0x38c   : > { %v2917_v14 = vadd.f32 %v2916_v30, %v2762_v22  ;;  %v3986_v49 = vsel %vm3142_vm4, %v3984_v36, %v3985_v10  ;;  %v7134_v60 = vsel %vm3263_vm3, %v4084_v29, %v4085_v15  ;;  %v2767_v51 = vpop.f32.mrf.mxu1  ;;  %v721_v24 = vmul.f32 %v7863_v0, %v7863_v0  ;;  %v7865_v22 = vld [vmem:[#allocation49_spill] sm:$0xff] }
 0x38d   : > { %v3564_v26 = vmul.f32 3.0, %v7127_v41  ;;  %v3609_v4 = vadd.f32 %v7017_v6, %v7127_v41  ;;  %v738_v52 = vadd.f32 %v737_v2, %v736_v27  ;;  %v7544_v30 = vrot.slane %v7119_v16, 6  ;;  %v7864_v6 = vld [vmem:[#allocation48_spill] sm:$0xff] }
 0x38e   : > { %v3056_v1 = vadd.f32 %v3055_v9, %v2917_v14  ;;  %v739_v32 = vsel %vm733_vm0, %v720_v46, 0.0  ;;  %v7144_v33 = vadd.f32 %v3986_v49, %v7051_v42  ;;  %v3784_v29 = vand.u32 2147483647, %v3760_v53  ;;  %v3631_v27 = vld [vmem:[#allocation2 + $0xc2] sm:$0xff] }
 0x38f   : > { %v2573_v45 = vpop.f32.mrf.mxu0  ;;  %v2920_v23 = vpop.f32.mrf.mxu2  ;;  %v7147_v7 = vadd.f32 %v3564_v26, %v7000_v37  ;;  %v722_v36 = vmul.f32 %v7864_v6, %v7864_v6  ;;  %v740_v39 = vadd.f32 %v739_v32, %v738_v52  ;;  %v3761_v54 = vsub.f32 %v3609_v4, %v7089_v44  ;;  %v3647_v14 = vld [vmem:[#allocation2 + $0xc0] sm:$0xff] }
 0x390   : > { %v7151_v11 = vsub.f32 %v3056_v1, %v3477_v18  ;;  %v3912_v9 = vmul.f32 3.0, %v3056_v1  ;;  %v4087_v58 = vrot.slane %v3056_v1, 2  ;;  %v2574_v8 = vadd.f32 %v2573_v45, %v7865_v22  ;;  %v7867_v44 = vld [vmem:[#allocation56_spill] sm:$0xff] }
 0x391   : > { %v3059_v42 = vpop.f32.mrf.mxu3  ;;  %v723_v53 = vmul.f32 %v7866_v62, %v7866_v62  ;;  %v741_v46 = vsel %vm733_vm0, %v721_v24, 0.0  ;;  %v743_v37 = vsel %vm733_vm0, %v722_v36, 0.0  ;;  %v724_v4 = vmul.f32 %v7867_v44, %v7867_v44 }
 0x392   : > { %v3565_v2 = vmul.f32 3.0, %v7151_v11  ;;  %v3610_v18 = vadd.f32 %v7040_v20, %v7151_v11  ;;  %v3987_v49 = vrot.slane %v3912_v9, 1  ;;  %v4088_v26 = vsel %vm3263_vm3, %v4085_v15, %v4087_v58 }
 0x393   : > { %v2768_v0 = vadd.f32 %v2767_v51, %v2574_v8  ;;  %v742_v52 = vadd.f32 %v741_v46, %v740_v39  ;;  %v745_v1 = vsel %vm733_vm0, %v723_v53, 0.0  ;;  %v3663_v6 = vsub.f32 %v3631_v27, %v3647_v14  ;;  %v7868_v51 = vld [vmem:[#allocation61_spill] sm:$0xff]  ;;  %v7869_v53 = vld [vmem:[#allocation51_spill] sm:$0xff]  ;;  %v7870_v46 = vld [vmem:[#allocation64_spill] sm:$0xff] }
 0x394   : > { %v3762_v24 = vsub.f32 %v3610_v18, %v3713_v59  ;;  %v3988_v32 = vsel %vm3142_vm4, %v3985_v10, %v3987_v49  ;;  %v7170_v45 = vadd.f32 %v3565_v2, %v7021_v40  ;;  %v2773_v15 = vpop.f32.mrf.mxu1  ;;  %v725_v9 = vmul.f32 %v7868_v51, %v7868_v51  ;;  %v7175_v39 = vld [vmem:[#allocation2 + $0xa9] sm:$0xff] }
 0x395   : > { %v4034_v20 = vadd.f32 %v3988_v32, %v7101_v17  ;;  %v2921_v36 = vadd.f32 %v2920_v23, %v2768_v0  ;;  %v744_v58 = vadd.f32 %v743_v37, %v742_v52  ;;  %v7177_v22 = vrot.slane %v3784_v29, 2  ;;  %v3648_v0 = vld [vmem:[#allocation2 + $0xc8] sm:$0xff]  ;;  %v7877_v14 = vld [vmem:[#allocation94_spill] sm:$0xff] }
 0x396   : > { %v7179_v31 = vand.u32 2147483647, %v3761_v54  ;;  %v3786_v59 = vand.u32 2147483647, %v3762_v24  ;;  %v7186_v40 = vsel %vm3454_vm5, %v3715_v38, %v7544_v30  ;;  %v747_v29 = vsel %vm733_vm0, %v724_v4, 0.0 }
 0x397   : > { %v7188_v17 = vadd.f32 %v4088_v26, %v4034_v20  ;;  %v7190_v10 = vadd.f32 %v3059_v42, %v2921_v36  ;;  %v2578_v23 = vpop.f32.mrf.mxu0  ;;  %v2924_v8 = vpop.f32.mrf.mxu2  ;;  %v746_v62 = vadd.f32 %v745_v1, %v744_v58  ;;  %v726_v37 = vmul.f32 %v7870_v46, %v7870_v46  ;;  %v3632_v26 = vld [vmem:[#allocation2 + $0xca] sm:$0xff]  ;;  %v7872_v36 = vld [vmem:[#allocation72_spill] sm:$0xff] }
 0x398   : > { %v2579_v54 = vadd.f32 %v2578_v23, %v7869_v53  ;;  %v7196_v27 = vmul.f32 3.0, %v3663_v6  ;;  %v749_v44 = vsel %vm733_vm0, %v725_v9, 0.0  ;;  %v3664_v52 = vsub.f32 %v3632_v26, %v3648_v0  ;;  %v7871_v1 = vld [vmem:[#allocation69_spill] sm:$0xff] }
 0x399   : > { %v3479_v42 = vrot.slane %v7190_v10, 6  ;;  %v3913_v18 = vmul.f32 3.0, %v7190_v10  ;;  %v3063_v49 = vpop.f32.mrf.mxu3  ;;  %v727_v24 = vmul.f32 %v7871_v1, %v7871_v1  ;;  %v748_v32 = vadd.f32 %v747_v29, %v746_v62  ;;  %v7873_v62 = vld [vmem:[#allocation79_spill] sm:$0xff] }
 0x39a   : > { %v2774_v4 = vadd.f32 %v2773_v15, %v2579_v54  ;;  %v3845_v6 = vrot.slane %v3786_v59, 2  ;;  %v728_v51 = vmul.f32 %v7872_v36, %v7872_v36  ;;  %v3843_v58 = vrot.slane %v7179_v31, 2 }
 0x39b   : > { %v3539_v20 = vsub.f32 %v7190_v10, %v3479_v42  ;;  %v4089_v23 = vrot.slane %v7190_v10, 2  ;;  %v750_v46 = vadd.f32 %v749_v44, %v748_v32  ;;  %v751_v9 = vsel %vm733_vm0, %v726_v37, 0.0 }
 0x39c   : > { %v2925_v53 = vadd.f32 %v2924_v8, %v2774_v4  ;;  %v3989_v26 = vrot.slane %v3913_v18, 1  ;;  %v2779_v0 = vpop.f32.mrf.mxu1  ;;  %v729_v59 = vmul.f32 %v7873_v62, %v7873_v62  ;;  %v7218_v1 = vmul.f32 3.0, %v3664_v52 }
 0x39d   : > { %v3566_v15 = vmul.f32 3.0, %v3539_v20  ;;  %v3611_v54 = vadd.f32 %v7109_v63, %v3539_v20  ;;  %v752_v36 = vadd.f32 %v751_v9, %v750_v46  ;;  %v753_v31 = vsel %vm733_vm0, %v727_v24, 0.0  ;;  %v7874_v63 = vld [vmem:[#allocation83_spill] sm:$0xff]  ;;  %v7875_v20 = vld [vmem:[#allocation54_spill] sm:$0xff] }
 0x39e   : > { %v7216_v29 = vadd.f32 %v3063_v49, %v2925_v53  ;;  %v730_v18 = vmul.f32 %v7874_v63, %v7874_v63  ;;  %v755_v32 = vsel %vm733_vm0, %v728_v51, 0.0  ;;  %v7876_v46 = vld [vmem:[#allocation90_spill] sm:$0xff] }
 0x39f   : > { %v3763_v8 = vsub.f32 %v3611_v54, %v3715_v38  ;;  %v2583_v44 = vpop.f32.mrf.mxu0  ;;  %v2928_v37 = vpop.f32.mrf.mxu2  ;;  %v7224_v4 = vadd.f32 %v3566_v15, %v7074_v25  ;;  %v731_v9 = vmul.f32 %v7876_v46, %v7876_v46  ;;  %v754_v25 = vadd.f32 %v753_v31, %v752_v36 }
 0x3a0   : > { %v3914_v49 = vmul.f32 3.0, %v7216_v29  ;;  %v4090_v52 = vrot.slane %v7216_v29, 2  ;;  %v2584_v53 = vadd.f32 %v2583_v44, %v7875_v20  ;;  %v3480_v24 = vrot.slane %v7216_v29, 6 }
 0x3a1   : > { %v3787_v56 = vand.u32 2147483647, %v3763_v8  ;;  %v3067_v38 = vpop.f32.mrf.mxu3  ;;  %v757_v15 = vsel %vm733_vm0, %v729_v59, 0.0  ;;  %v732_v44 = vmul.f32 %v7877_v14, %v7877_v14  ;;  %v756_v20 = vadd.f32 %v755_v32, %v754_v25 }
 0x3a2   : > { %v3990_v54 = vrot.slane %v3914_v49, 1  ;;  %v4091_v62 = vsel %vm3263_vm3, %v4089_v23, %v4090_v52  ;;  %v2780_v51 = vadd.f32 %v2779_v0, %v2584_v53  ;;  %v3481_v63 = vsel %vm3454_vm5, %v3479_v42, %v3480_v24 }
 0x3a3   : > { %v3540_v2 = vsub.f32 %v7216_v29, %v3481_v63  ;;  %v759_v8 = vsel %vm733_vm0, %v730_v18, 0.0  ;;  %v761_v36 = vsel %vm733_vm0, %v731_v9, 0.0  ;;  %v3844_v59 = vsel %vm3263_vm3, %v7177_v22, %v3843_v58 }
 0x3a4   : > { %v3991_v30 = vsel %vm3142_vm4, %v3989_v26, %v3990_v54  ;;  %v2929_v46 = vadd.f32 %v2928_v37, %v2780_v51  ;;  %v2785_v42 = vpop.f32.mrf.mxu1  ;;  %v758_v31 = vadd.f32 %v757_v15, %v756_v20  ;;  %v763_v49 = vsel %vm733_vm0, %v732_v44, 0.0  ;;  %v7878_v51 = vld [vmem:[#allocation55_spill] sm:$0xff] }
 0x3a5   : > { %v3567_v23 = vmul.f32 3.0, %v3540_v2  ;;  %v3612_v0 = vadd.f32 %v7147_v7, %v3540_v2  ;;  %v3846_v14 = vsel %vm3263_vm3, %v3843_v58, %v3845_v6  ;;  %v3847_v32 = vrot.slane %v3787_v56, 2 }
 0x3a6   : > { %v3068_v53 = vadd.f32 %v3067_v38, %v2929_v46  ;;  %v7250_v18 = vadd.f32 %v3844_v59, %v7079_v50  ;;  %v760_v25 = vadd.f32 %v759_v8, %v758_v31  ;;  %v7257_v7 = vadd.f32 %v3846_v14, %v7084_v5 }
 0x3a7   : > { %v3764_v26 = vsub.f32 %v3612_v0, %v7186_v40  ;;  %v2588_v37 = vpop.f32.mrf.mxu0  ;;  %v2932_v9 = vpop.f32.mrf.mxu2  ;;  %v7254_v22 = vadd.f32 %v3567_v23, %v7127_v41  ;;  %v4035_v63 = vadd.f32 %v3991_v30, %v7190_v10  ;;  %v7263_v40 = vadd.f32 %v7134_v60, %v7144_v33  ;;  %v4168_v23 = vld [vmem:[#allocation2 + $0xc1] sm:$0xff]  ;;  %v4169_v0 = vld [vmem:[#allocation2 + $0xc9] sm:$0xff] }
 0x3a8   : > { %v3541_v2 = vsub.f32 %v3068_v53, %v3480_v24  ;;  %v3915_v15 = vmul.f32 3.0, %v3068_v53  ;;  %v4092_v38 = vrot.slane %v3068_v53, 2  ;;  %v2589_v6 = vadd.f32 %v2588_v37, %v7878_v51  ;;  %v7880_v37 = vld [vmem:[#allocation59_spill] sm:$0xff] }
 0x3a9   : > { %v3071_v58 = vpop.f32.mrf.mxu3  ;;  %v762_v56 = vadd.f32 %v761_v36, %v760_v25  ;;  %v3788_v50 = vand.u32 2147483647, %v3764_v26  ;;  %v4135_v59 = vadd.f32 %v4091_v62, %v4035_v63  ;;  %v7879_v36 = vrot.slane %v7119_v16, 6 }
 0x3aa   : > { %v3568_v41 = vmul.f32 3.0, %v3541_v2  ;;  %v3613_v44 = vadd.f32 %v7170_v45, %v3541_v2  ;;  %v3992_v20 = vrot.slane %v3915_v15, 1  ;;  %v4093_v5 = vsel %vm3263_vm3, %v4090_v52, %v4092_v38  ;;  %v4170_v38 = vld [vmem:[#allocation2 + $0xd9] sm:$0xff] }
 0x3ab   : > { %v2786_v24 = vadd.f32 %v2785_v42, %v2589_v6  ;;  %v764_v8 = vadd.f32 %v763_v49, %v762_v56  ;;  %v3848_v46 = vrot.slane %v3788_v50, 2  ;;  %v4149_v33 = vsub.f32 %v7263_v40, %v6942_v3 }
 0x3ac   : > { %v3765_v31 = vsub.f32 %v3613_v44, %v7879_v36  ;;  %v3993_v30 = vsel %vm3142_vm4, %v3990_v54, %v3992_v20  ;;  %v7271_v60 = vadd.f32 %v3568_v41, %v7151_v11  ;;  %v2791_v52 = vpop.f32.mrf.mxu1  ;;  %v4151_v42 = vsub.f32 %v4135_v59, %v7019_v35  ;;  %v7883_v35 = vld [vmem:[#allocation58_spill] sm:$0xff] }
 0x3ad   : > { %v4036_v45 = vadd.f32 %v3993_v30, %v7216_v29  ;;  %v2933_v10 = vadd.f32 %v2932_v9, %v2786_v24  ;;  %765 = vadd.xlane.f32.xlu0 %v764_v8  ;;  %v3849_v62 = vsel %vm3263_vm3, %v3847_v32, %v3848_v46  ;;  %v4200_v54 = vsub.f32 %v4168_v23, %v6995_v28  ;;  %v7881_v9 = vld [vmem:[#allocation44_spill] sm:$0xff] }
 0x3ae   : > { %v3789_v49 = vand.u32 2147483647, %v3765_v31  ;;  %v3885_v16 = vadd.f32 %v3849_v62, %v7094_v47  ;;  %v4201_v11 = vsub.f32 %v4169_v0, %v7037_v61  ;;  %v4245_v53 = vand.u32 2147483647, %v7106_v57 }
 0x3af   : > { %v4136_v14 = vadd.f32 %v4093_v5, %v4036_v45  ;;  %v7282_v3 = vadd.f32 %v3071_v58, %v2933_v10  ;;  %v2593_v29 = vpop.f32.mrf.mxu0  ;;  %v2936_v26 = vpop.f32.mrf.mxu2  ;;  %v7882_v25 = vsub.f32 %v7880_v37, %v7881_v9  ;;  %v7884_v28 = vsub.f32 %v7175_v39, %v6926_v43 }
 0x3b0   : > { %v3850_v2 = vrot.slane %v3789_v49, 2  ;;  %v2594_v15 = vadd.f32 %v2593_v29, %v7883_v35  ;;  %v4216_v61 = vmul.f32 3.0, %v4200_v54  ;;  %v7885_v57 = vsub.f32 %v7188_v17, %v6965_v21 }
 0x3b1   : > { %v3431_v32 = vand.u32 2147483647, %v7882_v25  ;;  %v4214_v47 = vmul.f32 3.0, %v7884_v28  ;;  %v4152_v6 = vsub.f32 %v4136_v14, %v7047_v55  ;;  %v3482_v58 = vrot.slane %v7282_v3, 6  ;;  %v3075_v56 = vpop.f32.mrf.mxu3 }
 0x3b2   : > { %v4231_v51 = vsub.f32 %v7885_v57, %v7103_v12  ;;  %v3718_v50 = vrot.slane %v7196_v27, 6  ;;  %v2792_v63 = vadd.f32 %v2791_v52, %v2594_v15  ;;  %v3719_v41 = vrot.slane %v7218_v1, 6 }
 0x3b3   : > { %v3851_v44 = vsel %vm3263_vm3, %v3848_v46, %v3850_v2  ;;  %v4217_v43 = vmul.f32 3.0, %v4201_v11  ;;  %v3542_v20 = vsub.f32 %v7282_v3, %v3482_v58  ;;  %v3916_v5 = vmul.f32 3.0, %v7282_v3 }
 0x3b4   : > { %v3886_v24 = vadd.f32 %v3851_v44, %v3431_v32  ;;  %v4202_v21 = vsub.f32 %v4170_v38, %v7175_v39  ;;  %v2937_v12 = vadd.f32 %v2936_v26, %v2792_v63  ;;  %v4230_v55 = vsub.f32 %v4149_v33, %v4214_v47  ;;  %v2797_v39 = vpop.f32.mrf.mxu1 }
 0x3b5   : > { %v4232_v8 = vsub.f32 %v4151_v42, %v4216_v61  ;;  %v4233_v59 = vsub.f32 %v4152_v6, %v4217_v43  ;;  %v3614_v23 = vadd.f32 %v7224_v4, %v3542_v20  ;;  %v4247_v27 = vand.u32 2147483647, %v4231_v51  ;;  %v4171_v43 = vld [vmem:[#allocation2 + $0xe1] sm:$0xff] }
 0x3b6   : > { %v4261_v0 = vadd.f32 %v4245_v53, %v7071_v19  ;;  %v4283_v46 = vsel %vm733_vm0, %v7068_v48, 0.0  ;;  %v3076_v36 = vadd.f32 %v3075_v56, %v2937_v12  ;;  %v4246_v31 = vand.u32 2147483647, %v4230_v55  ;;  %v7886_v19 = vld [vmem:[#allocation62_spill] sm:$0xff] }
 0x3b7   : > { %v4248_v30 = vand.u32 2147483647, %v4232_v8  ;;  %v4249_v45 = vand.u32 2147483647, %v4233_v59  ;;  %v4094_v10 = vrot.slane %v7282_v3, 2  ;;  %v2598_v52 = vpop.f32.mrf.mxu0  ;;  %v4263_v33 = vadd.f32 %v4247_v27, %v7257_v7  ;;  %v2940_v53 = vpop.f32.mrf.mxu2 }
 0x3b8   : > { %v4284_v62 = vadd.f32 %v4283_v46, %v7057_v34  ;;  %v4285_v4 = vsel %vm733_vm0, %v4261_v0, 0.0  ;;  %v3917_v42 = vmul.f32 3.0, %v3076_v36  ;;  %v4095_v49 = vrot.slane %v3076_v36, 2 }
 0x3b9   : > { %v2599_v54 = vadd.f32 %v2598_v52, %v7886_v19  ;;  %v3483_v11 = vrot.slane %v3076_v36, 6  ;;  %v3994_v48 = vrot.slane %v3916_v5, 1  ;;  %v4262_v14 = vadd.f32 %v4246_v31, %v7250_v18  ;;  %v3079_v34 = vpop.f32.mrf.mxu3  ;;  %v7888_v52 = vld [vmem:[#allocation50_spill] sm:$0xff] }
 0x3ba   : > { %v4264_v29 = vadd.f32 %v4248_v30, %v3885_v16  ;;  %v4265_v26 = vadd.f32 %v4249_v45, %v3886_v24  ;;  %v3995_v37 = vrot.slane %v3917_v42, 1  ;;  %v4096_v7 = vsel %vm3263_vm3, %v4094_v10, %v4095_v49  ;;  %v7887_v10 = vld [vmem:[#allocation60_spill] sm:$0xff] }
 0x3bb   : > { %v2798_v9 = vadd.f32 %v2797_v39, %v2599_v54  ;;  %v3484_v25 = vsel %vm3454_vm5, %v3482_v58, %v3483_v11  ;;  %v3766_v2 = vsub.f32 %v3614_v23, %v3718_v50  ;;  %v4286_v35 = vadd.f32 %v4285_v4, %v4284_v62 }
 0x3bc   : > { %v3543_v32 = vsub.f32 %v3076_v36, %v3484_v25  ;;  %v4287_v15 = vsel %vm733_vm0, %v4262_v14, 0.0  ;;  %v3720_v28 = vsel %vm3454_vm5, %v3718_v50, %v3719_v41  ;;  %v3996_v18 = vsel %vm3142_vm4, %v3994_v48, %v3995_v37  ;;  %v7891_v48 = vld [vmem:[#allocation57_spill] sm:$0xff] }
 0x3bd   : > { %v2941_v38 = vadd.f32 %v2940_v53, %v2798_v9  ;;  %v4289_v16 = vsel %vm733_vm0, %v4263_v33, 0.0  ;;  %v4037_v61 = vadd.f32 %v3996_v18, %v7282_v3  ;;  %v4288_v57 = vadd.f32 %v4287_v15, %v4286_v35 }
 0x3be   : > { %v3615_v47 = vadd.f32 %v7254_v22, %v3543_v32  ;;  %v4218_v6 = vmul.f32 3.0, %v4202_v21  ;;  %v4291_v58 = vsel %vm733_vm0, %v4264_v29, 0.0  ;;  %v3790_v63 = vand.u32 2147483647, %v3766_v2 }
 0x3bf   : > { %v3080_v51 = vadd.f32 %v3079_v34, %v2941_v38  ;;  %v4137_v44 = vadd.f32 %v4096_v7, %v4037_v61  ;;  %v4290_v20 = vadd.f32 %v4289_v16, %v4288_v57  ;;  %v4293_v12 = vsel %vm733_vm0, %v4265_v26, 0.0 }
 0x3c0   : > { %v3767_v56 = vsub.f32 %v3615_v47, %v3720_v28  ;;  %v4203_v23 = vsub.f32 %v4171_v43, %v7044_v13  ;;  %v3852_v27 = vrot.slane %v3790_v63, 2 }
 0x3c1   : > { %v3544_v5 = vsub.f32 %v3080_v51, %v3483_v11  ;;  %v3918_v50 = vmul.f32 3.0, %v3080_v51  ;;  %v4097_v24 = vrot.slane %v3080_v51, 2  ;;  %v4153_v22 = vsub.f32 %v4137_v44, %v7263_v40  ;;  %v7890_v11 = vld [vmem:[#allocation65_spill] sm:$0xff] }
 0x3c2   : > { %v3791_v55 = vand.u32 2147483647, %v3767_v56  ;;  %v4292_v8 = vadd.f32 %v4291_v58, %v4290_v20  ;;  %v7889_v40 = vsub.f32 %v7887_v10, %v7888_v52  ;;  %v7892_v1 = vsub.f32 %v7890_v11, %v7891_v48 }
 0x3c3   : > { %v3616_v3 = vadd.f32 %v7271_v60, %v3544_v5  ;;  %v3997_v59 = vrot.slane %v3918_v50, 1  ;;  %v4098_v21 = vsel %vm3263_vm3, %v4095_v49, %v4097_v24  ;;  %v4234_v46 = vsub.f32 %v4153_v22, %v4218_v6 }
 0x3c4   : > { %v3853_v0 = vrot.slane %v3791_v55, 2  ;;  %v4294_v31 = vadd.f32 %v4293_v12, %v4292_v8  ;;  %v3432_v39 = vand.u32 2147483647, %v7889_v40  ;;  %v4219_v49 = vmul.f32 3.0, %v4203_v23 }
 0x3c5   : > { %v3768_v30 = vsub.f32 %v3616_v3, %v3719_v41  ;;  %v3998_v45 = vsel %vm3142_vm4, %v3995_v37, %v3997_v59  ;;  %v4250_v62 = vand.u32 2147483647, %v4234_v46  ;;  %v3433_v41 = vand.u32 2147483647, %v7892_v1 }
 0x3c6   : > { %v4038_v33 = vadd.f32 %v3998_v45, %v3076_v36  ;;  %v3854_v60 = vsel %vm3263_vm3, %v3852_v27, %v3853_v0  ;;  %v4308_v58 = vlaneseq }
 0x3c7   : > { %v3792_v4 = vand.u32 2147483647, %v3768_v30  ;;  %v3887_v42 = vadd.f32 %v3854_v60, %v3432_v39 }
 0x3c8   : > { %v4138_v13 = vadd.f32 %v4098_v21, %v4038_v33  ;;  %v4309_v56 = vshrl.u32 %v4308_v58, 7  ;;  %v4311_v63 = vand.u32 127, %v4308_v58 }
 0x3c9   : > { %v3855_v19 = vrot.slane %v3792_v4, 2  ;;  %v4266_v54 = vadd.f32 %v4250_v62, %v3887_v42 }
 0x3ca   : > { %v4154_v53 = vsub.f32 %v4138_v13, %v7188_v17  ;;  %v4312_v44 = vmul.u32 128, %v4309_v56 }
 0x3cb   : > { %v3856_v14 = vsel %vm3263_vm3, %v3853_v0, %v3855_v19  ;;  %v4295_v29 = vsel %vm733_vm0, %v4266_v54, 0.0 }
 0x3cc   : > { %v3888_v36 = vadd.f32 %v3856_v14, %v3433_v41  ;;  %v4235_v26 = vsub.f32 %v4154_v53, %v4219_v49  ;;  %v4296_v37 = vadd.f32 %v4295_v29, %v4294_v31  ;;  %v4313_v43 = vadd.s32 %v4312_v44, %v4311_v63 }
 0x3ce   : > { %v4251_v9 = vand.u32 2147483647, %v4235_v26  ;;  %vm4314_vm6 = vcmp.eq.s32.totalorder %v4313_v43, 0  ;;  %vm4317_vm7 = vcmp.eq.s32.totalorder %v4313_v43, 1 }
 0x3d0   : > { %v4267_v25 = vadd.f32 %v4251_v9, %v3888_v36 }
 0x3d2   : > { %v4297_v7 = vsel %vm733_vm0, %v4267_v25, 0.0 }
 0x3d3   : > { %v4298_v34 = vadd.f32 %v4297_v7, %v4296_v37 }
 0x3d5   : > { %4299 = vadd.xlane.f32.xlu0 %v4298_v34 }
 0x420   : > { %v766_v32 = vpop.xlane.xlu0 %765 }
 0x421   : > { %v767_v2 = vrot.slane %v766_v32, 4 }
 0x423   : > { %v768_v35 = vadd.f32 %v767_v2, %v766_v32 }
 0x425   : > { %v769_v15 = vrot.slane %v768_v35, 2 }
 0x427   : > { %v770_v38 = vadd.f32 %v769_v15, %v768_v35 }
 0x429   : > { %v771_v17 = vrot.slane %v770_v38, 1 }
 0x42b   : > { %v772_v28 = vadd.f32 %v771_v17, %v770_v38 }
 0x42d   : > { %4612 = vpush %v772_v28 }
 0x448   : > { %v4300_v18 = vpop.xlane.xlu0 %4299 }
 0x449   : > { %v4301_v16 = vrot.slane %v4300_v18, 4 }
 0x44b   : > { %v4302_v47 = vadd.f32 %v4301_v16, %v4300_v18 }
 0x44d   : > { %v4303_v61 = vrot.slane %v4302_v47, 2 }
 0x44f   : > { %v4304_v57 = vadd.f32 %v4303_v61, %v4302_v47 }
 0x451   : > { %v4305_v51 = vrot.slane %v4304_v57, 1 }
 0x453   : > { %v4306_v6 = vadd.f32 %v4305_v51, %v4304_v57 }
 0x455   : > { %4614 = vpush %v4306_v6 }
 0x45e   : > { %s4613_s1 = spop %4612 }
 0x45f   : > { %v4315_v20 = vstv %s4613_s1 }
 0x460   : > { %v4316_v50 = vsel %vm4314_vm6, %v4315_v20, 0.0 }
 0x486   : > { %s4615_s16 = spop %4614 }
 0x487   : > { %v4318_v5 = vstv %s4615_s16 }
 0x488   : > { %v4319_v24 = vsel %vm4317_vm7, %v4318_v5, 0.0 }
 0x489   : > { %v4320_v12 = vadd.f32 %v4319_v24, %v4316_v50 }
 0x48b   : > { %4321 = vst [vmem:[%s650_s19] sm:$0xff] %v4320_v12 }
 0x48c   : > { %4994 = shalt.err (!%p4991_p0)
}
 0x48d   : > { %4636 = dma.vmem_to_hbm [thread:$0]  (%p5201_p5), %s4337_s25, 128, %s4339_s17, %s4323_s30  }
 0x48e PF: > { %s7893_s24 = sld [smem:[#allocation25_spill]]  ;;  %p4665_p3 = pnand %p4569_p11, %p5166_p6 }
 0x48f   : > { %s7895_s18 = sld [smem:[#allocation28_spill]] }
 0x490   : > { %p4666_p7 = pneg %p4665_p3 }
 0x494   : > { %s4350_s22 = sand.u32 1, %s7893_s24  }
 0x495   : > { %s4351_s20 = scalar_lea.sflag [#allocation5], %s4350_s22 }
 0x496   : > { %5044 = dma.done.wait (%p4666_p7), %s4351_s20, 128  }
 0x497   : > { %5046 = vsyncadd (%p4666_p7), %s4351_s20, 4294967168  ;;  %s34_s10 = sadd.s32 1, %s7895_s18   ;;  %s7896_s11 = sld [smem:[#allocation26_spill]] }
 0x498   : > { %p31_p9 = scmp.ge.s32.totalorder %s34_s10, 4   ;;  %s7897_s29 = sld [smem:[#allocation31_spill]] }
 0x499   : > { %s7898_s30 = sld [smem:[#allocation27_spill]]  ;;  %s7900_s27 = smov %s5053_s28 }
 0x49a   : > { %s7899_s9 = sld [smem:[#allocation30_spill]]  ;;  %33 = sbr.rel (!%p31_p9) target bundleno = 17 (0x11), region = 169 }
 0x49d   : > { %s7901_s28 = smov %s7896_s11 }
 0x49f   :  { %4357 = vsyncpa [#allocation4], 1 }
 0x4a0   :  { %4359 = vsyncpa [#allocation4 + $0x1], 1 }
 0x4a1   :  { %4360 = vsyncpa [#allocation7], 1 }
 0x4a2   :  { %4362 = vsyncpa [#allocation7 + $0x1], 1 }
 0x4a3   :  { %4363 = vsyncpa [#allocation10], 1 }
 0x4a4   :  { %4365 = vsyncpa [#allocation10 + $0x1], 1 }
 0x4a5   :  { %4366 = vsyncpa [#allocation13], 1 }
 0x4a6   :  { %4368 = vsyncpa [#allocation13 + $0x1], 1 }
 0x4a7   :  { %4369 = vsyncpa [#allocation16], 1 }
 0x4a8   :  { %4370 = vsyncpa [#allocation5], 1 }
 0x4a9   :  { %4372 = vsyncpa [#allocation5 + $0x1], 1 }

</bundles_post_ra>
